<compile_context>
chip_gen: v7x
topology: tpu7x:2x2x1
jax: 0.10.0
libtpu: 0.0.40
codegen_flags: <defaults>
</compile_context>

<pallas_src>
import jax
import jax.numpy as jnp
from jax.experimental import pallas as pl
from jax.experimental.pallas import tpu as pltpu


# ---------------------------------------------------------------------------------
# Fixed small-network configuration (consistent with the module's structure).
# ---------------------------------------------------------------------------------
H = W = 16
CIN = 3
C1, C2 = 8, 16
H2, W2 = H // 2, W // 2            # 8, 8   (after maxpool1)
H4, W4 = H2 // 2, W2 // 2          # 4, 4   (after maxpool2)
H8, W8 = 2, 2                      # AdaptiveAvgPool2d target
D1, D2, NCLASS = 32, 32, 10
SLAB_W = 32                        # lane width of the packed parameter slab

# Parameter slab layout: (name, (rows, cols)) row-stacked in this order.
_LAYOUT = [
    ("w1",   (9 * CIN, C1)),        # conv1 weight, rows = (kh,kw,cin), cols = cout
    ("b1",   (1, C1)),
    ("g1",   (H * W, C1)),          # LN1 gamma in (h*w, c) layout
    ("be1",  (H * W, C1)),
    ("w2",   (9 * C1, C2)),
    ("b2",   (1, C2)),
    ("g2",   (H2 * W2, C2)),
    ("be2",  (H2 * W2, C2)),
    ("fc1w", (H8 * W8 * C2, D1)),   # flatten order folded in: row = sp*C2 + c
    ("fc1b", (1, D1)),
    ("fc2w", (D1, D2)),
    ("fc2b", (1, D2)),
    ("fc3w", (D2, NCLASS)),
    ("fc3b", (1, NCLASS)),
]
_SHAPES = dict(_LAYOUT)
_OFFSETS = {}
_off = 0
for _name, _shape in _LAYOUT:
    _OFFSETS[_name] = _off
    _off += _shape[0]
_TOTAL_ROWS = _off                 # 872


# ---------------------------------------------------------------------------------
# Fused kernel: conv1 -> LN -> ReLU -> maxpool -> conv2 -> LN -> ReLU ->
#               (maxpool + adaptive avgpool fused) -> fc1 -> ReLU -> fc2 -> ReLU -> fc3
# ---------------------------------------------------------------------------------
def _fused_vgg_ln_kernel(x_ref, p_ref, o_ref,
                         act1_ref, pad_ref, patch2_ref, act2_ref, flat_ref):
    f32 = jnp.float32
    eps = 1e-5
    N = x_ref.shape[0] // (H * W)              # batch (patch rows are (n,h,w))

    # Static slab slices (trace-time Python offsets -> zero-cost views).
    def prm(name):
        off = _OFFSETS[name]
        r, c = _SHAPES[name]
        return p_ref[off:off + r, 0:c]

    # LayerNorm([C,H,W]) (biased var, eps=1e-5) fused with the following ReLU.
    # Single pass: sum and sum-of-squares together (review item).
    def ln_relu(a, g, b, hw, c):
        a = a.reshape(N, hw, c)
        cnt = float(hw * c)
        s1 = jnp.sum(jnp.sum(a, axis=2, keepdims=True), axis=1, keepdims=True)
        s2 = jnp.sum(jnp.sum(a * a, axis=2, keepdims=True), axis=1, keepdims=True)
        mu = s1 / cnt
        var = s2 / cnt - mu * mu
        y = (a - mu) * jax.lax.rsqrt(var + eps) * g + b
        return jnp.maximum(y, 0.0)             # (N, hw, c)

    # 2x2 / stride-2 max pooling via strided VMEM reads; ref rows are ordered (n, h).
    # (Relies on even H so sample boundaries stay on even rows.)
    def maxpool2x2(ref, rows_out, wout):
        a = ref[pl.ds(0, rows_out, 2), pl.ds(0, wout, 2), :]
        b = ref[pl.ds(0, rows_out, 2), pl.ds(1, wout, 2), :]
        c = ref[pl.ds(1, rows_out, 2), pl.ds(0, wout, 2), :]
        d = ref[pl.ds(1, rows_out, 2), pl.ds(1, wout, 2), :]
        return jnp.maximum(jnp.maximum(a, b), jnp.maximum(c, d))

    # ---------------- block 1: conv (single dot on host im2col) -> LN -> ReLU -> pool
    a1 = jnp.dot(x_ref[...], prm("w1"), preferred_element_type=f32) + prm("b1")
    y1 = ln_relu(a1, prm("g1"), prm("be1"), H * W, C1)          # (N, H*W, C1)
    act1_ref[...] = y1.reshape(N * H, W, C1)
    p1 = maxpool2x2(act1_ref, N * H2, W2)                        # (N*H2, W2, C1)

    # ---------------- block 2: zero-pad border only, patch matrix, single dot --------
    pad_ref[:, 0:1, :, :] = jnp.zeros((N, 1, W2 + 2, C1), f32)
    pad_ref[:, H2 + 1:H2 + 2, :, :] = jnp.zeros((N, 1, W2 + 2, C1), f32)
    pad_ref[:, 1:H2 + 1, 0:1, :] = jnp.zeros((N, H2, 1, C1), f32)
    pad_ref[:, 1:H2 + 1, W2 + 1:W2 + 2, :] = jnp.zeros((N, H2, 1, C1), f32)
    pad_ref[:, 1:H2 + 1, 1:W2 + 1, :] = p1.reshape(N, H2, W2, C1)
    for t in range(9):                                           # 9 static slice stores
        kh, kw = t // 3, t % 3
        patch2_ref[:, t * C1:(t + 1) * C1] = (
            pad_ref[:, kh:kh + H2, kw:kw + W2, :].reshape(N * H2 * W2, C1))
    a2 = jnp.dot(patch2_ref[...], prm("w2"), preferred_element_type=f32) + prm("b2")
    y2 = ln_relu(a2, prm("g2"), prm("be2"), H2 * W2, C2)         # (N, H2*W2, C2)
    act2_ref[...] = y2.reshape(N * H2, W2, C2)

    # ------ maxpool2 + AdaptiveAvgPool2d((2,2)) fused: stride-4 reads of act2_ref ----
    def rd(r, cc):
        return act2_ref[pl.ds(r, N * H8, 4), pl.ds(cc, W8, 4), :]   # (N*H8, W8, C2)
    cells = []
    for a in range(2):
        for b in range(2):
            cells.append(jnp.maximum(
                jnp.maximum(rd(2 * a, 2 * b), rd(2 * a, 2 * b + 1)),
                jnp.maximum(rd(2 * a + 1, 2 * b), rd(2 * a + 1, 2 * b + 1))))
    p3 = (cells[0] + cells[1] + cells[2] + cells[3]) * 0.25       # (N*H8, W8, C2)

    # -------- classifier: flatten (NCHW order folded into fc1w) + 3 dense layers -----
    A = p3.reshape(N, H8 * W8, C2)                                # (n, sp=(h8,w8), c)
    for sp in range(H8 * W8):                                     # lane-contiguous slab
        flat_ref[:, sp * C2:(sp + 1) * C2] = A[:, sp, :]
    h1 = jnp.maximum(jnp.dot(flat_ref[...], prm("fc1w"),
                             preferred_element_type=f32) + prm("fc1b"), 0.0)
    h2 = jnp.maximum(jnp.dot(h1, prm("fc2w"),
                             preferred_element_type=f32) + prm("fc2b"), 0.0)
    o_ref[...] = (jnp.dot(h2, prm("fc3w"), preferred_element_type=f32)
                  + prm("fc3b")).astype(o_ref.dtype)


# ---------------------------------------------------------------------------------
# Host-side im2col for conv1 (folds the NCHW->NHWC transpose + zero-pad into the one
# input prelude fusion); row = (n,h,w), col = (kh,kw,cin).
# ---------------------------------------------------------------------------------
def _im2col_conv1(x_nchw):
    n = x_nchw.shape[0]
    x = jnp.transpose(x_nchw, (0, 2, 3, 1))                      # (N,H,W,CIN)
    xp = jnp.pad(x, ((0, 0), (1, 1), (1, 1), (0, 0)))
    taps = [xp[:, kh:kh + H, kw:kw + W, :] for kh in range(3) for kw in range(3)]
    return jnp.stack(taps, axis=3).reshape(n * H * W, 9 * CIN)   # (N*H*W, 27)


# ---------------------------------------------------------------------------------
# Wrapper: one pallas_call, no grid, everything resident in VMEM, 3 DMAs total.
# ---------------------------------------------------------------------------------
def proxy_vgg_ln_forward(pslab, x_nchw):
    assert x_nchw.shape[1:] == (CIN, H, W), x_nchw.shape
    n = x_nchw.shape[0]
    patches = _im2col_conv1(x_nchw)

    vmem = pl.BlockSpec(memory_space=pltpu.MemorySpace.VMEM)
    return pl.pallas_call(
        _fused_vgg_ln_kernel,
        out_shape=jax.ShapeDtypeStruct((n, NCLASS), jnp.float32),
        in_specs=[vmem, vmem],
        out_specs=vmem,
        scratch_shapes=[
            pltpu.VMEM((n * H, W, C1), jnp.float32),             # LN1/ReLU output
            pltpu.VMEM((n, H2 + 2, W2 + 2, C1), jnp.float32),    # zero-padded conv2 in
            pltpu.VMEM((n * H2 * W2, 9 * C1), jnp.float32),      # conv2 patch matrix
            pltpu.VMEM((n * H2, W2, C2), jnp.float32),           # LN2/ReLU output
            pltpu.VMEM((n, H8 * W8 * C2), jnp.float32),          # flattened avgpool
        ],
    )(patches, pslab)


# ---------------------------------------------------------------------------------
# Parameters: deterministic synthetic init in PyTorch-native layouts, plus a one-time
# host-side conversion + packing into the single (872, 32) slab the kernel expects.
# ---------------------------------------------------------------------------------
def init_params(key):
    ks = jax.random.split(key, 12)
    p = {}
    p["conv1_w"] = 0.1 * jax.random.normal(ks[0], (C1, CIN, 3, 3), jnp.float32)
    p["conv1_b"] = 0.01 * jax.random.normal(ks[1], (C1,), jnp.float32)
    p["ln1_g"] = 1.0 + 0.05 * jax.random.normal(ks[2], (C1, H, W), jnp.float32)
    p["ln1_b"] = 0.05 * jax.random.normal(ks[3], (C1, H, W), jnp.float32)
    p["conv2_w"] = 0.1 * jax.random.normal(ks[4], (C2, C1, 3, 3), jnp.float32)
    p["conv2_b"] = 0.01 * jax.random.normal(ks[5], (C2,), jnp.float32)
    p["ln2_g"] = 1.0 + 0.05 * jax.random.normal(ks[6], (C2, H2, W2), jnp.float32)
    p["ln2_b"] = 0.05 * jax.random.normal(ks[7], (C2, H2, W2), jnp.float32)
    p["fc1_w"] = 0.1 * jax.random.normal(ks[8], (D1, H8 * W8 * C2), jnp.float32)
    p["fc1_b"] = 0.01 * jax.random.normal(ks[9], (D1,), jnp.float32)
    p["fc2_w"] = 0.1 * jax.random.normal(ks[10], (D2, D1), jnp.float32)
    p["fc2_b"] = jnp.zeros((D2,), jnp.float32)
    p["fc3_w"] = 0.1 * jax.random.normal(ks[11], (NCLASS, D2), jnp.float32)
    p["fc3_b"] = jnp.zeros((NCLASS,), jnp.float32)
    return p


def prepare_params(p):
    """Host-side, one-time conversion + packing of PyTorch-layout params."""
    blk = {}
    # Conv2d weight (Cout,Cin,kh,kw) -> rows=(kh,kw,cin), cols=cout.
    blk["w1"] = jnp.transpose(p["conv1_w"], (2, 3, 1, 0)).reshape(9 * CIN, C1)
    blk["b1"] = p["conv1_b"].reshape(1, C1)
    blk["w2"] = jnp.transpose(p["conv2_w"], (2, 3, 1, 0)).reshape(9 * C1, C2)
    blk["b2"] = p["conv2_b"].reshape(1, C2)
    # LayerNorm affine (C,H,W) -> (H*W, C), matching the kernel's channels-last data.
    blk["g1"] = jnp.transpose(p["ln1_g"], (1, 2, 0)).reshape(H * W, C1)
    blk["be1"] = jnp.transpose(p["ln1_b"], (1, 2, 0)).reshape(H * W, C1)
    blk["g2"] = jnp.transpose(p["ln2_g"], (1, 2, 0)).reshape(H2 * W2, C2)
    blk["be2"] = jnp.transpose(p["ln2_b"], (1, 2, 0)).reshape(H2 * W2, C2)
    # fc1: torch.flatten index = c*(H8*W8) + sp  ->  kernel flat index = sp*C2 + c.
    wf = p["fc1_w"].reshape(D1, C2, H8 * W8)                   # (d, c, sp)
    blk["fc1w"] = jnp.transpose(wf, (2, 1, 0)).reshape(H8 * W8 * C2, D1)
    blk["fc1b"] = p["fc1_b"].reshape(1, D1)
    blk["fc2w"] = p["fc2_w"].T
    blk["fc2b"] = p["fc2_b"].reshape(1, D2)
    blk["fc3w"] = p["fc3_w"].T
    blk["fc3b"] = p["fc3_b"].reshape(1, NCLASS)
    parts = []
    for name, shape in _LAYOUT:
        a = blk[name]
        assert a.shape == shape, (name, a.shape, shape)
        parts.append(jnp.pad(a, ((0, 0), (0, SLAB_W - a.shape[1]))))
    slab = jnp.concatenate(parts, axis=0)
    assert slab.shape == (_TOTAL_ROWS, SLAB_W), slab.shape
    return slab

# TODO(synk): verbose/IB-noise/parametric-frequency/attenuate_HF/lambda/dropout_bn/
# channel-transfer side branches (torch RNG noise, torch.fft HF masking) are gated off
# by the default constructor flags and are not reproduced here.


if __name__ == "__main__":
    key = jax.random.PRNGKey(0)
    pkey, xkey = jax.random.split(key)
    params = init_params(pkey)
    pslab = prepare_params(params)                # one-time host-side packing
    x = jax.random.normal(xkey, (2, CIN, H, W), jnp.float32)   # NCHW, like PyTorch
    fwd = jax.jit(proxy_vgg_ln_forward)
    out = fwd(pslab, x)
    jax.block_until_ready(out)
    assert out.shape == (2, NCLASS), out.shape
    assert bool(jnp.all(jnp.isfinite(out)))
    print("KERNEL_OK")
</pallas_src>

<mosaic_0001>
module attributes {stable_mosaic.version = 11 : i64} {
  func.func @_fused_vgg_ln_kernel(%arg0: memref<512x27xf32, #tpu.memory_space<vmem>>, %arg1: memref<872x32xf32, #tpu.memory_space<vmem>>, %arg2: memref<2x10xf32, #tpu.memory_space<vmem>>, %arg3: memref<32x16x8xf32, #tpu.memory_space<vmem>>, %arg4: memref<2x10x10x8xf32, #tpu.memory_space<vmem>>, %arg5: memref<128x72xf32, #tpu.memory_space<vmem>>, %arg6: memref<16x8x16xf32, #tpu.memory_space<vmem>>, %arg7: memref<2x64xf32, #tpu.memory_space<vmem>>) attributes {dimension_semantics = [], scalar_prefetch = 0 : i64, scratch_operands = 5 : i64, tpu.core_type = #tpu.core_type<tc>} {
    %c0 = arith.constant 0 : index
    %c0_0 = arith.constant 0 : index
    %0 = vector.load %arg0[%c0, %c0_0] : memref<512x27xf32, #tpu.memory_space<vmem>>, vector<512x27xf32>
    %c0_1 = arith.constant 0 : index
    %c0_2 = arith.constant 0 : index
    %1 = vector.load %arg1[%c0_1, %c0_2] : memref<872x32xf32, #tpu.memory_space<vmem>>, vector<27x8xf32>
    %cst = arith.constant dense<0.000000e+00> : vector<512x8xf32>
    %2 = tpu.matmul %0, %1, %cst {dimension_numbers = #tpu.dot_dimension_numbers<[1], [0], [0], [1], [0, 0, 1, 1], [], []>} : vector<512x27xf32>, vector<27x8xf32>, vector<512x8xf32> -> vector<512x8xf32>
    %c27 = arith.constant 27 : index
    %c0_3 = arith.constant 0 : index
    %3 = vector.load %arg1[%c27, %c0_3] : memref<872x32xf32, #tpu.memory_space<vmem>>, vector<1x8xf32>
    %4 = vector.broadcast %3 : vector<1x8xf32> to vector<512x8xf32>
    %5 = arith.addf %2, %4 : vector<512x8xf32>
    %c28 = arith.constant 28 : index
    %c0_4 = arith.constant 0 : index
    %6 = vector.load %arg1[%c28, %c0_4] : memref<872x32xf32, #tpu.memory_space<vmem>>, vector<256x8xf32>
    %c284 = arith.constant 284 : index
    %c0_5 = arith.constant 0 : index
    %7 = vector.load %arg1[%c284, %c0_5] : memref<872x32xf32, #tpu.memory_space<vmem>>, vector<256x8xf32>
    %8 = vector.shape_cast %5 : vector<512x8xf32> to vector<2x256x8xf32>
    %cst_6 = arith.constant dense<0.000000e+00> : vector<2x256xf32>
    %9 = vector.multi_reduction <add>, %8, %cst_6 [2] : vector<2x256x8xf32> to vector<2x256xf32>
    %10 = vector.shape_cast %9 : vector<2x256xf32> to vector<2x256x1xf32>
    %cst_7 = arith.constant dense<0.000000e+00> : vector<2x1xf32>
    %11 = vector.multi_reduction <add>, %10, %cst_7 [1] : vector<2x256x1xf32> to vector<2x1xf32>
    %12 = vector.shape_cast %11 : vector<2x1xf32> to vector<2x1x1xf32>
    %13 = arith.mulf %8, %8 : vector<2x256x8xf32>
    %cst_8 = arith.constant dense<0.000000e+00> : vector<2x256xf32>
    %14 = vector.multi_reduction <add>, %13, %cst_8 [2] : vector<2x256x8xf32> to vector<2x256xf32>
    %15 = vector.shape_cast %14 : vector<2x256xf32> to vector<2x256x1xf32>
    %cst_9 = arith.constant dense<0.000000e+00> : vector<2x1xf32>
    %16 = vector.multi_reduction <add>, %15, %cst_9 [1] : vector<2x256x1xf32> to vector<2x1xf32>
    %17 = vector.shape_cast %16 : vector<2x1xf32> to vector<2x1x1xf32>
    %cst_10 = arith.constant 2.048000e+03 : f32
    %18 = vector.broadcast %cst_10 : f32 to vector<2x1x1xf32>
    %19 = arith.divf %12, %18 : vector<2x1x1xf32>
    %cst_11 = arith.constant 2.048000e+03 : f32
    %20 = vector.broadcast %cst_11 : f32 to vector<2x1x1xf32>
    %21 = arith.divf %17, %20 : vector<2x1x1xf32>
    %22 = arith.mulf %19, %19 : vector<2x1x1xf32>
    %23 = arith.subf %21, %22 : vector<2x1x1xf32>
    %24 = vector.broadcast %19 : vector<2x1x1xf32> to vector<2x256x8xf32>
    %25 = arith.subf %8, %24 : vector<2x256x8xf32>
    %cst_12 = arith.constant 9.99999974E-6 : f32
    %26 = vector.broadcast %cst_12 : f32 to vector<2x1x1xf32>
    %27 = arith.addf %23, %26 : vector<2x1x1xf32>
    %28 = math.rsqrt %27 : vector<2x1x1xf32>
    %29 = vector.broadcast %28 : vector<2x1x1xf32> to vector<2x256x8xf32>
    %30 = arith.mulf %25, %29 : vector<2x256x8xf32>
    %31 = vector.shape_cast %6 : vector<256x8xf32> to vector<1x256x8xf32>
    %32 = vector.broadcast %31 : vector<1x256x8xf32> to vector<2x256x8xf32>
    %33 = arith.mulf %30, %32 : vector<2x256x8xf32>
    %34 = vector.shape_cast %7 : vector<256x8xf32> to vector<1x256x8xf32>
    %35 = vector.broadcast %34 : vector<1x256x8xf32> to vector<2x256x8xf32>
    %36 = arith.addf %33, %35 : vector<2x256x8xf32>
    %cst_13 = arith.constant 0.000000e+00 : f32
    %37 = vector.broadcast %cst_13 : f32 to vector<2x256x8xf32>
    %38 = arith.maximumf %36, %37 : vector<2x256x8xf32>
    %39 = vector.shape_cast %38 : vector<2x256x8xf32> to vector<32x16x8xf32>
    %c0_14 = arith.constant 0 : index
    %c0_15 = arith.constant 0 : index
    %c0_16 = arith.constant 0 : index
    %40 = vector.load %arg3[%c0_14, %c0_15, %c0_16] : memref<32x16x8xf32, #tpu.memory_space<vmem>>, vector<32x16x8xf32>
    tpu.vector_store %arg3[%c0_14, %c0_15, %c0_16], %39 {strides = array<i32>} : memref<32x16x8xf32, #tpu.memory_space<vmem>>, vector<32x16x8xf32>,
    %c0_17 = arith.constant 0 : index
    %c0_18 = arith.constant 0 : index
    %c0_19 = arith.constant 0 : index
    %41 = tpu.strided_load %arg3[%c0_17, %c0_18, %c0_19] {strides = array<i32: 2, 2, 1>} : memref<32x16x8xf32, #tpu.memory_space<vmem>>, vector<16x8x8xf32>
    %c0_20 = arith.constant 0 : index
    %c1 = arith.constant 1 : index
    %c0_21 = arith.constant 0 : index
    %42 = tpu.strided_load %arg3[%c0_20, %c1, %c0_21] {strides = array<i32: 2, 2, 1>} : memref<32x16x8xf32, #tpu.memory_space<vmem>>, vector<16x8x8xf32>
    %c1_22 = arith.constant 1 : index
    %c0_23 = arith.constant 0 : index
    %c0_24 = arith.constant 0 : index
    %43 = tpu.strided_load %arg3[%c1_22, %c0_23, %c0_24] {strides = array<i32: 2, 2, 1>} : memref<32x16x8xf32, #tpu.memory_space<vmem>>, vector<16x8x8xf32>
    %c1_25 = arith.constant 1 : index
    %c1_26 = arith.constant 1 : index
    %c0_27 = arith.constant 0 : index
    %44 = tpu.strided_load %arg3[%c1_25, %c1_26, %c0_27] {strides = array<i32: 2, 2, 1>} : memref<32x16x8xf32, #tpu.memory_space<vmem>>, vector<16x8x8xf32>
    %45 = arith.maximumf %41, %42 : vector<16x8x8xf32>
    %46 = arith.maximumf %43, %44 : vector<16x8x8xf32>
    %47 = arith.maximumf %45, %46 : vector<16x8x8xf32>
    %cst_28 = arith.constant 0.000000e+00 : f32
    %48 = vector.broadcast %cst_28 : f32 to vector<2x1x10x8xf32>
    %c0_29 = arith.constant 0 : index
    %c0_30 = arith.constant 0 : index
    %c0_31 = arith.constant 0 : index
    %c0_32 = arith.constant 0 : index
    %49 = vector.load %arg4[%c0_29, %c0_30, %c0_31, %c0_32] : memref<2x10x10x8xf32, #tpu.memory_space<vmem>>, vector<2x1x10x8xf32>
    tpu.vector_store %arg4[%c0_29, %c0_30, %c0_31, %c0_32], %48 {strides = array<i32>} : memref<2x10x10x8xf32, #tpu.memory_space<vmem>>, vector<2x1x10x8xf32>,
    %cst_33 = arith.constant 0.000000e+00 : f32
    %50 = vector.broadcast %cst_33 : f32 to vector<2x1x10x8xf32>
    %c0_34 = arith.constant 0 : index
    %c9 = arith.constant 9 : index
    %c0_35 = arith.constant 0 : index
    %c0_36 = arith.constant 0 : index
    %51 = vector.load %arg4[%c0_34, %c9, %c0_35, %c0_36] : memref<2x10x10x8xf32, #tpu.memory_space<vmem>>, vector<2x1x10x8xf32>
    tpu.vector_store %arg4[%c0_34, %c9, %c0_35, %c0_36], %50 {strides = array<i32>} : memref<2x10x10x8xf32, #tpu.memory_space<vmem>>, vector<2x1x10x8xf32>,
    %cst_37 = arith.constant 0.000000e+00 : f32
    %52 = vector.broadcast %cst_37 : f32 to vector<2x8x1x8xf32>
    %c0_38 = arith.constant 0 : index
    %c1_39 = arith.constant 1 : index
    %c0_40 = arith.constant 0 : index
    %c0_41 = arith.constant 0 : index
    %53 = vector.load %arg4[%c0_38, %c1_39, %c0_40, %c0_41] : memref<2x10x10x8xf32, #tpu.memory_space<vmem>>, vector<2x8x1x8xf32>
    tpu.vector_store %arg4[%c0_38, %c1_39, %c0_40, %c0_41], %52 {strides = array<i32>} : memref<2x10x10x8xf32, #tpu.memory_space<vmem>>, vector<2x8x1x8xf32>,
    %cst_42 = arith.constant 0.000000e+00 : f32
    %54 = vector.broadcast %cst_42 : f32 to vector<2x8x1x8xf32>
    %c0_43 = arith.constant 0 : index
    %c1_44 = arith.constant 1 : index
    %c9_45 = arith.constant 9 : index
    %c0_46 = arith.constant 0 : index
    %55 = vector.load %arg4[%c0_43, %c1_44, %c9_45, %c0_46] : memref<2x10x10x8xf32, #tpu.memory_space<vmem>>, vector<2x8x1x8xf32>
    tpu.vector_store %arg4[%c0_43, %c1_44, %c9_45, %c0_46], %54 {strides = array<i32>} : memref<2x10x10x8xf32, #tpu.memory_space<vmem>>, vector<2x8x1x8xf32>,
    %56 = vector.shape_cast %47 : vector<16x8x8xf32> to vector<2x8x8x8xf32>
    %c0_47 = arith.constant 0 : index
    %c1_48 = arith.constant 1 : index
    %c1_49 = arith.constant 1 : index
    %c0_50 = arith.constant 0 : index
    %57 = vector.load %arg4[%c0_47, %c1_48, %c1_49, %c0_50] : memref<2x10x10x8xf32, #tpu.memory_space<vmem>>, vector<2x8x8x8xf32>
    tpu.vector_store %arg4[%c0_47, %c1_48, %c1_49, %c0_50], %56 {strides = array<i32>} : memref<2x10x10x8xf32, #tpu.memory_space<vmem>>, vector<2x8x8x8xf32>,
    %c0_51 = arith.constant 0 : index
    %c0_52 = arith.constant 0 : index
    %c0_53 = arith.constant 0 : index
    %c0_54 = arith.constant 0 : index
    %58 = vector.load %arg4[%c0_51, %c0_52, %c0_53, %c0_54] : memref<2x10x10x8xf32, #tpu.memory_space<vmem>>, vector<2x8x8x8xf32>
    %59 = vector.shape_cast %58 : vector<2x8x8x8xf32> to vector<128x8xf32>
    %c0_55 = arith.constant 0 : index
    %c0_56 = arith.constant 0 : index
    %60 = vector.load %arg5[%c0_55, %c0_56] : memref<128x72xf32, #tpu.memory_space<vmem>>, vector<128x8xf32>
    tpu.vector_store %arg5[%c0_55, %c0_56], %59 {strides = array<i32>} : memref<128x72xf32, #tpu.memory_space<vmem>>, vector<128x8xf32>,
    %c0_57 = arith.constant 0 : index
    %c0_58 = arith.constant 0 : index
    %c1_59 = arith.constant 1 : index
    %c0_60 = arith.constant 0 : index
    %61 = vector.load %arg4[%c0_57, %c0_58, %c1_59, %c0_60] : memref<2x10x10x8xf32, #tpu.memory_space<vmem>>, vector<2x8x8x8xf32>
    %62 = vector.shape_cast %61 : vector<2x8x8x8xf32> to vector<128x8xf32>
    %c0_61 = arith.constant 0 : index
    %c8 = arith.constant 8 : index
    %63 = vector.load %arg5[%c0_61, %c8] : memref<128x72xf32, #tpu.memory_space<vmem>>, vector<128x8xf32>
    tpu.vector_store %arg5[%c0_61, %c8], %62 {strides = array<i32>} : memref<128x72xf32, #tpu.memory_space<vmem>>, vector<128x8xf32>,
    %c0_62 = arith.constant 0 : index
    %c0_63 = arith.constant 0 : index
    %c2 = arith.constant 2 : index
    %c0_64 = arith.constant 0 : index
    %64 = vector.load %arg4[%c0_62, %c0_63, %c2, %c0_64] : memref<2x10x10x8xf32, #tpu.memory_space<vmem>>, vector<2x8x8x8xf32>
    %65 = vector.shape_cast %64 : vector<2x8x8x8xf32> to vector<128x8xf32>
    %c0_65 = arith.constant 0 : index
    %c16 = arith.constant 16 : index
    %66 = vector.load %arg5[%c0_65, %c16] : memref<128x72xf32, #tpu.memory_space<vmem>>, vector<128x8xf32>
    tpu.vector_store %arg5[%c0_65, %c16], %65 {strides = array<i32>} : memref<128x72xf32, #tpu.memory_space<vmem>>, vector<128x8xf32>,
    %c0_66 = arith.constant 0 : index
    %c1_67 = arith.constant 1 : index
    %c0_68 = arith.constant 0 : index
    %c0_69 = arith.constant 0 : index
    %67 = vector.load %arg4[%c0_66, %c1_67, %c0_68, %c0_69] : memref<2x10x10x8xf32, #tpu.memory_space<vmem>>, vector<2x8x8x8xf32>
    %68 = vector.shape_cast %67 : vector<2x8x8x8xf32> to vector<128x8xf32>
    %c0_70 = arith.constant 0 : index
    %c24 = arith.constant 24 : index
    %69 = vector.load %arg5[%c0_70, %c24] : memref<128x72xf32, #tpu.memory_space<vmem>>, vector<128x8xf32>
    tpu.vector_store %arg5[%c0_70, %c24], %68 {strides = array<i32>} : memref<128x72xf32, #tpu.memory_space<vmem>>, vector<128x8xf32>,
    %c0_71 = arith.constant 0 : index
    %c1_72 = arith.constant 1 : index
    %c1_73 = arith.constant 1 : index
    %c0_74 = arith.constant 0 : index
    %70 = vector.load %arg4[%c0_71, %c1_72, %c1_73, %c0_74] : memref<2x10x10x8xf32, #tpu.memory_space<vmem>>, vector<2x8x8x8xf32>
    %71 = vector.shape_cast %70 : vector<2x8x8x8xf32> to vector<128x8xf32>
    %c0_75 = arith.constant 0 : index
    %c32 = arith.constant 32 : index
    %72 = vector.load %arg5[%c0_75, %c32] : memref<128x72xf32, #tpu.memory_space<vmem>>, vector<128x8xf32>
    tpu.vector_store %arg5[%c0_75, %c32], %71 {strides = array<i32>} : memref<128x72xf32, #tpu.memory_space<vmem>>, vector<128x8xf32>,
    %c0_76 = arith.constant 0 : index
    %c1_77 = arith.constant 1 : index
    %c2_78 = arith.constant 2 : index
    %c0_79 = arith.constant 0 : index
    %73 = vector.load %arg4[%c0_76, %c1_77, %c2_78, %c0_79] : memref<2x10x10x8xf32, #tpu.memory_space<vmem>>, vector<2x8x8x8xf32>
    %74 = vector.shape_cast %73 : vector<2x8x8x8xf32> to vector<128x8xf32>
    %c0_80 = arith.constant 0 : index
    %c40 = arith.constant 40 : index
    %75 = vector.load %arg5[%c0_80, %c40] : memref<128x72xf32, #tpu.memory_space<vmem>>, vector<128x8xf32>
    tpu.vector_store %arg5[%c0_80, %c40], %74 {strides = array<i32>} : memref<128x72xf32, #tpu.memory_space<vmem>>, vector<128x8xf32>,
    %c0_81 = arith.constant 0 : index
    %c2_82 = arith.constant 2 : index
    %c0_83 = arith.constant 0 : index
    %c0_84 = arith.constant 0 : index
    %76 = vector.load %arg4[%c0_81, %c2_82, %c0_83, %c0_84] : memref<2x10x10x8xf32, #tpu.memory_space<vmem>>, vector<2x8x8x8xf32>
    %77 = vector.shape_cast %76 : vector<2x8x8x8xf32> to vector<128x8xf32>
    %c0_85 = arith.constant 0 : index
    %c48 = arith.constant 48 : index
    %78 = vector.load %arg5[%c0_85, %c48] : memref<128x72xf32, #tpu.memory_space<vmem>>, vector<128x8xf32>
    tpu.vector_store %arg5[%c0_85, %c48], %77 {strides = array<i32>} : memref<128x72xf32, #tpu.memory_space<vmem>>, vector<128x8xf32>,
    %c0_86 = arith.constant 0 : index
    %c2_87 = arith.constant 2 : index
    %c1_88 = arith.constant 1 : index
    %c0_89 = arith.constant 0 : index
    %79 = vector.load %arg4[%c0_86, %c2_87, %c1_88, %c0_89] : memref<2x10x10x8xf32, #tpu.memory_space<vmem>>, vector<2x8x8x8xf32>
    %80 = vector.shape_cast %79 : vector<2x8x8x8xf32> to vector<128x8xf32>
    %c0_90 = arith.constant 0 : index
    %c56 = arith.constant 56 : index
    %81 = vector.load %arg5[%c0_90, %c56] : memref<128x72xf32, #tpu.memory_space<vmem>>, vector<128x8xf32>
    tpu.vector_store %arg5[%c0_90, %c56], %80 {strides = array<i32>} : memref<128x72xf32, #tpu.memory_space<vmem>>, vector<128x8xf32>,
    %c0_91 = arith.constant 0 : index
    %c2_92 = arith.constant 2 : index
    %c2_93 = arith.constant 2 : index
    %c0_94 = arith.constant 0 : index
    %82 = vector.load %arg4[%c0_91, %c2_92, %c2_93, %c0_94] : memref<2x10x10x8xf32, #tpu.memory_space<vmem>>, vector<2x8x8x8xf32>
    %83 = vector.shape_cast %82 : vector<2x8x8x8xf32> to vector<128x8xf32>
    %c0_95 = arith.constant 0 : index
    %c64 = arith.constant 64 : index
    %84 = vector.load %arg5[%c0_95, %c64] : memref<128x72xf32, #tpu.memory_space<vmem>>, vector<128x8xf32>
    tpu.vector_store %arg5[%c0_95, %c64], %83 {strides = array<i32>} : memref<128x72xf32, #tpu.memory_space<vmem>>, vector<128x8xf32>,
    %c0_96 = arith.constant 0 : index
    %c0_97 = arith.constant 0 : index
    %85 = vector.load %arg5[%c0_96, %c0_97] : memref<128x72xf32, #tpu.memory_space<vmem>>, vector<128x72xf32>
    %c540 = arith.constant 540 : index
    %c0_98 = arith.constant 0 : index
    %86 = vector.load %arg1[%c540, %c0_98] : memref<872x32xf32, #tpu.memory_space<vmem>>, vector<72x16xf32>
    %cst_99 = arith.constant dense<0.000000e+00> : vector<128x16xf32>
    %87 = tpu.matmul %85, %86, %cst_99 {dimension_numbers = #tpu.dot_dimension_numbers<[1], [0], [0], [1], [0, 0, 1, 1], [], []>} : vector<128x72xf32>, vector<72x16xf32>, vector<128x16xf32> -> vector<128x16xf32>
    %c612 = arith.constant 612 : index
    %c0_100 = arith.constant 0 : index
    %88 = vector.load %arg1[%c612, %c0_100] : memref<872x32xf32, #tpu.memory_space<vmem>>, vector<1x16xf32>
    %89 = vector.broadcast %88 : vector<1x16xf32> to vector<128x16xf32>
    %90 = arith.addf %87, %89 : vector<128x16xf32>
    %c613 = arith.constant 613 : index
    %c0_101 = arith.constant 0 : index
    %91 = vector.load %arg1[%c613, %c0_101] : memref<872x32xf32, #tpu.memory_space<vmem>>, vector<64x16xf32>
    %c677 = arith.constant 677 : index
    %c0_102 = arith.constant 0 : index
    %92 = vector.load %arg1[%c677, %c0_102] : memref<872x32xf32, #tpu.memory_space<vmem>>, vector<64x16xf32>
    %93 = vector.shape_cast %90 : vector<128x16xf32> to vector<2x64x16xf32>
    %cst_103 = arith.constant dense<0.000000e+00> : vector<2x64xf32>
    %94 = vector.multi_reduction <add>, %93, %cst_103 [2] : vector<2x64x16xf32> to vector<2x64xf32>
    %95 = vector.shape_cast %94 : vector<2x64xf32> to vector<2x64x1xf32>
    %cst_104 = arith.constant dense<0.000000e+00> : vector<2x1xf32>
    %96 = vector.multi_reduction <add>, %95, %cst_104 [1] : vector<2x64x1xf32> to vector<2x1xf32>
    %97 = vector.shape_cast %96 : vector<2x1xf32> to vector<2x1x1xf32>
    %98 = arith.mulf %93, %93 : vector<2x64x16xf32>
    %cst_105 = arith.constant dense<0.000000e+00> : vector<2x64xf32>
    %99 = vector.multi_reduction <add>, %98, %cst_105 [2] : vector<2x64x16xf32> to vector<2x64xf32>
    %100 = vector.shape_cast %99 : vector<2x64xf32> to vector<2x64x1xf32>
    %cst_106 = arith.constant dense<0.000000e+00> : vector<2x1xf32>
    %101 = vector.multi_reduction <add>, %100, %cst_106 [1] : vector<2x64x1xf32> to vector<2x1xf32>
    %102 = vector.shape_cast %101 : vector<2x1xf32> to vector<2x1x1xf32>
    %cst_107 = arith.constant 1.024000e+03 : f32
    %103 = vector.broadcast %cst_107 : f32 to vector<2x1x1xf32>
    %104 = arith.divf %97, %103 : vector<2x1x1xf32>
    %cst_108 = arith.constant 1.024000e+03 : f32
    %105 = vector.broadcast %cst_108 : f32 to vector<2x1x1xf32>
    %106 = arith.divf %102, %105 : vector<2x1x1xf32>
    %107 = arith.mulf %104, %104 : vector<2x1x1xf32>
    %108 = arith.subf %106, %107 : vector<2x1x1xf32>
    %109 = vector.broadcast %104 : vector<2x1x1xf32> to vector<2x64x16xf32>
    %110 = arith.subf %93, %109 : vector<2x64x16xf32>
    %cst_109 = arith.constant 9.99999974E-6 : f32
    %111 = vector.broadcast %cst_109 : f32 to vector<2x1x1xf32>
    %112 = arith.addf %108, %111 : vector<2x1x1xf32>
    %113 = math.rsqrt %112 : vector<2x1x1xf32>
    %114 = vector.broadcast %113 : vector<2x1x1xf32> to vector<2x64x16xf32>
    %115 = arith.mulf %110, %114 : vector<2x64x16xf32>
    %116 = vector.shape_cast %91 : vector<64x16xf32> to vector<1x64x16xf32>
    %117 = vector.broadcast %116 : vector<1x64x16xf32> to vector<2x64x16xf32>
    %118 = arith.mulf %115, %117 : vector<2x64x16xf32>
    %119 = vector.shape_cast %92 : vector<64x16xf32> to vector<1x64x16xf32>
    %120 = vector.broadcast %119 : vector<1x64x16xf32> to vector<2x64x16xf32>
    %121 = arith.addf %118, %120 : vector<2x64x16xf32>
    %cst_110 = arith.constant 0.000000e+00 : f32
    %122 = vector.broadcast %cst_110 : f32 to vector<2x64x16xf32>
    %123 = arith.maximumf %121, %122 : vector<2x64x16xf32>
    %124 = vector.shape_cast %123 : vector<2x64x16xf32> to vector<16x8x16xf32>
    %c0_111 = arith.constant 0 : index
    %c0_112 = arith.constant 0 : index
    %c0_113 = arith.constant 0 : index
    %125 = vector.load %arg6[%c0_111, %c0_112, %c0_113] : memref<16x8x16xf32, #tpu.memory_space<vmem>>, vector<16x8x16xf32>
    tpu.vector_store %arg6[%c0_111, %c0_112, %c0_113], %124 {strides = array<i32>} : memref<16x8x16xf32, #tpu.memory_space<vmem>>, vector<16x8x16xf32>,
    %c0_114 = arith.constant 0 : index
    %c0_115 = arith.constant 0 : index
    %c0_116 = arith.constant 0 : index
    %126 = tpu.strided_load %arg6[%c0_114, %c0_115, %c0_116] {strides = array<i32: 4, 4, 1>} : memref<16x8x16xf32, #tpu.memory_space<vmem>>, vector<4x2x16xf32>
    %c0_117 = arith.constant 0 : index
    %c1_118 = arith.constant 1 : index
    %c0_119 = arith.constant 0 : index
    %127 = tpu.strided_load %arg6[%c0_117, %c1_118, %c0_119] {strides = array<i32: 4, 4, 1>} : memref<16x8x16xf32, #tpu.memory_space<vmem>>, vector<4x2x16xf32>
    %128 = arith.maximumf %126, %127 : vector<4x2x16xf32>
    %c1_120 = arith.constant 1 : index
    %c0_121 = arith.constant 0 : index
    %c0_122 = arith.constant 0 : index
    %129 = tpu.strided_load %arg6[%c1_120, %c0_121, %c0_122] {strides = array<i32: 4, 4, 1>} : memref<16x8x16xf32, #tpu.memory_space<vmem>>, vector<4x2x16xf32>
    %c1_123 = arith.constant 1 : index
    %c1_124 = arith.constant 1 : index
    %c0_125 = arith.constant 0 : index
    %130 = tpu.strided_load %arg6[%c1_123, %c1_124, %c0_125] {strides = array<i32: 4, 4, 1>} : memref<16x8x16xf32, #tpu.memory_space<vmem>>, vector<4x2x16xf32>
    %131 = arith.maximumf %129, %130 : vector<4x2x16xf32>
    %132 = arith.maximumf %128, %131 : vector<4x2x16xf32>
    %c0_126 = arith.constant 0 : index
    %c2_127 = arith.constant 2 : index
    %c0_128 = arith.constant 0 : index
    %133 = tpu.strided_load %arg6[%c0_126, %c2_127, %c0_128] {strides = array<i32: 4, 4, 1>} : memref<16x8x16xf32, #tpu.memory_space<vmem>>, vector<4x2x16xf32>
    %c0_129 = arith.constant 0 : index
    %c3 = arith.constant 3 : index
    %c0_130 = arith.constant 0 : index
    %134 = tpu.strided_load %arg6[%c0_129, %c3, %c0_130] {strides = array<i32: 4, 4, 1>} : memref<16x8x16xf32, #tpu.memory_space<vmem>>, vector<4x2x16xf32>
    %135 = arith.maximumf %133, %134 : vector<4x2x16xf32>
    %c1_131 = arith.constant 1 : index
    %c2_132 = arith.constant 2 : index
    %c0_133 = arith.constant 0 : index
    %136 = tpu.strided_load %arg6[%c1_131, %c2_132, %c0_133] {strides = array<i32: 4, 4, 1>} : memref<16x8x16xf32, #tpu.memory_space<vmem>>, vector<4x2x16xf32>
    %c1_134 = arith.constant 1 : index
    %c3_135 = arith.constant 3 : index
    %c0_136 = arith.constant 0 : index
    %137 = tpu.strided_load %arg6[%c1_134, %c3_135, %c0_136] {strides = array<i32: 4, 4, 1>} : memref<16x8x16xf32, #tpu.memory_space<vmem>>, vector<4x2x16xf32>
    %138 = arith.maximumf %136, %137 : vector<4x2x16xf32>
    %139 = arith.maximumf %135, %138 : vector<4x2x16xf32>
    %c2_137 = arith.constant 2 : index
    %c0_138 = arith.constant 0 : index
    %c0_139 = arith.constant 0 : index
    %140 = tpu.strided_load %arg6[%c2_137, %c0_138, %c0_139] {strides = array<i32: 4, 4, 1>} : memref<16x8x16xf32, #tpu.memory_space<vmem>>, vector<4x2x16xf32>
    %c2_140 = arith.constant 2 : index
    %c1_141 = arith.constant 1 : index
    %c0_142 = arith.constant 0 : index
    %141 = tpu.strided_load %arg6[%c2_140, %c1_141, %c0_142] {strides = array<i32: 4, 4, 1>} : memref<16x8x16xf32, #tpu.memory_space<vmem>>, vector<4x2x16xf32>
    %142 = arith.maximumf %140, %141 : vector<4x2x16xf32>
    %c3_143 = arith.constant 3 : index
    %c0_144 = arith.constant 0 : index
    %c0_145 = arith.constant 0 : index
    %143 = tpu.strided_load %arg6[%c3_143, %c0_144, %c0_145] {strides = array<i32: 4, 4, 1>} : memref<16x8x16xf32, #tpu.memory_space<vmem>>, vector<4x2x16xf32>
    %c3_146 = arith.constant 3 : index
    %c1_147 = arith.constant 1 : index
    %c0_148 = arith.constant 0 : index
    %144 = tpu.strided_load %arg6[%c3_146, %c1_147, %c0_148] {strides = array<i32: 4, 4, 1>} : memref<16x8x16xf32, #tpu.memory_space<vmem>>, vector<4x2x16xf32>
    %145 = arith.maximumf %143, %144 : vector<4x2x16xf32>
    %146 = arith.maximumf %142, %145 : vector<4x2x16xf32>
    %c2_149 = arith.constant 2 : index
    %c2_150 = arith.constant 2 : index
    %c0_151 = arith.constant 0 : index
    %147 = tpu.strided_load %arg6[%c2_149, %c2_150, %c0_151] {strides = array<i32: 4, 4, 1>} : memref<16x8x16xf32, #tpu.memory_space<vmem>>, vector<4x2x16xf32>
    %c2_152 = arith.constant 2 : index
    %c3_153 = arith.constant 3 : index
    %c0_154 = arith.constant 0 : index
    %148 = tpu.strided_load %arg6[%c2_152, %c3_153, %c0_154] {strides = array<i32: 4, 4, 1>} : memref<16x8x16xf32, #tpu.memory_space<vmem>>, vector<4x2x16xf32>
    %149 = arith.maximumf %147, %148 : vector<4x2x16xf32>
    %c3_155 = arith.constant 3 : index
    %c2_156 = arith.constant 2 : index
    %c0_157 = arith.constant 0 : index
    %150 = tpu.strided_load %arg6[%c3_155, %c2_156, %c0_157] {strides = array<i32: 4, 4, 1>} : memref<16x8x16xf32, #tpu.memory_space<vmem>>, vector<4x2x16xf32>
    %c3_158 = arith.constant 3 : index
    %c3_159 = arith.constant 3 : index
    %c0_160 = arith.constant 0 : index
    %151 = tpu.strided_load %arg6[%c3_158, %c3_159, %c0_160] {strides = array<i32: 4, 4, 1>} : memref<16x8x16xf32, #tpu.memory_space<vmem>>, vector<4x2x16xf32>
    %152 = arith.maximumf %150, %151 : vector<4x2x16xf32>
    %153 = arith.maximumf %149, %152 : vector<4x2x16xf32>
    %154 = arith.addf %132, %139 : vector<4x2x16xf32>
    %155 = arith.addf %154, %146 : vector<4x2x16xf32>
    %156 = arith.addf %155, %153 : vector<4x2x16xf32>
    %cst_161 = arith.constant 2.500000e-01 : f32
    %157 = vector.broadcast %cst_161 : f32 to vector<4x2x16xf32>
    %158 = arith.mulf %156, %157 : vector<4x2x16xf32>
    %159 = vector.shape_cast %158 : vector<4x2x16xf32> to vector<2x4x16xf32>
    %160 = vector.extract_strided_slice %159 {offsets = [0, 0, 0], sizes = [2, 1, 16], strides = [1, 1, 1]} : vector<2x4x16xf32> to vector<2x1x16xf32>
    %161 = vector.shape_cast %160 : vector<2x1x16xf32> to vector<2x16xf32>
    %c0_162 = arith.constant 0 : index
    %c0_163 = arith.constant 0 : index
    %162 = vector.load %arg7[%c0_162, %c0_163] : memref<2x64xf32, #tpu.memory_space<vmem>>, vector<2x16xf32>
    tpu.vector_store %arg7[%c0_162, %c0_163], %161 {strides = array<i32>} : memref<2x64xf32, #tpu.memory_space<vmem>>, vector<2x16xf32>,
    %163 = vector.extract_strided_slice %159 {offsets = [0, 1, 0], sizes = [2, 1, 16], strides = [1, 1, 1]} : vector<2x4x16xf32> to vector<2x1x16xf32>
    %164 = vector.shape_cast %163 : vector<2x1x16xf32> to vector<2x16xf32>
    %c0_164 = arith.constant 0 : index
    %c16_165 = arith.constant 16 : index
    %165 = vector.load %arg7[%c0_164, %c16_165] : memref<2x64xf32, #tpu.memory_space<vmem>>, vector<2x16xf32>
    tpu.vector_store %arg7[%c0_164, %c16_165], %164 {strides = array<i32>} : memref<2x64xf32, #tpu.memory_space<vmem>>, vector<2x16xf32>,
    %166 = vector.extract_strided_slice %159 {offsets = [0, 2, 0], sizes = [2, 1, 16], strides = [1, 1, 1]} : vector<2x4x16xf32> to vector<2x1x16xf32>
    %167 = vector.shape_cast %166 : vector<2x1x16xf32> to vector<2x16xf32>
    %c0_166 = arith.constant 0 : index
    %c32_167 = arith.constant 32 : index
    %168 = vector.load %arg7[%c0_166, %c32_167] : memref<2x64xf32, #tpu.memory_space<vmem>>, vector<2x16xf32>
    tpu.vector_store %arg7[%c0_166, %c32_167], %167 {strides = array<i32>} : memref<2x64xf32, #tpu.memory_space<vmem>>, vector<2x16xf32>,
    %169 = vector.extract_strided_slice %159 {offsets = [0, 3, 0], sizes = [2, 1, 16], strides = [1, 1, 1]} : vector<2x4x16xf32> to vector<2x1x16xf32>
    %170 = vector.shape_cast %169 : vector<2x1x16xf32> to vector<2x16xf32>
    %c0_168 = arith.constant 0 : index
    %c48_169 = arith.constant 48 : index
    %171 = vector.load %arg7[%c0_168, %c48_169] : memref<2x64xf32, #tpu.memory_space<vmem>>, vector<2x16xf32>
    tpu.vector_store %arg7[%c0_168, %c48_169], %170 {strides = array<i32>} : memref<2x64xf32, #tpu.memory_space<vmem>>, vector<2x16xf32>,
    %c0_170 = arith.constant 0 : index
    %c0_171 = arith.constant 0 : index
    %172 = vector.load %arg7[%c0_170, %c0_171] : memref<2x64xf32, #tpu.memory_space<vmem>>, vector<2x64xf32>
    %c741 = arith.constant 741 : index
    %c0_172 = arith.constant 0 : index
    %173 = vector.load %arg1[%c741, %c0_172] : memref<872x32xf32, #tpu.memory_space<vmem>>, vector<64x32xf32>
    %cst_173 = arith.constant dense<0.000000e+00> : vector<2x32xf32>
    %174 = tpu.matmul %172, %173, %cst_173 {dimension_numbers = #tpu.dot_dimension_numbers<[1], [0], [0], [1], [0, 0, 1, 1], [], []>} : vector<2x64xf32>, vector<64x32xf32>, vector<2x32xf32> -> vector<2x32xf32>
    %c805 = arith.constant 805 : index
    %c0_174 = arith.constant 0 : index
    %175 = vector.load %arg1[%c805, %c0_174] : memref<872x32xf32, #tpu.memory_space<vmem>>, vector<1x32xf32>
    %176 = vector.broadcast %175 : vector<1x32xf32> to vector<2x32xf32>
    %177 = arith.addf %174, %176 : vector<2x32xf32>
    %cst_175 = arith.constant 0.000000e+00 : f32
    %178 = vector.broadcast %cst_175 : f32 to vector<2x32xf32>
    %179 = arith.maximumf %177, %178 : vector<2x32xf32>
    %c806 = arith.constant 806 : index
    %c0_176 = arith.constant 0 : index
    %180 = vector.load %arg1[%c806, %c0_176] : memref<872x32xf32, #tpu.memory_space<vmem>>, vector<32x32xf32>
    %cst_177 = arith.constant dense<0.000000e+00> : vector<2x32xf32>
    %181 = tpu.matmul %179, %180, %cst_177 {dimension_numbers = #tpu.dot_dimension_numbers<[1], [0], [0], [1], [0, 0, 1, 1], [], []>} : vector<2x32xf32>, vector<32x32xf32>, vector<2x32xf32> -> vector<2x32xf32>
    %c838 = arith.constant 838 : index
    %c0_178 = arith.constant 0 : index
    %182 = vector.load %arg1[%c838, %c0_178] : memref<872x32xf32, #tpu.memory_space<vmem>>, vector<1x32xf32>
    %183 = vector.broadcast %182 : vector<1x32xf32> to vector<2x32xf32>
    %184 = arith.addf %181, %183 : vector<2x32xf32>
    %cst_179 = arith.constant 0.000000e+00 : f32
    %185 = vector.broadcast %cst_179 : f32 to vector<2x32xf32>
    %186 = arith.maximumf %184, %185 : vector<2x32xf32>
    %c839 = arith.constant 839 : index
    %c0_180 = arith.constant 0 : index
    %187 = vector.load %arg1[%c839, %c0_180] : memref<872x32xf32, #tpu.memory_space<vmem>>, vector<32x10xf32>
    %cst_181 = arith.constant dense<0.000000e+00> : vector<2x10xf32>
    %188 = tpu.matmul %186, %187, %cst_181 {dimension_numbers = #tpu.dot_dimension_numbers<[1], [0], [0], [1], [0, 0, 1, 1], [], []>} : vector<2x32xf32>, vector<32x10xf32>, vector<2x10xf32> -> vector<2x10xf32>
    %c871 = arith.constant 871 : index
    %c0_182 = arith.constant 0 : index
    %189 = vector.load %arg1[%c871, %c0_182] : memref<872x32xf32, #tpu.memory_space<vmem>>, vector<1x10xf32>
    %190 = vector.broadcast %189 : vector<1x10xf32> to vector<2x10xf32>
    %191 = arith.addf %188, %190 : vector<2x10xf32>
    %c0_183 = arith.constant 0 : index
    %c0_184 = arith.constant 0 : index
    %192 = vector.load %arg2[%c0_183, %c0_184] : memref<2x10xf32, #tpu.memory_space<vmem>>, vector<2x10xf32>
    tpu.vector_store %arg2[%c0_183, %c0_184], %191 {strides = array<i32>} : memref<2x10xf32, #tpu.memory_space<vmem>>, vector<2x10xf32>,
    return
  }
}

</mosaic_0001>

<bundles_post_ra>
// kernel: proxy_vgg_ln_forward.1
= control target key start
LH: loop header
LB: loop body
LE: loop exit
PB: predicated region body
PF: predicated region fallthrough
CT: control target
= control target key end

     0   :  { %vm278_vm0 = vcmask 1042432   ;;  %vm85_vm1 = vcmask 220160   ;;  %vm731_vm2 = vcmask 64512   ;;  %vm1901_vm3 = vcmask 58368   ;;  %s4370_s17 = smov 16   ;;  %s4371_s26 = smov 8   ;;  %s7337_s0 = inlined_call_operand.vmem [shape: f32[512,27], index: 0, kind: input, shape index: {}]   ;;  %s7338_s1 = inlined_call_operand.vmem [shape: f32[872,32], index: 1, kind: input, shape index: {}]   ;;  %s7339_s2 = inlined_call_operand.hbm [shape: f32[2,10], index: 2, kind: output, shape index: {}]  }
   0x1   :  { %v76_v0 = vld [vmem:[%s7338_s1] sm:$0xff]  ;;  %v77_v1 = vld [vmem:[%s7338_s1 + $0x8] sm:$0xff]  ;;  %v78_v2 = vld [vmem:[%s7338_s1 + $0x10] sm:$0xff]  ;;  %vm4368_vm4 = vmmov 1   ;;  %v7340_v8 = vmov 0.0  }
   0x2   :  { %v4269_v3 = vpack.c.bf16 %v77_v1, %v76_v0  ;;  %v79_v4 = vld [vmem:[%s7338_s1 + $0x18] sm:$0x7]  ;;  %v12_v5 = vld [vmem:[%s7337_s0] sm:$0xff]  ;;  %vm4411_vm5 = vmpackc.low %vm278_vm0, %vm4368_vm4  ;;  %1900 = vst.msk [vmem:[#allocation3] sm:$0xff] %vm731_vm2, %v7340_v8 }
   0x3   :  { %v4273_v6 = vpack.c.bf16 %v79_v4, %v78_v2  ;;  %4090 = vmatprep.mubr.msk.f32.mxu0 %vm85_vm1, %v12_v5  ;;  %1902 = vst.msk [vmem:[#allocation3 + $0x8] sm:$0x3] %vm1901_vm3, %v7340_v8  ;;  %1904 = vst.msk [vmem:[#allocation3 + $0xa8] sm:$0x3] %vm1901_vm3, %v7340_v8  ;;  %v58_v9 = vld [vmem:[%s7337_s0 + $0x170] sm:$0xff]  ;;  %v13_v10 = vld [vmem:[%s7337_s0 + $0x8] sm:$0xff] }
   0x4   :  { %1903 = vst.msk [vmem:[#allocation3 + $0xa0] sm:$0xff] %vm731_vm2, %v7340_v8  ;;  %1906 = vst.msk [vmem:[#allocation3 + $0x90] sm:$0xff] %vm731_vm2, %v7340_v8  ;;  %4270 = vmatprep.subr.bf16.mxu0 %v4269_v3  ;;  %4319 = vmatprep.subr.bf16.mxu1 %v4269_v3  ;;  %v59_v11 = vld [vmem:[%s7337_s0 + $0x178] sm:$0xff]  ;;  %v14_v12 = vld [vmem:[%s7337_s0 + $0x10] sm:$0xff] }
   0x5   :  { %1907 = vst.msk [vmem:[#allocation3 + $0x98] sm:$0x3] %vm1901_vm3, %v7340_v8  ;;  %1909 = vst.msk [vmem:[#allocation3 + $0x138] sm:$0x3] %vm1901_vm3, %v7340_v8  ;;  %4272 = vmatpush3.bf16.msra.mxu0 %v4269_v3  ;;  %4321 = vmatpush3.bf16.msra.mxu1 %v4269_v3  ;;  %v60_v13 = vld [vmem:[%s7337_s0 + $0x180] sm:$0xff]  ;;  %v15_v14 = vld [vmem:[%s7337_s0 + $0x18] sm:$0xff] }
   0x6   :  { %1908 = vst.msk [vmem:[#allocation3 + $0x130] sm:$0xff] %vm731_vm2, %v7340_v8  ;;  %4275 = vmatprep.subr.msk.bf16.mxu0 %vm4411_vm5, %v4273_v6  ;;  %4320 = vmatprep.subr.msk.bf16.mxu1 %vm4411_vm5, %v4273_v6  ;;  %v61_v15 = vld [vmem:[%s7337_s0 + $0x188] sm:$0xff]  ;;  %v16_v16 = vld [vmem:[%s7337_s0 + $0x20] sm:$0xff]  ;;  %v62_v17 = vld [vmem:[%s7337_s0 + $0x190] sm:$0xff] }
   0x7   :  { %4159 = vmatprep.mubr.msk.f32.mxu1 %vm85_vm1, %v58_v9  ;;  %v17_v18 = vld [vmem:[%s7337_s0 + $0x28] sm:$0xff]  ;;  %v63_v19 = vld [vmem:[%s7337_s0 + $0x198] sm:$0xff]  ;;  %v18_v20 = vld [vmem:[%s7337_s0 + $0x30] sm:$0xff] }
   0x8   :  { %v64_v21 = vld [vmem:[%s7337_s0 + $0x1a0] sm:$0xff]  ;;  %v19_v25 = vld [vmem:[%s7337_s0 + $0x38] sm:$0xff]  ;;  %v65_v26 = vld [vmem:[%s7337_s0 + $0x1a8] sm:$0xff] }
   0x9   :  { %4278 = vmatpush3.bf16.msk.msra.mxu0 %vm4411_vm5, %v4273_v6  ;;  %4322 = vmatpush3.bf16.msk.msra.mxu1 %vm4411_vm5, %v4273_v6  ;;  %v66_v27 = vld [vmem:[%s7337_s0 + $0x1b0] sm:$0xff]  ;;  %v20_v28 = vld [vmem:[%s7337_s0 + $0x40] sm:$0xff]  ;;  %v67_v31 = vld [vmem:[%s7337_s0 + $0x1b8] sm:$0xff] }
   0xa   :  { %v2089_v22 = vld [vmem:[#allocation3 + $0x2] sm:$0xff] }
   0xb   :  { %2121 = vrot.lane.b32.xlu1 %v2089_v22, %s4370_s17  ;;  %v2097_v23 = vld [vmem:[#allocation3 + $0xa2] sm:$0xff] }
   0xc   :  { %4091 = vmatmul.mubr.msk.f32.vlgmr.msra.gmra.mrb[0].mxu0 %vm85_vm1, %v13_v10  ;;  %4160 = vmatmul.mubr.msk.f32.vlgmr.msra.gmra.mrb[0].mxu1 %vm85_vm1, %v59_v11  ;;  %v1992_v24 = vld [vmem:[#allocation3 + $0x1] sm:$0xff]  ;;  %v2679_v30 = vld [vmem:[#allocation3 + $0x92] sm:$0xff] }
   0xd   :  { %4093 = vmatprep.mubr.msk.f32.mxu0 %vm85_vm1, %v14_v12  ;;  %4162 = vmatprep.mubr.msk.f32.mxu1 %vm85_vm1, %v60_v13  ;;  %v2000_v29 = vld [vmem:[#allocation3 + $0xa1] sm:$0xff] }
   0xe   :  { %2024 = vrot.lane.b32.xlu0 %v1992_v24, %s4371_s26  ;;  %v21_v32 = vld [vmem:[%s7337_s0 + $0x48] sm:$0xff] }
   0xf   :  { %2137 = vrot.lane.b32.xlu1 %v2097_v23, %s4370_s17 }
  0x10   :  { %4094 = vmatmul.mubr.msk.f32.gmra.mrb[2].mxu0 %vm85_vm1, %v15_v14  ;;  %4163 = vmatmul.mubr.msk.f32.gmra.mrb[2].mxu1 %vm85_vm1, %v61_v15 }
  0x11   :  { %4096 = vmatprep.mubr.msk.f32.mxu0 %vm85_vm1, %v16_v16  ;;  %4165 = vmatprep.mubr.msk.f32.mxu1 %vm85_vm1, %v62_v17 }
  0x14   :  { %4097 = vmatmul.mubr.msk.f32.gmra.mrb[4].mxu0 %vm85_vm1, %v17_v18  ;;  %4166 = vmatmul.mubr.msk.f32.gmra.mrb[4].mxu1 %vm85_vm1, %v63_v19 }
  0x15   :  { %4099 = vmatprep.mubr.msk.f32.mxu0 %vm85_vm1, %v18_v20  ;;  %4168 = vmatprep.mubr.msk.f32.mxu1 %vm85_vm1, %v64_v21 }
  0x18   :  { %4100 = vmatmul.mubr.msk.f32.gmra.mrb[6].mxu0 %vm85_vm1, %v19_v25  ;;  %4169 = vmatmul.mubr.msk.f32.gmra.mrb[6].mxu1 %vm85_vm1, %v65_v26 }
  0x19   :  { %4171 = vmatprep.mubr.msk.f32.mxu1 %vm85_vm1, %v66_v27  ;;  %4102 = vmatprep.mubr.msk.f32.mxu0 %vm85_vm1, %v20_v28 }
  0x1a   :  { %7 = vsyncpa [#allocation8], 0  ;;  %v22_v33 = vld [vmem:[%s7337_s0 + $0x50] sm:$0xff]  ;;  %v68_v34 = vld [vmem:[%s7337_s0 + $0x1c0] sm:$0xff]  ;;  %2040 = vrot.lane.b32.xlu0 %v2000_v29, %s4371_s26  ;;  %s4372_s7 = smov 64   ;;  %s4373_s16 = smov 48  }
  0x1b   :  { %2718 = vrot.lane.b32.xlu1 %v2679_v30, %s4372_s7  ;;  %v2485_v35 = vld [vmem:[#allocation3 + $0x90] sm:$0xff]  ;;  %v23_v37 = vld [vmem:[%s7337_s0 + $0x58] sm:$0xff]  ;;  %v69_v38 = vld [vmem:[%s7337_s0 + $0x1c8] sm:$0xff]  ;;  %s4374_s27 = smov 56   ;;  %vm2072_vm6 = vcmask 130112   ;;  %vm2169_vm7 = vcmask 195712  }
  0x1c   :  { %4172 = vmatmul.mubr.msk.f32.gmra.mrb[8].mxu1 %vm85_vm1, %v67_v31  ;;  %4103 = vmatmul.mubr.msk.f32.gmra.mrb[8].mxu0 %vm85_vm1, %v21_v32  ;;  %v2493_v36 = vld [vmem:[#allocation3 + $0x130] sm:$0xff]  ;;  %v24_v39 = vld [vmem:[%s7337_s0 + $0x60] sm:$0xff]  ;;  %v25_v43 = vld [vmem:[%s7337_s0 + $0x68] sm:$0xff]  ;;  %vm1911_vm8 = vcmask 57344   ;;  %s4375_s9 = smov 24   ;;  %s4376_s10 = smov 32  }
  0x1d   :  { %4105 = vmatprep.mubr.msk.f32.mxu0 %vm85_vm1, %v22_v33  ;;  %4174 = vmatprep.mubr.msk.f32.mxu1 %vm85_vm1, %v68_v34  ;;  %v70_v40 = vld [vmem:[%s7337_s0 + $0x1d0] sm:$0xff]  ;;  %v71_v44 = vld [vmem:[%s7337_s0 + $0x1d8] sm:$0xff]  ;;  %v72_v46 = vld [vmem:[%s7337_s0 + $0x1e0] sm:$0xff]  ;;  %s4377_s11 = smov 40   ;;  %vm2266_vm9 = vcmask 261312   ;;  %vm2363_vm10 = vcmask 326912  }
  0x1e   :  { %2524 = vrot.lane.b32.xlu0 %v2485_v35, %s4373_s16  ;;  %v2582_v41 = vld [vmem:[#allocation3 + $0x91] sm:$0xff]  ;;  %v73_v48 = vld [vmem:[%s7337_s0 + $0x1e8] sm:$0xff]  ;;  %v28_v49 = vld [vmem:[%s7337_s0 + $0x80] sm:$0xff]  ;;  %vm2460_vm11 = vcmask 392512   ;;  %vm2558_vm12 = vcmask 458112   ;;  %vm2655_vm13 = vcmask 523712  }
  0x1f   :  { %2540 = vrot.lane.b32.xlu1 %v2493_v36, %s4373_s16  ;;  %v2590_v42 = vld [vmem:[#allocation3 + $0x131] sm:$0xff]  ;;  %v29_v51 = vld [vmem:[%s7337_s0 + $0x88] sm:$0xff]  ;;  %v32_v55 = vld [vmem:[%s7337_s0 + $0xa0] sm:$0xff]  ;;  %vm2752_vm14 = vcmask 589312   ;;  %vm2799_vm15 = vcmask 588800   ;;  %vm3009_vm0 = vcmask 130048  }
  0x20   :  { %4106 = vmatmul.mubr.msk.f32.gmra.mrb[10].mxu0 %vm85_vm1, %v23_v37  ;;  %4175 = vmatmul.mubr.msk.f32.gmra.mrb[10].mxu1 %vm85_vm1, %v69_v38  ;;  %v26_v45 = vld [vmem:[%s7337_s0 + $0x70] sm:$0xff]  ;;  %v27_v47 = vld [vmem:[%s7337_s0 + $0x78] sm:$0xff]  ;;  %v33_v56 = vld [vmem:[%s7337_s0 + $0xa8] sm:$0xff]  ;;  %vm4379_vm3 = vmmov 0   ;;  %vm3487_vm4 = vcmask 123904   ;;  %vm3502_vm5 = vcmask 256129  }
  0x21   :  { %4108 = vmatprep.mubr.msk.f32.mxu0 %vm85_vm1, %v24_v39  ;;  %4177 = vmatprep.mubr.msk.f32.mxu1 %vm85_vm1, %v70_v40  ;;  %v74_v50 = vld [vmem:[%s7337_s0 + $0x1f0] sm:$0xff]  ;;  %v75_v52 = vld [vmem:[%s7337_s0 + $0x1f8] sm:$0xff]  ;;  %v36_v59 = vld [vmem:[%s7337_s0 + $0xc0] sm:$0xff]  ;;  %s4380_s23 = smov [#allocation7]  }
  0x22   :  { %2621 = vrot.lane.b32.xlu0 %v2582_v41, %s4374_s27  ;;  %v30_v53 = vld [vmem:[%s7337_s0 + $0x90] sm:$0xff]  ;;  %v31_v54 = vld [vmem:[%s7337_s0 + $0x98] sm:$0xff]  ;;  %v37_v60 = vld [vmem:[%s7337_s0 + $0xc8] sm:$0xff]  ;;  %s3797_s24 = sshll.u32 %s4380_s23, 4  ;;  %s3798_s24 = int_to_ptr.vmem [resolvable:$true] %s3797_s24 }
  0x23   :  { %2637 = vrot.lane.b32.xlu1 %v2590_v42, %s4374_s27  ;;  %v34_v57 = vld [vmem:[%s7337_s0 + $0xb0] sm:$0xff]  ;;  %v35_v58 = vld [vmem:[%s7337_s0 + $0xb8] sm:$0xff]  ;;  %v40_v63 = vld [vmem:[%s7337_s0 + $0xe0] sm:$0xff]  ;;  %p4349_p1 = scmp.lt.s32.totalorder %s3798_s24, %s3798_s24 }
  0x24   :  { %4109 = vmatmul.mubr.msk.f32.gmra.mrb[12].mxu0 %vm85_vm1, %v25_v43  ;;  %4178 = vmatmul.mubr.msk.f32.gmra.mrb[12].mxu1 %vm85_vm1, %v71_v44  ;;  %v38_v61 = vld [vmem:[%s7337_s0 + $0xd0] sm:$0xff]  ;;  %v39_v62 = vld [vmem:[%s7337_s0 + $0xd8] sm:$0xff]  ;;  %v41_v0 = vld [vmem:[%s7337_s0 + $0xe8] sm:$0xff] }
  0x25   :  { %4111 = vmatprep.mubr.msk.f32.mxu0 %vm85_vm1, %v26_v45  ;;  %4180 = vmatprep.mubr.msk.f32.mxu1 %vm85_vm1, %v72_v46  ;;  %v42_v1 = vld [vmem:[%s7337_s0 + $0xf0] sm:$0xff]  ;;  %v43_v2 = vld [vmem:[%s7337_s0 + $0xf8] sm:$0xff]  ;;  %v44_v3 = vld [vmem:[%s7337_s0 + $0x100] sm:$0xff] }
  0x26   :  { %v45_v4 = vld [vmem:[%s7337_s0 + $0x108] sm:$0xff]  ;;  %v46_v5 = vld [vmem:[%s7337_s0 + $0x110] sm:$0xff]  ;;  %v47_v6 = vld [vmem:[%s7337_s0 + $0x118] sm:$0xff] }
  0x27   :  { %v48_v7 = vld [vmem:[%s7337_s0 + $0x120] sm:$0xff]  ;;  %v49_v9 = vld [vmem:[%s7337_s0 + $0x128] sm:$0xff]  ;;  %v50_v10 = vld [vmem:[%s7337_s0 + $0x130] sm:$0xff] }
  0x28   :  { %4112 = vmatmul.mubr.msk.f32.gmra.mrb[14].mxu0 %vm85_vm1, %v27_v47  ;;  %4181 = vmatmul.mubr.msk.f32.gmra.mrb[14].mxu1 %vm85_vm1, %v73_v48  ;;  %v51_v11 = vld [vmem:[%s7337_s0 + $0x138] sm:$0xff]  ;;  %v52_v12 = vld [vmem:[%s7337_s0 + $0x140] sm:$0xff]  ;;  %v53_v13 = vld [vmem:[%s7337_s0 + $0x148] sm:$0xff] }
  0x29   :  { %4114 = vmatprep.mubr.msk.f32.mxu0 %vm85_vm1, %v28_v49  ;;  %4183 = vmatprep.mubr.msk.f32.mxu1 %vm85_vm1, %v74_v50  ;;  %v54_v14 = vld [vmem:[%s7337_s0 + $0x150] sm:$0xff]  ;;  %v55_v15 = vld [vmem:[%s7337_s0 + $0x158] sm:$0xff]  ;;  %v56_v16 = vld [vmem:[%s7337_s0 + $0x160] sm:$0xff] }
  0x2a   :  { %v57_v17 = vld [vmem:[%s7337_s0 + $0x168] sm:$0xff]  ;;  %v1960_v19 = vld [vmem:[#allocation3] sm:$0xff]  ;;  %v4705_v23 = vld [vmem:[%s7338_s1 + $0x1b] ss:$0 sm:$0xff]  ;;  %s4344_s0 = scalar_lea.vmem %s3798_s24, 32 }
  0x2b   :  { %1976 = vst.msk [vmem:[#allocation4] sm:$0xff] %vm731_vm2, %v1960_v19  ;;  %v1968_v21 = vld [vmem:[#allocation3 + $0xa0] sm:$0xff]  ;;  %p4345_p0 = scmp.ne.s32.totalorder %s3798_s24, %s4344_s0  ;;  %p4350_p2 = scmp.lt.s32.totalorder %s4344_s0, %s4344_s0 }
  0x2c   :  { %4115 = vmatmul.mubr.msk.f32.gmra.mrb[16].mxu0 %vm85_vm1, %v29_v51  ;;  %4184 = vmatmul.mubr.msk.f32.gmra.mrb[16].mxu1 %vm85_vm1, %v75_v52  ;;  %1984 = vst.msk [vmem:[#allocation4 + $0x40] sm:$0xff] %vm731_vm2, %v1968_v21 }
  0x2d   :  { %4117 = vmatprep.mubr.msk.f32.mxu0 %vm85_vm1, %v30_v53  ;;  %p4351_p3 = por %p4350_p2, %p4349_p1 }
  0x2f   :  { %p4352_p4 = pnand %p4351_p3, %p4345_p0 }
  0x30   :  { %4118 = vmatmul.mubr.msk.f32.gmra.mrb[18].mxu0 %vm85_vm1, %v31_v54 }
  0x31   :  { %4120 = vmatprep.mubr.msk.f32.mxu0 %vm85_vm1, %v32_v55 }
  0x34   :  { %4121 = vmatmul.mubr.msk.f32.gmra.mrb[20].mxu0 %vm85_vm1, %v33_v56 }
  0x35   :  { %4123 = vmatprep.mubr.msk.f32.mxu0 %vm85_vm1, %v34_v57 }
  0x38   :  { %4124 = vmatmul.mubr.msk.f32.gmra.mrb[22].mxu0 %vm85_vm1, %v35_v58 }
  0x39   :  { %4126 = vmatprep.mubr.msk.f32.mxu0 %vm85_vm1, %v36_v59 }
  0x3c   :  { %4127 = vmatmul.mubr.msk.f32.gmra.mrb[24].mxu0 %vm85_vm1, %v37_v60 }
  0x3d   :  { %4129 = vmatprep.mubr.msk.f32.mxu0 %vm85_vm1, %v38_v61 }
  0x40   :  { %4130 = vmatmul.mubr.msk.f32.gmra.mrb[26].mxu0 %vm85_vm1, %v39_v62 }
  0x41   :  { %4132 = vmatprep.mubr.msk.f32.mxu0 %vm85_vm1, %v40_v63 }
  0x44   :  { %4133 = vmatmul.mubr.msk.f32.gmra.mrb[28].mxu0 %vm85_vm1, %v41_v0 }
  0x45   :  { %4135 = vmatprep.mubr.msk.f32.mxu0 %vm85_vm1, %v42_v1 }
  0x48   :  { %4136 = vmatmul.mubr.msk.f32.gmra.mrb[30].mxu0 %vm85_vm1, %v43_v2 }
  0x49   :  { %4138 = vmatprep.mubr.msk.f32.mxu0 %vm85_vm1, %v44_v3 }
  0x4c   :  { %4139 = vmatmul.mubr.msk.f32.gmra.mrb[32].mxu0 %vm85_vm1, %v45_v4 }
  0x4d   :  { %4141 = vmatprep.mubr.msk.f32.mxu0 %vm85_vm1, %v46_v5 }
  0x50   :  { %4142 = vmatmul.mubr.msk.f32.gmra.mrb[34].mxu0 %vm85_vm1, %v47_v6 }
  0x51   :  { %4144 = vmatprep.mubr.msk.f32.mxu0 %vm85_vm1, %v48_v7 }
  0x54   :  { %4145 = vmatmul.mubr.msk.f32.gmra.mrb[36].mxu0 %vm85_vm1, %v49_v9 }
  0x55   :  { %4147 = vmatprep.mubr.msk.f32.mxu0 %vm85_vm1, %v50_v10 }
  0x58   :  { %4148 = vmatmul.mubr.msk.f32.gmra.mrb[38].mxu0 %vm85_vm1, %v51_v11 }
  0x59   :  { %4150 = vmatprep.mubr.msk.f32.mxu0 %vm85_vm1, %v52_v12 }
  0x5c   :  { %4151 = vmatmul.mubr.msk.f32.gmra.mrb[40].mxu0 %vm85_vm1, %v53_v13 }
  0x5d   :  { %4153 = vmatprep.mubr.msk.f32.mxu0 %vm85_vm1, %v54_v14 }
  0x60   :  { %4154 = vmatmul.mubr.msk.f32.gmra.mrb[42].mxu0 %vm85_vm1, %v55_v15 }
  0x61   :  { %4156 = vmatprep.mubr.msk.f32.mxu0 %vm85_vm1, %v56_v16 }
  0x64   :  { %4157 = vmatmul.mubr.msk.f32.gmra.mrb[44].mxu0 %vm85_vm1, %v57_v17  ;;  %vm3484_vm1 = vcmask 1041409  }
  0x7d   :  { %v2122_v22 = vpop.permute.xlu1 %2121 }
  0x80   :  { %v2025_v18 = vpop.permute.xlu0 %2024 }
  0x81   :  { %2073 = vst.msk [vmem:[#allocation4] sm:$0xff] %vm2072_vm6, %v2025_v18  ;;  %v2138_v31 = vpop.permute.xlu1 %2137 }
  0x82   :  { %2170 = vst.msk [vmem:[#allocation4] sm:$0xff] %vm2169_vm7, %v2122_v22 }
  0x8c   :  { %v2041_v20 = vpop.permute.xlu0 %2040 }
  0x8d   :  { %2081 = vst.msk [vmem:[#allocation4 + $0x40] sm:$0xff] %vm2072_vm6, %v2041_v20 }
  0x8e   :  { %2178 = vst.msk [vmem:[#allocation4 + $0x40] sm:$0xff] %vm2169_vm7, %v2138_v31 }
  0xdf   :  { %v4092_v24 = vpop.f32.mrb[0].mxu0  ;;  %v4161_v25 = vpop.f32.mrb[0].mxu1 }
  0xe0   :  { %v4708_v26 = vadd.f32 %v4092_v24, %v4705_v23  ;;  %v4711_v27 = vadd.f32 %v4161_v25, %v4705_v23  ;;  %v348_v28 = vpop.f32.mrb[1].mxu0  ;;  %v578_v29 = vpop.f32.mrb[1].mxu1 }
  0xe1   :  { %v4714_v30 = vadd.f32 %v4705_v23, %v578_v29  ;;  %v4717_v32 = vadd.f32 %v4705_v23, %v348_v28 }
  0xe2   :  { %7452 = vst [vmem:[#allocation10_spill] sm:$0xff] %v4711_v27  ;;  %v873_v33 = vsel %vm731_vm2, %v4711_v27, 0.0  ;;  %v735_v34 = vsel %vm731_vm2, %v4708_v26, 0.0  ;;  %v1045_v40 = vmul.f32 %v4711_v27, %v4711_v27  ;;  %v999_v43 = vmul.f32 %v4708_v26, %v4708_v26 }
  0xe3   :  { %7453 = vst [vmem:[#allocation11_spill] sm:$0xff] %v4714_v30  ;;  %874 = vadd.xlane.f32.xlu1 %v873_v33  ;;  %736 = vadd.xlane.f32.xlu0 %v735_v34  ;;  %v4095_v35 = vpop.f32.mrb[2].mxu0  ;;  %v4164_v36 = vpop.f32.mrb[2].mxu1  ;;  %v870_v37 = vsel %vm731_vm2, %v4714_v30, 0.0  ;;  %v732_v42 = vsel %vm731_vm2, %v4717_v32, 0.0  ;;  %v998_v52 = vmul.f32 %v4717_v32, %v4717_v32  ;;  %v1044_v57 = vmul.f32 %v4714_v30, %v4714_v30 }
  0xe4   :  { %v4727_v38 = vadd.f32 %v4095_v35, %v4705_v23  ;;  %v358_v39 = vpop.f32.mrb[3].mxu0  ;;  %v4731_v41 = vpop.f32.mrb[3].mxu1  ;;  %v1203_v46 = vsel %vm731_vm2, %v1045_v40, 0.0  ;;  %v1065_v51 = vsel %vm731_vm2, %v999_v43, 0.0  ;;  %v4783_v13 = vadd.f32 %v4164_v36, %v4705_v23 }
  0xe5   :  { %v4745_v50 = vadd.f32 %v4705_v23, %v358_v39  ;;  %v1062_v60 = vsel %vm731_vm2, %v998_v52, 0.0  ;;  %v1200_v0 = vsel %vm731_vm2, %v1044_v57, 0.0  ;;  %v4819_v35 = vadd.f32 %v4705_v23, %v4731_v41 }
  0xe6   :  { %v1001_v47 = vmul.f32 %v4727_v38, %v4727_v38  ;;  %7454 = vst [vmem:[#allocation12_spill] sm:$0xff] %v4783_v13  ;;  %v741_v14 = vsel %vm731_vm2, %v4727_v38, 0.0  ;;  %v879_v22 = vsel %vm731_vm2, %v4783_v13, 0.0 }
  0xe7   :  { %871 = vadd.xlane.f32.xlu1 %v870_v37  ;;  %733 = vadd.xlane.f32.xlu0 %v732_v42  ;;  %v4098_v44 = vpop.f32.mrb[4].mxu0  ;;  %v4737_v45 = vpop.f32.mrb[4].mxu1  ;;  %v1000_v61 = vmul.f32 %v4745_v50, %v4745_v50  ;;  %7456 = vst [vmem:[#allocation14_spill] sm:$0xff] %v4819_v35  ;;  %v738_v36 = vsel %vm731_vm2, %v4745_v50, 0.0 }
  0xe8   :  { %v368_v48 = vpop.f32.mrb[5].mxu0  ;;  %v4742_v49 = vpop.f32.mrb[5].mxu1  ;;  %v1071_v55 = vsel %vm731_vm2, %v1001_v47, 0.0  ;;  %v4754_v56 = vadd.f32 %v4098_v44, %v4705_v23 }
  0xe9   :  { %v4771_v4 = vadd.f32 %v4705_v23, %v368_v48  ;;  %v1068_v5 = vsel %vm731_vm2, %v1000_v61, 0.0  ;;  %v1047_v48 = vmul.f32 %v4783_v13, %v4783_v13 }
  0xea   :  { %v1003_v1 = vmul.f32 %v4754_v56, %v4754_v56 }
  0xeb   :  { %1204 = vadd.xlane.f32.xlu1 %v1203_v46  ;;  %1066 = vadd.xlane.f32.xlu0 %v1065_v51  ;;  %v4101_v53 = vpop.f32.mrb[6].mxu0  ;;  %v4750_v54 = vpop.f32.mrb[6].mxu1  ;;  %v1002_v15 = vmul.f32 %v4771_v4, %v4771_v4  ;;  %v876_v46 = vsel %vm731_vm2, %v4819_v35, 0.0  ;;  %v1209_v57 = vsel %vm731_vm2, %v1047_v48, 0.0 }
  0xec   :  { %v378_v58 = vpop.f32.mrb[7].mxu0  ;;  %v4758_v59 = vpop.f32.mrb[7].mxu1  ;;  %v1077_v9 = vsel %vm731_vm2, %v1003_v1, 0.0  ;;  %v4778_v10 = vadd.f32 %v4101_v53, %v4705_v23 }
  0xed   :  { %v4800_v21 = vadd.f32 %v4705_v23, %v378_v58  ;;  %v1074_v24 = vsel %vm731_vm2, %v1002_v15, 0.0  ;;  %v1046_v58 = vmul.f32 %v4819_v35, %v4819_v35  ;;  %v747_v15 = vsel %vm731_vm2, %v4754_v56, 0.0 }
  0xee   :  { %v1005_v18 = vmul.f32 %v4778_v10, %v4778_v10 }
  0xef   :  { %1063 = vadd.xlane.f32.xlu1 %v1062_v60  ;;  %1072 = vadd.xlane.f32.xlu0 %v1071_v55  ;;  %v4173_v62 = vpop.f32.mrb[8].mxu1  ;;  %v4763_v63 = vpop.f32.mrb[8].mxu0  ;;  %v1004_v37 = vmul.f32 %v4800_v21, %v4800_v21  ;;  %v1206_v1 = vsel %vm731_vm2, %v1046_v58, 0.0 }
  0xf0   :  { %v4768_v2 = vpop.f32.mrb[9].mxu1  ;;  %v388_v3 = vpop.f32.mrb[9].mxu0  ;;  %v1083_v29 = vsel %vm731_vm2, %v1005_v18, 0.0  ;;  %v4811_v31 = vadd.f32 %v4173_v62, %v4705_v23 }
  0xf1   :  { %v4830_v42 = vadd.f32 %v4705_v23, %v388_v3  ;;  %v1080_v47 = vsel %vm731_vm2, %v1004_v37, 0.0 }
  0xf2   :  { %7455 = vst [vmem:[#allocation13_spill] sm:$0xff] %v4811_v31  ;;  %v1053_v43 = vmul.f32 %v4811_v31, %v4811_v31 }
  0xf3   :  { %1201 = vadd.xlane.f32.xlu1 %v1200_v0  ;;  %1069 = vadd.xlane.f32.xlu0 %v1068_v5  ;;  %v4107_v6 = vpop.f32.mrb[10].mxu0  ;;  %v4774_v7 = vpop.f32.mrb[10].mxu1  ;;  %v1006_v53 = vmul.f32 %v4830_v42, %v4830_v42 }
  0xf4   :  { %v4780_v11 = vpop.f32.mrb[11].mxu0  ;;  %v628_v12 = vpop.f32.mrb[11].mxu1  ;;  %v1227_v52 = vsel %vm731_vm2, %v1053_v43, 0.0  ;;  %v4856_v61 = vadd.f32 %v4107_v6, %v4705_v23  ;;  %v4873_v6 = vadd.f32 %v4737_v45, %v4705_v23  ;;  %v4897_v43 = vadd.f32 %v4705_v23, %v4742_v49 }
  0xf5   :  { %v1086_v62 = vsel %vm731_vm2, %v1006_v53, 0.0  ;;  %v4865_v5 = vadd.f32 %v4705_v23, %v628_v12 }
  0xf6   :  { %7458 = vst [vmem:[#allocation16_spill] sm:$0xff] %v4873_v6  ;;  %v885_v45 = vsel %vm731_vm2, %v4873_v6, 0.0  ;;  %7460 = vst [vmem:[#allocation18_spill] sm:$0xff] %v4897_v43  ;;  %v882_v49 = vsel %vm731_vm2, %v4897_v43, 0.0 }
  0xf7   :  { %742 = vadd.xlane.f32.xlu1 %v741_v14  ;;  %1078 = vadd.xlane.f32.xlu0 %v1077_v9  ;;  %v4789_v16 = vpop.f32.mrb[12].mxu0  ;;  %v4791_v17 = vpop.f32.mrb[12].mxu1  ;;  %7457 = vst [vmem:[#allocation15_spill] sm:$0xff] %v4865_v5  ;;  %v765_v9 = vsel %vm731_vm2, %v4856_v61, 0.0  ;;  %v900_v12 = vsel %vm731_vm2, %v4865_v5, 0.0 }
  0xf8   :  { %v4795_v19 = vpop.f32.mrb[13].mxu0  ;;  %v4797_v20 = vpop.f32.mrb[13].mxu1 }
  0xfb   :  { %880 = vadd.xlane.f32.xlu1 %v879_v22  ;;  %1075 = vadd.xlane.f32.xlu0 %v1074_v24  ;;  %v4805_v25 = vpop.f32.mrb[14].mxu0  ;;  %v4807_v28 = vpop.f32.mrb[14].mxu1  ;;  %v4885_v24 = vadd.f32 %v4774_v7, %v4705_v23  ;;  %v4901_v7 = vadd.f32 %v4705_v23, %v4780_v11 }
  0xfc   :  { %v4813_v33 = vpop.f32.mrb[15].mxu0  ;;  %v4815_v34 = vpop.f32.mrb[15].mxu1 }
  0xfd   :  { %7459 = vst [vmem:[#allocation17_spill] sm:$0xff] %v4885_v24  ;;  %v1055_v48 = vmul.f32 %v4885_v24, %v4885_v24  ;;  %v1008_v58 = vmul.f32 %v4901_v7, %v4901_v7 }
  0xff   :  { %739 = vadd.xlane.f32.xlu1 %v738_v36  ;;  %1084 = vadd.xlane.f32.xlu0 %v1083_v29  ;;  %v4825_v39 = vpop.f32.mrb[16].mxu0  ;;  %v4827_v40 = vpop.f32.mrb[16].mxu1  ;;  %v1009_v29 = vmul.f32 %v4856_v61, %v4856_v61  ;;  %v1233_v11 = vsel %vm731_vm2, %v1055_v48, 0.0 }
 0x100   :  { %v4834_v41 = vpop.f32.mrb[17].mxu0  ;;  %v4836_v44 = vpop.f32.mrb[17].mxu1 }
 0x103   :  { %877 = vadd.xlane.f32.xlu1 %v876_v46  ;;  %1081 = vadd.xlane.f32.xlu0 %v1080_v47  ;;  %v4843_v51 = vpop.f32.mrb[18].mxu0  ;;  %v744_v46 = vsel %vm731_vm2, %v4771_v4, 0.0  ;;  %v1095_v47 = vsel %vm731_vm2, %v1009_v29, 0.0 }
 0x104   :  { %v4848_v55 = vpop.f32.mrb[19].mxu0 }
 0x107   :  { %1210 = vadd.xlane.f32.xlu1 %v1209_v57  ;;  %1228 = vadd.xlane.f32.xlu0 %v1227_v52  ;;  %v4853_v60 = vpop.f32.mrb[20].mxu0  ;;  %v1049_v57 = vmul.f32 %v4873_v6, %v4873_v6 }
 0x108   :  { %v4859_v0 = vpop.f32.mrb[21].mxu0 }
 0x10b   :  { %1207 = vadd.xlane.f32.xlu1 %v1206_v1  ;;  %1087 = vadd.xlane.f32.xlu0 %v1086_v62  ;;  %v4862_v3 = vpop.f32.mrb[22].mxu0 }
 0x10c   :  { %v4869_v14 = vpop.f32.mrb[23].mxu0 }
 0x10f   :  { %748 = vadd.xlane.f32.xlu1 %v747_v15  ;;  %766 = vadd.xlane.f32.xlu0 %v765_v9  ;;  %v4877_v18 = vpop.f32.mrb[24].mxu0  ;;  %v1215_v9 = vsel %vm731_vm2, %v1049_v57, 0.0  ;;  %v1092_v15 = vsel %vm731_vm2, %v1008_v58, 0.0 }
 0x110   :  { %v4881_v22 = vpop.f32.mrb[25].mxu0 }
 0x113   :  { %886 = vadd.xlane.f32.xlu1 %v885_v45  ;;  %901 = vadd.xlane.f32.xlu0 %v900_v12  ;;  %v4891_v36 = vpop.f32.mrb[26].mxu0  ;;  %v1048_v12 = vmul.f32 %v4897_v43, %v4897_v43  ;;  %v1054_v45 = vmul.f32 %v4865_v5, %v4865_v5 }
 0x114   :  { %v4893_v37 = vpop.f32.mrb[27].mxu0 }
 0x115   :  { %v1212_v48 = vsel %vm731_vm2, %v1048_v12, 0.0 }
 0x117   :  { %745 = vadd.xlane.f32.xlu1 %v744_v46  ;;  %1096 = vadd.xlane.f32.xlu0 %v1095_v47  ;;  %v4908_v52 = vpop.f32.mrb[28].mxu0  ;;  %v4933_v46 = vadd.f32 %v4789_v16, %v4705_v23  ;;  %v4951_v16 = vadd.f32 %v4705_v23, %v4795_v19 }
 0x118   :  { %v4910_v53 = vpop.f32.mrb[29].mxu0 }
 0x119   :  { %v771_v57 = vsel %vm731_vm2, %v4933_v46, 0.0  ;;  %v768_v19 = vsel %vm731_vm2, %v4951_v16, 0.0  ;;  %v1010_v43 = vmul.f32 %v4951_v16, %v4951_v16 }
 0x11b   :  { %883 = vadd.xlane.f32.xlu1 %v882_v49  ;;  %1234 = vadd.xlane.f32.xlu0 %v1233_v11  ;;  %v4919_v62 = vpop.f32.mrb[30].mxu0  ;;  %v1230_v49 = vsel %vm731_vm2, %v1054_v45, 0.0  ;;  %v4959_v45 = vadd.f32 %v4791_v17, %v4705_v23  ;;  %v4973_v17 = vadd.f32 %v4705_v23, %v4758_v59 }
 0x11c   :  { %v4921_v1 = vpop.f32.mrb[31].mxu0 }
 0x11d   :  { %7462 = vst [vmem:[#allocation20_spill] sm:$0xff] %v4959_v45  ;;  %7463 = vst [vmem:[#allocation21_spill] sm:$0xff] %v4973_v17 }
 0x11f   :  { %1216 = vadd.xlane.f32.xlu1 %v1215_v9  ;;  %1093 = vadd.xlane.f32.xlu0 %v1092_v15  ;;  %v4929_v29 = vpop.f32.mrb[32].mxu0  ;;  %v4947_v9 = vadd.f32 %v4750_v54, %v4705_v23  ;;  %v753_v15 = vsel %vm731_vm2, %v4778_v10, 0.0 }
 0x120   :  { %v4935_v47 = vpop.f32.mrb[33].mxu0 }
 0x121   :  { %7461 = vst [vmem:[#allocation19_spill] sm:$0xff] %v4947_v9  ;;  %v891_v54 = vsel %vm731_vm2, %v4947_v9, 0.0  ;;  %v1051_v59 = vmul.f32 %v4947_v9, %v4947_v9  ;;  %v5001_v9 = vadd.f32 %v4805_v25, %v4705_v23 }
 0x123   :  { %1213 = vadd.xlane.f32.xlu1 %v1212_v48  ;;  %1231 = vadd.xlane.f32.xlu0 %v1230_v49  ;;  %v4939_v11 = vpop.f32.mrb[34].mxu0  ;;  %v1011_v49 = vmul.f32 %v4933_v46, %v4933_v46  ;;  %7465 = vst [vmem:[#allocation23_spill] sm:$0xff] %v5001_v9 }
 0x124   :  { %v4943_v58 = vpop.f32.mrb[35].mxu0 }
 0x125   :  { %v1101_v8 = vsel %vm731_vm2, %v1011_v49, 0.0  ;;  %v1221_v49 = vsel %vm731_vm2, %v1051_v59, 0.0  ;;  %v777_v59 = vsel %vm731_vm2, %v5001_v9, 0.0 }
 0x127   :  { %754 = vadd.xlane.f32.xlu1 %v753_v15  ;;  %772 = vadd.xlane.f32.xlu0 %v771_v57  ;;  %v4955_v12 = vpop.f32.mrb[36].mxu0  ;;  %v1057_v57 = vmul.f32 %v4959_v45, %v4959_v45  ;;  %v750_v15 = vsel %vm731_vm2, %v4800_v21, 0.0 }
 0x128   :  { %v4961_v48 = vpop.f32.mrb[37].mxu0 }
 0x129   :  { %v1239_v5 = vsel %vm731_vm2, %v1057_v57, 0.0  ;;  %v1098_v57 = vsel %vm731_vm2, %v1010_v43, 0.0 }
 0x12b   :  { %892 = vadd.xlane.f32.xlu1 %v891_v54  ;;  %769 = vadd.xlane.f32.xlu0 %v768_v19  ;;  %v4979_v6 = vpop.f32.mrb[38].mxu0  ;;  %v4983_v54 = vadd.f32 %v4705_v23, %v4797_v20  ;;  %v888_v19 = vsel %vm731_vm2, %v4973_v17, 0.0  ;;  %v1050_v20 = vmul.f32 %v4973_v17, %v4973_v17 }
 0x12d   :  { %7464 = vst [vmem:[#allocation22_spill] sm:$0xff] %v4983_v54 }
 0x12f   :  { %751 = vadd.xlane.f32.xlu1 %v750_v15  ;;  %1102 = vadd.xlane.f32.xlu0 %v1101_v8  ;;  %v4991_v8 = vpop.f32.mrb[39].mxu0  ;;  %v1056_v15 = vmul.f32 %v4983_v54, %v4983_v54 }
 0x131   :  { %v1236_v43 = vsel %vm731_vm2, %v1056_v15, 0.0 }
 0x133   :  { %889 = vadd.xlane.f32.xlu1 %v888_v19  ;;  %1240 = vadd.xlane.f32.xlu0 %v1239_v5  ;;  %v5005_v5 = vadd.f32 %v4763_v63, %v4705_v23  ;;  %v1218_v19 = vsel %vm731_vm2, %v1050_v20, 0.0  ;;  %v5019_v63 = vadd.f32 %v4807_v28, %v4705_v23  ;;  %v897_v20 = vsel %vm731_vm2, %v4811_v31, 0.0 }
 0x134   :  { %v5035_v28 = vadd.f32 %v4705_v23, %v4768_v2 }
 0x135   :  { %v759_v25 = vsel %vm731_vm2, %v5005_v5, 0.0  ;;  %7467 = vst [vmem:[#allocation25_spill] sm:$0xff] %v5019_v63  ;;  %v1007_v2 = vmul.f32 %v5005_v5, %v5005_v5 }
 0x136   :  { %7468 = vst [vmem:[#allocation26_spill] sm:$0xff] %v5035_v28 }
 0x137   :  { %1222 = vadd.xlane.f32.xlu1 %v1221_v49  ;;  %1099 = vadd.xlane.f32.xlu0 %v1098_v57  ;;  %v5013_v49 = vadd.f32 %v4705_v23, %v4813_v33  ;;  %v5021_v57 = vpop.f32.mrb[40].mxu0  ;;  %v1013_v33 = vmul.f32 %v5001_v9, %v5001_v9 }
 0x139   :  { %7466 = vst [vmem:[#allocation24_spill] sm:$0xff] %v5013_v49  ;;  %v774_v15 = vsel %vm731_vm2, %v5013_v49, 0.0  ;;  %v1012_v17 = vmul.f32 %v5013_v49, %v5013_v49 }
 0x13b   :  { %1219 = vadd.xlane.f32.xlu1 %v1218_v19  ;;  %1237 = vadd.xlane.f32.xlu0 %v1236_v43  ;;  %v1059_v19 = vmul.f32 %v5019_v63, %v5019_v63  ;;  %v5031_v43 = vpop.f32.mrb[41].mxu0 }
 0x13c   :  { %v5061_v13 = vpop.f32.mrb[42].mxu0 }
 0x13d   :  { %v1245_v31 = vsel %vm731_vm2, %v1059_v19, 0.0  ;;  %v1052_v19 = vmul.f32 %v5035_v28, %v5035_v28 }
 0x13f   :  { %760 = vadd.xlane.f32.xlu1 %v759_v25  ;;  %778 = vadd.xlane.f32.xlu0 %v777_v59  ;;  %v756_v59 = vsel %vm731_vm2, %v4830_v42, 0.0  ;;  %v1107_v25 = vsel %vm731_vm2, %v1013_v33, 0.0  ;;  %v1089_v33 = vsel %vm731_vm2, %v1007_v2, 0.0  ;;  %v5067_v2 = vpop.f32.mrb[43].mxu0 }
 0x143   :  { %898 = vadd.xlane.f32.xlu1 %v897_v20  ;;  %775 = vadd.xlane.f32.xlu0 %v774_v15  ;;  %v5043_v20 = vadd.f32 %v4705_v23, %v4815_v34  ;;  %v894_v15 = vsel %vm731_vm2, %v5035_v28, 0.0  ;;  %v915_v28 = vsel %vm731_vm2, %v5019_v63, 0.0 }
 0x145   :  { %7469 = vst [vmem:[#allocation27_spill] sm:$0xff] %v5043_v20  ;;  %v1058_v34 = vmul.f32 %v5043_v20, %v5043_v20 }
 0x147   :  { %757 = vadd.xlane.f32.xlu1 %v756_v59  ;;  %1108 = vadd.xlane.f32.xlu0 %v1107_v25  ;;  %v1104_v59 = vsel %vm731_vm2, %v1012_v17, 0.0  ;;  %v5059_v25 = vadd.f32 %v4825_v39, %v4705_v23  ;;  %v903_v39 = vsel %vm731_vm2, %v4885_v24, 0.0 }
 0x149   :  { %7470 = vst [vmem:[#allocation28_spill] sm:$0xff] %v5059_v25  ;;  %v783_v17 = vsel %vm731_vm2, %v5059_v25, 0.0 }
 0x14b   :  { %895 = vadd.xlane.f32.xlu1 %v894_v15  ;;  %1246 = vadd.xlane.f32.xlu0 %v1245_v31  ;;  %v1224_v31 = vsel %vm731_vm2, %v1052_v19, 0.0  ;;  %v1242_v15 = vsel %vm731_vm2, %v1058_v34, 0.0  ;;  %v1015_v34 = vmul.f32 %v5059_v25, %v5059_v25 }
 0x14f   :  { %1090 = vadd.xlane.f32.xlu1 %v1089_v33  ;;  %1105 = vadd.xlane.f32.xlu0 %v1104_v59  ;;  %v5071_v33 = vadd.f32 %v4705_v23, %v4834_v41  ;;  %v762_v59 = vsel %vm731_vm2, %v4901_v7, 0.0  ;;  %v5083_v41 = vadd.f32 %v4705_v23, %v4836_v44  ;;  %v906_v44 = vsel %vm731_vm2, %v4983_v54, 0.0 }
 0x151   :  { %7471 = vst [vmem:[#allocation29_spill] sm:$0xff] %v5071_v33  ;;  %v780_v19 = vsel %vm731_vm2, %v5071_v33, 0.0  ;;  %7472 = vst [vmem:[#allocation30_spill] sm:$0xff] %v5083_v41 }
 0x153   :  { %1225 = vadd.xlane.f32.xlu1 %v1224_v31  ;;  %1243 = vadd.xlane.f32.xlu0 %v1242_v15  ;;  %v909_v31 = vsel %vm731_vm2, %v4959_v45, 0.0  ;;  %v1113_v15 = vsel %vm731_vm2, %v1015_v34, 0.0  ;;  %v5101_v34 = vadd.f32 %v4843_v51, %v4705_v23  ;;  %v5108_v45 = vpop.permute.xlu0 %2524  ;;  %v5116_v51 = vadd.f32 %v4827_v40, %v4705_v23 }
 0x154   :  { %7476 = vst [vmem:[#allocation34_spill] sm:$0xff] %v5108_v45 }
 0x155   :  { %7474 = vst [vmem:[#allocation32_spill] sm:$0xff] %v5101_v34  ;;  %7477 = vst [vmem:[#allocation35_spill] sm:$0xff] %v5116_v51 }
 0x157   :  { %904 = vadd.xlane.f32.xlu1 %v903_v39  ;;  %784 = vadd.xlane.f32.xlu0 %v783_v17  ;;  %v1014_v17 = vmul.f32 %v5071_v33, %v5071_v33  ;;  %v5090_v39 = vpop.permute.xlu1 %2718 }
 0x158   :  { %7473 = vst [vmem:[#allocation31_spill] sm:$0xff] %v5090_v39 }
 0x159   :  { %v1110_v24 = vsel %vm731_vm2, %v1014_v17, 0.0  ;;  %v5120_v17 = vadd.f32 %v4705_v23, %v4848_v55 }
 0x15b   :  { %763 = vadd.xlane.f32.xlu1 %v762_v59  ;;  %781 = vadd.xlane.f32.xlu0 %v780_v19  ;;  %v1060_v59 = vmul.f32 %v5083_v41, %v5083_v41  ;;  %v5094_v19 = vpop.f32.mrb[44].mxu0  ;;  %7478 = vst [vmem:[#allocation36_spill] sm:$0xff] %v5120_v17  ;;  %v786_v40 = vsel %vm731_vm2, %v5120_v17, 0.0  ;;  %v1016_v63 = vmul.f32 %v5120_v17, %v5120_v17 }
 0x15d   :  { %v1248_v39 = vsel %vm731_vm2, %v1060_v59, 0.0  ;;  %v912_v59 = vsel %vm731_vm2, %v5043_v20, 0.0 }
 0x15f   :  { %910 = vadd.xlane.f32.xlu1 %v909_v31  ;;  %1114 = vadd.xlane.f32.xlu0 %v1113_v15  ;;  %v5104_v31 = vpop.permute.xlu1 %2540  ;;  %v5106_v15 = vpop.f32.mrb[45].mxu0 }
 0x160   :  { %7475 = vst [vmem:[#allocation33_spill] sm:$0xff] %v5104_v31  ;;  %v1017_v31 = vmul.f32 %v5101_v34, %v5101_v34 }
 0x163   :  { %907 = vadd.xlane.f32.xlu1 %v906_v44  ;;  %1111 = vadd.xlane.f32.xlu0 %v1110_v24  ;;  %v789_v24 = vsel %vm731_vm2, %v5101_v34, 0.0  ;;  %v5124_v44 = vpop.permute.xlu1 %2637 }
 0x164   :  { %7479 = vst [vmem:[#allocation37_spill] sm:$0xff] %v5124_v44  ;;  %v1119_v44 = vsel %vm731_vm2, %v1017_v31, 0.0 }
 0x167   :  { %916 = vadd.xlane.f32.xlu1 %v915_v28  ;;  %1249 = vadd.xlane.f32.xlu0 %v1248_v39  ;;  %v5126_v28 = vpop.permute.xlu0 %2621  ;;  %v921_v39 = vsel %vm731_vm2, %v5116_v51, 0.0 }
 0x168   :  { %7480 = vst [vmem:[#allocation38_spill] sm:$0xff] %v5126_v28  ;;  %v1061_v28 = vmul.f32 %v5116_v51, %v5116_v51  ;;  %v1116_v51 = vsel %vm731_vm2, %v1016_v63, 0.0 }
 0x16a   :  { %v1251_v31 = vsel %vm731_vm2, %v1061_v28, 0.0 }
 0x16b   :  { %913 = vadd.xlane.f32.xlu1 %v912_v59  ;;  %790 = vadd.xlane.f32.xlu0 %v789_v24  ;;  %v5138_v59 = vadd.f32 %v4919_v62, %v4705_v23  ;;  %v918_v24 = vsel %vm731_vm2, %v5083_v41, 0.0  ;;  %v5151_v62 = vadd.f32 %v4853_v60, %v4705_v23  ;;  %v5163_v60 = vadd.f32 %v4929_v29, %v4705_v23 }
 0x16d   :  { %7482 = vst [vmem:[#allocation40_spill] sm:$0xff] %v5138_v59  ;;  %7484 = vst [vmem:[#allocation42_spill] sm:$0xff] %v5151_v62  ;;  %v1029_v41 = vmul.f32 %v5138_v59, %v5138_v59  ;;  %v831_v28 = vsel %vm731_vm2, %v5163_v60, 0.0 }
 0x16e   :  { %7486 = vst [vmem:[#allocation44_spill] sm:$0xff] %v5163_v60 }
 0x16f   :  { %922 = vadd.xlane.f32.xlu1 %v921_v39  ;;  %787 = vadd.xlane.f32.xlu0 %v786_v40  ;;  %v1155_v35 = vsel %vm731_vm2, %v1029_v41, 0.0  ;;  %v1019_v41 = vmul.f32 %v5151_v62, %v5151_v62 }
 0x170   :  { %v5134_v55 = vpop.xlane.xlu1 %874  ;;  %v737_v45 = vpop.xlane.xlu0 %736 }
 0x171   :  { %7481 = vst [vmem:[#allocation39_spill] sm:$0xff] %v5134_v55 }
 0x173   :  { %919 = vadd.xlane.f32.xlu1 %v918_v24  ;;  %1120 = vadd.xlane.f32.xlu0 %v1119_v44  ;;  %v795_v24 = vsel %vm731_vm2, %v5151_v62, 0.0 }
 0x174   :  { %v5147_v39 = vpop.xlane.xlu1 %871  ;;  %v734_v40 = vpop.xlane.xlu0 %733 }
 0x175   :  { %7483 = vst [vmem:[#allocation41_spill] sm:$0xff] %v5147_v39  ;;  %v924_v20 = vadd.f32 %v737_v45, %v734_v40  ;;  %v5168_v45 = vadd.f32 %v4705_v23, %v4859_v0  ;;  %v1031_v40 = vmul.f32 %v5163_v60, %v5163_v60 }
 0x177   :  { %1252 = vadd.xlane.f32.xlu1 %v1251_v31  ;;  %1117 = vadd.xlane.f32.xlu0 %v1116_v51  ;;  %7487 = vst [vmem:[#allocation45_spill] sm:$0xff] %v5168_v45  ;;  %v792_v29 = vsel %vm731_vm2, %v5168_v45, 0.0  ;;  %v1161_v27 = vsel %vm731_vm2, %v1031_v40, 0.0  ;;  %v5196_v40 = vadd.f32 %v4705_v23, %v4943_v58 }
 0x178   :  { %v5157_v54 = vpop.xlane.xlu1 %1204  ;;  %v1067_v44 = vpop.xlane.xlu0 %1066 }
 0x179   :  { %7485 = vst [vmem:[#allocation43_spill] sm:$0xff] %v5157_v54  ;;  %7491 = vst [vmem:[#allocation49_spill] sm:$0xff] %v5196_v40 }
 0x17b   :  { %796 = vadd.xlane.f32.xlu0 %v795_v24  ;;  %1156 = vadd.xlane.f32.xlu1 %v1155_v35  ;;  %v5182_v24 = vadd.f32 %v4939_v11, %v4705_v23 }
 0x17c   :  { %v1064_v63 = vpop.xlane.xlu1 %1063  ;;  %v1073_v51 = vpop.xlane.xlu0 %1072 }
 0x17d   :  { %v1254_v31 = vadd.f32 %v1067_v44, %v1064_v63  ;;  %7489 = vst [vmem:[#allocation47_spill] sm:$0xff] %v5182_v24  ;;  %v1125_v44 = vsel %vm731_vm2, %v1019_v41, 0.0  ;;  %v1018_v63 = vmul.f32 %v5168_v45, %v5168_v45  ;;  %v837_v11 = vsel %vm731_vm2, %v5182_v24, 0.0 }
 0x17f   :  { %793 = vadd.xlane.f32.xlu0 %v792_v29  ;;  %832 = vadd.xlane.f32.xlu1 %v831_v28  ;;  %v5190_v28 = vadd.f32 %v4862_v3, %v4705_v23  ;;  %v1122_v41 = vsel %vm731_vm2, %v1018_v63, 0.0 }
 0x180   :  { %v5178_v0 = vpop.xlane.xlu1 %1201  ;;  %v1070_v35 = vpop.xlane.xlu0 %1069 }
 0x181   :  { %7488 = vst [vmem:[#allocation46_spill] sm:$0xff] %v5178_v0  ;;  %v1255_v30 = vadd.f32 %v1254_v31, %v1070_v35  ;;  %7490 = vst [vmem:[#allocation48_spill] sm:$0xff] %v5190_v28  ;;  %v1033_v31 = vmul.f32 %v5182_v24, %v5182_v24  ;;  %v801_v3 = vsel %vm731_vm2, %v5190_v28, 0.0  ;;  %v1032_v35 = vmul.f32 %v5196_v40, %v5196_v40 }
 0x182   :  { %v5214_v24 = vadd.f32 %v4955_v12, %v4705_v23 }
 0x183   :  { %1126 = vadd.xlane.f32.xlu0 %v1125_v44  ;;  %v1256_v60 = vadd.f32 %v1255_v30, %v1073_v51  ;;  %1162 = vadd.xlane.f32.xlu1 %v1161_v27  ;;  %v1167_v51 = vsel %vm731_vm2, %v1033_v31, 0.0  ;;  %v5210_v44 = vadd.f32 %v4705_v23, %v4869_v14 }
 0x184   :  { %v743_v29 = vpop.xlane.xlu1 %742  ;;  %v1079_v55 = vpop.xlane.xlu0 %1078  ;;  %7494 = vst [vmem:[#allocation52_spill] sm:$0xff] %v5214_v24  ;;  %v843_v12 = vsel %vm731_vm2, %v5214_v24, 0.0 }
 0x185   :  { %7493 = vst [vmem:[#allocation51_spill] sm:$0xff] %v5210_v44  ;;  %v798_v54 = vsel %vm731_vm2, %v5210_v44, 0.0 }
 0x187   :  { %1123 = vadd.xlane.f32.xlu0 %v1122_v41  ;;  %838 = vadd.xlane.f32.xlu1 %v837_v11 }
 0x188   :  { %v5201_v27 = vpop.xlane.xlu1 %880  ;;  %v1076_v30 = vpop.xlane.xlu0 %1075 }
 0x189   :  { %7492 = vst [vmem:[#allocation50_spill] sm:$0xff] %v5201_v27  ;;  %v1257_v58 = vadd.f32 %v1256_v60, %v1076_v30  ;;  %v1164_v27 = vsel %vm731_vm2, %v1032_v35, 0.0  ;;  %v1021_v60 = vmul.f32 %v5190_v28, %v5190_v28  ;;  %v1020_v35 = vmul.f32 %v5210_v44, %v5210_v44 }
 0x18b   :  { %802 = vadd.xlane.f32.xlu0 %v801_v3  ;;  %v1258_v63 = vadd.f32 %v1257_v58, %v1079_v55  ;;  %1168 = vadd.xlane.f32.xlu1 %v1167_v51  ;;  %v5225_v3 = vadd.f32 %v4705_v23, %v4961_v48  ;;  %v1131_v51 = vsel %vm731_vm2, %v1021_v60, 0.0 }
 0x18c   :  { %v740_v11 = vpop.xlane.xlu1 %739  ;;  %v1085_v41 = vpop.xlane.xlu0 %1084 }
 0x18d   :  { %v925_v31 = vadd.f32 %v924_v20, %v740_v11  ;;  %7496 = vst [vmem:[#allocation54_spill] sm:$0xff] %v5225_v3  ;;  %v840_v58 = vsel %vm731_vm2, %v5225_v3, 0.0  ;;  %v1128_v11 = vsel %vm731_vm2, %v1020_v35, 0.0 }
 0x18f   :  { %799 = vadd.xlane.f32.xlu0 %v798_v54  ;;  %1165 = vadd.xlane.f32.xlu1 %v1164_v27  ;;  %v926_v14 = vadd.f32 %v925_v31, %v743_v29  ;;  %v5234_v29 = vadd.f32 %v4877_v18, %v4705_v23 }
 0x190   :  { %v5221_v55 = vpop.xlane.xlu1 %877  ;;  %v1082_v30 = vpop.xlane.xlu0 %1081 }
 0x191   :  { %7495 = vst [vmem:[#allocation53_spill] sm:$0xff] %v5221_v55  ;;  %v1259_v20 = vadd.f32 %v1258_v63, %v1082_v30  ;;  %7497 = vst [vmem:[#allocation55_spill] sm:$0xff] %v5234_v29  ;;  %v1035_v63 = vmul.f32 %v5214_v24, %v5214_v24  ;;  %v807_v18 = vsel %vm731_vm2, %v5234_v29, 0.0  ;;  %v1034_v30 = vmul.f32 %v5225_v3, %v5225_v3 }
 0x193   :  { %1132 = vadd.xlane.f32.xlu0 %v1131_v51  ;;  %v1260_v54 = vadd.f32 %v1259_v20, %v1085_v41  ;;  %844 = vadd.xlane.f32.xlu1 %v843_v12  ;;  %v1173_v60 = vsel %vm731_vm2, %v1035_v63, 0.0  ;;  %v5256_v20 = vadd.f32 %v4705_v23, %v4881_v22  ;;  %v1170_v63 = vsel %vm731_vm2, %v1034_v30, 0.0 }
 0x194   :  { %v5236_v27 = vpop.xlane.xlu1 %1210  ;;  %v5238_v48 = vpop.xlane.xlu0 %1228 }
 0x195   :  { %7498 = vst [vmem:[#allocation56_spill] sm:$0xff] %v5236_v27  ;;  %7499 = vst [vmem:[#allocation57_spill] sm:$0xff] %v5238_v48  ;;  %v1022_v30 = vmul.f32 %v5256_v20, %v5256_v20 }
 0x196   :  { %7501 = vst [vmem:[#allocation59_spill] sm:$0xff] %v5256_v20 }
 0x197   :  { %1129 = vadd.xlane.f32.xlu0 %v1128_v11  ;;  %841 = vadd.xlane.f32.xlu1 %v840_v58  ;;  %v5262_v58 = vadd.f32 %v4979_v6, %v4705_v23  ;;  %v804_v11 = vsel %vm731_vm2, %v5256_v20, 0.0 }
 0x198   :  { %v5245_v41 = vpop.xlane.xlu1 %1207  ;;  %v1088_v31 = vpop.xlane.xlu0 %1087 }
 0x199   :  { %7500 = vst [vmem:[#allocation58_spill] sm:$0xff] %v5245_v41  ;;  %v5252_v12 = vadd.f32 %v1260_v54, %v1088_v31  ;;  %7502 = vst [vmem:[#allocation60_spill] sm:$0xff] %v5262_v58  ;;  %v1023_v54 = vmul.f32 %v5234_v29, %v5234_v29  ;;  %v849_v6 = vsel %vm731_vm2, %v5262_v58, 0.0  ;;  %v1037_v3 = vmul.f32 %v5262_v58, %v5262_v58 }
 0x19b   :  { %808 = vadd.xlane.f32.xlu0 %v807_v18  ;;  %1174 = vadd.xlane.f32.xlu1 %v1173_v60  ;;  %v5275_v18 = vadd.f32 %v4705_v23, %v4991_v8  ;;  %v1137_v60 = vsel %vm731_vm2, %v1023_v54, 0.0  ;;  %v1134_v54 = vsel %vm731_vm2, %v1022_v30, 0.0  ;;  %v5314_v30 = vadd.f32 %v5021_v57, %v4705_v23 }
 0x19c   :  { %v749_v51 = vpop.xlane.xlu1 %748  ;;  %v5258_v35 = vpop.xlane.xlu0 %766 }
 0x19d   :  { %7505 = vst [vmem:[#allocation63_spill] sm:$0xff] %v5275_v18  ;;  %v846_v8 = vsel %vm731_vm2, %v5275_v18, 0.0  ;;  %v1036_v27 = vmul.f32 %v5275_v18, %v5275_v18  ;;  %7511 = vst [vmem:[#allocation69_spill] sm:$0xff] %v5314_v30  ;;  %v855_v57 = vsel %vm731_vm2, %v5314_v30, 0.0  ;;  %v5344_v18 = vadd.f32 %v4908_v52, %v4705_v23 }
 0x19f   :  { %805 = vadd.xlane.f32.xlu0 %v804_v11  ;;  %1171 = vadd.xlane.f32.xlu1 %v1170_v63  ;;  %v5284_v63 = vadd.f32 %v4891_v36, %v4705_v23  ;;  %7515 = vst [vmem:[#allocation73_spill] sm:$0xff] %v5344_v18  ;;  %v819_v52 = vsel %vm731_vm2, %v5344_v18, 0.0 }
 0x1a0   :  { %v5269_v22 = vpop.xlane.xlu1 %886  ;;  %v5271_v31 = vpop.xlane.xlu0 %901 }
 0x1a1   :  { %7503 = vst [vmem:[#allocation61_spill] sm:$0xff] %v5269_v22  ;;  %7504 = vst [vmem:[#allocation62_spill] sm:$0xff] %v5271_v31  ;;  %v813_v48 = vsel %vm731_vm2, %v5284_v63, 0.0  ;;  %v1179_v22 = vsel %vm731_vm2, %v1037_v3, 0.0 }
 0x1a2   :  { %7506 = vst [vmem:[#allocation64_spill] sm:$0xff] %v5284_v63 }
 0x1a3   :  { %1138 = vadd.xlane.f32.xlu0 %v1137_v60  ;;  %850 = vadd.xlane.f32.xlu1 %v849_v6 }
 0x1a4   :  { %v746_v11 = vpop.xlane.xlu1 %745  ;;  %v5286_v24 = vpop.xlane.xlu0 %1096 }
 0x1a5   :  { %v927_v31 = vadd.f32 %v926_v14, %v746_v11  ;;  %v5306_v14 = vadd.f32 %v4705_v23, %v4893_v37  ;;  %v1176_v11 = vsel %vm731_vm2, %v1036_v27, 0.0 }
 0x1a7   :  { %1135 = vadd.xlane.f32.xlu0 %v1134_v54  ;;  %847 = vadd.xlane.f32.xlu1 %v846_v8  ;;  %v5293_v60 = vadd.f32 %v927_v31, %v749_v51  ;;  %7509 = vst [vmem:[#allocation67_spill] sm:$0xff] %v5306_v14  ;;  %v810_v3 = vsel %vm731_vm2, %v5306_v14, 0.0  ;;  %v1025_v8 = vmul.f32 %v5284_v63, %v5284_v63 }
 0x1a8   :  { %v5295_v6 = vpop.xlane.xlu1 %883  ;;  %v5297_v36 = vpop.xlane.xlu0 %1234  ;;  %v1024_v54 = vmul.f32 %v5306_v14, %v5306_v14 }
 0x1a9   :  { %7507 = vst [vmem:[#allocation65_spill] sm:$0xff] %v5295_v6  ;;  %7508 = vst [vmem:[#allocation66_spill] sm:$0xff] %v5297_v36  ;;  %v1143_v27 = vsel %vm731_vm2, %v1025_v8, 0.0 }
 0x1aa   :  { %v1140_v8 = vsel %vm731_vm2, %v1024_v54, 0.0 }
 0x1ab   :  { %814 = vadd.xlane.f32.xlu0 %v813_v48  ;;  %1180 = vadd.xlane.f32.xlu1 %v1179_v22  ;;  %v5327_v22 = vadd.f32 %v4705_v23, %v5031_v43  ;;  %v1039_v43 = vmul.f32 %v5314_v30, %v5314_v30  ;;  %v5356_v30 = vadd.f32 %v4705_v23, %v4910_v53 }
 0x1ac   :  { %v5308_v51 = vpop.xlane.xlu1 %1216  ;;  %v5310_v31 = vpop.xlane.xlu0 %1093  ;;  %v1027_v53 = vmul.f32 %v5344_v18, %v5344_v18 }
 0x1ad   :  { %7510 = vst [vmem:[#allocation68_spill] sm:$0xff] %v5308_v51  ;;  %7514 = vst [vmem:[#allocation72_spill] sm:$0xff] %v5327_v22  ;;  %v852_v58 = vsel %vm731_vm2, %v5327_v22, 0.0  ;;  %v1185_v36 = vsel %vm731_vm2, %v1039_v43, 0.0  ;;  %v1026_v51 = vmul.f32 %v5356_v30, %v5356_v30 }
 0x1ae   :  { %7517 = vst [vmem:[#allocation75_spill] sm:$0xff] %v5356_v30 }
 0x1af   :  { %811 = vadd.xlane.f32.xlu0 %v810_v3  ;;  %1177 = vadd.xlane.f32.xlu1 %v1176_v11 }
 0x1b0   :  { %v5321_v37 = vpop.xlane.xlu1 %1213  ;;  %v5323_v48 = vpop.xlane.xlu0 %1231 }
 0x1b1   :  { %7512 = vst [vmem:[#allocation70_spill] sm:$0xff] %v5321_v37  ;;  %7513 = vst [vmem:[#allocation71_spill] sm:$0xff] %v5323_v48  ;;  %v1038_v48 = vmul.f32 %v5327_v22, %v5327_v22  ;;  %v816_v22 = vsel %vm731_vm2, %v5356_v30, 0.0 }
 0x1b3   :  { %1144 = vadd.xlane.f32.xlu0 %v1143_v27  ;;  %856 = vadd.xlane.f32.xlu1 %v855_v57  ;;  %v1182_v43 = vsel %vm731_vm2, %v1038_v48, 0.0  ;;  %v1149_v48 = vsel %vm731_vm2, %v1027_v53, 0.0 }
 0x1b4   :  { %v5334_v3 = vpop.xlane.xlu1 %754  ;;  %v5336_v11 = vpop.xlane.xlu0 %772 }
 0x1b7   :  { %1141 = vadd.xlane.f32.xlu0 %v1140_v8  ;;  %853 = vadd.xlane.f32.xlu1 %v852_v58  ;;  %v5366_v8 = vadd.f32 %v5061_v13, %v4705_v23 }
 0x1b8   :  { %v5347_v27 = vpop.xlane.xlu1 %892  ;;  %v5349_v57 = vpop.xlane.xlu0 %769 }
 0x1b9   :  { %7516 = vst [vmem:[#allocation74_spill] sm:$0xff] %v5347_v27  ;;  %7518 = vst [vmem:[#allocation76_spill] sm:$0xff] %v5366_v8  ;;  %v5379_v27 = vadd.f32 %v4705_v23, %v5067_v2  ;;  %v861_v13 = vsel %vm731_vm2, %v5366_v8, 0.0  ;;  %v1041_v2 = vmul.f32 %v5366_v8, %v5366_v8  ;;  %v825_v8 = vsel %vm731_vm2, %v5138_v59, 0.0 }
 0x1bb   :  { %820 = vadd.xlane.f32.xlu0 %v819_v52  ;;  %1186 = vadd.xlane.f32.xlu1 %v1185_v36  ;;  %7521 = vst [vmem:[#allocation79_spill] sm:$0xff] %v5379_v27 }
 0x1bc   :  { %v5360_v54 = vpop.xlane.xlu1 %751  ;;  %v5362_v58 = vpop.xlane.xlu0 %1102 }
 0x1bf   :  { %817 = vadd.xlane.f32.xlu0 %v816_v22  ;;  %1183 = vadd.xlane.f32.xlu1 %v1182_v43 }
 0x1c0   :  { %v5373_v52 = vpop.xlane.xlu1 %889  ;;  %v5375_v36 = vpop.xlane.xlu0 %1240 }
 0x1c1   :  { %7519 = vst [vmem:[#allocation77_spill] sm:$0xff] %v5373_v52  ;;  %7520 = vst [vmem:[#allocation78_spill] sm:$0xff] %v5375_v36  ;;  %v858_v36 = vsel %vm731_vm2, %v5379_v27, 0.0  ;;  %v1146_v52 = vsel %vm731_vm2, %v1026_v51, 0.0 }
 0x1c3   :  { %1150 = vadd.xlane.f32.xlu0 %v1149_v48  ;;  %862 = vadd.xlane.f32.xlu1 %v861_v13  ;;  %v1191_v13 = vsel %vm731_vm2, %v1041_v2, 0.0  ;;  %v1040_v48 = vmul.f32 %v5379_v27, %v5379_v27 }
 0x1c4   :  { %v5386_v22 = vpop.xlane.xlu1 %1222  ;;  %v5388_v43 = vpop.xlane.xlu0 %1099 }
 0x1c5   :  { %7522 = vst [vmem:[#allocation80_spill] sm:$0xff] %v5386_v22  ;;  %v5404_v22 = vadd.f32 %v4705_v23, %v4921_v1  ;;  %v1188_v2 = vsel %vm731_vm2, %v1040_v48, 0.0  ;;  %v5433_v48 = vadd.f32 %v4705_v23, %v4935_v47 }
 0x1c7   :  { %1147 = vadd.xlane.f32.xlu0 %v1146_v52  ;;  %859 = vadd.xlane.f32.xlu1 %v858_v36  ;;  %7525 = vst [vmem:[#allocation83_spill] sm:$0xff] %v5404_v22  ;;  %v5414_v36 = vadd.f32 %v5094_v19, %v4705_v23  ;;  %v822_v27 = vsel %vm731_vm2, %v5404_v22, 0.0  ;;  %v1028_v1 = vmul.f32 %v5404_v22, %v5404_v22  ;;  %7529 = vst [vmem:[#allocation87_spill] sm:$0xff] %v5433_v48 }
 0x1c8   :  { %v5395_v53 = vpop.xlane.xlu1 %1219  ;;  %v5397_v6 = vpop.xlane.xlu0 %1237  ;;  %v828_v37 = vsel %vm731_vm2, %v5433_v48, 0.0 }
 0x1c9   :  { %7523 = vst [vmem:[#allocation81_spill] sm:$0xff] %v5395_v53  ;;  %7524 = vst [vmem:[#allocation82_spill] sm:$0xff] %v5397_v6  ;;  %v5427_v6 = vadd.f32 %v4705_v23, %v5106_v15  ;;  %v867_v19 = vsel %vm731_vm2, %v5414_v36, 0.0  ;;  %v1152_v53 = vsel %vm731_vm2, %v1028_v1, 0.0  ;;  %v1043_v15 = vmul.f32 %v5414_v36, %v5414_v36 }
 0x1ca   :  { %7526 = vst [vmem:[#allocation84_spill] sm:$0xff] %v5414_v36  ;;  %v1030_v23 = vmul.f32 %v5433_v48, %v5433_v48 }
 0x1cb   :  { %826 = vadd.xlane.f32.xlu0 %v825_v8  ;;  %1192 = vadd.xlane.f32.xlu1 %v1191_v13  ;;  %7528 = vst [vmem:[#allocation86_spill] sm:$0xff] %v5427_v6  ;;  %v1197_v1 = vsel %vm731_vm2, %v1043_v15, 0.0 }
 0x1cc   :  { %v5408_v51 = vpop.xlane.xlu1 %760  ;;  %v5410_v52 = vpop.xlane.xlu0 %778  ;;  %v1158_v55 = vsel %vm731_vm2, %v1030_v23, 0.0 }
 0x1cf   :  { %823 = vadd.xlane.f32.xlu0 %v822_v27  ;;  %1189 = vadd.xlane.f32.xlu1 %v1188_v2 }
 0x1d0   :  { %v5421_v8 = vpop.xlane.xlu1 %898  ;;  %v5423_v13 = vpop.xlane.xlu0 %775 }
 0x1d1   :  { %7527 = vst [vmem:[#allocation85_spill] sm:$0xff] %v5421_v8  ;;  %v864_v8 = vsel %vm731_vm2, %v5427_v6, 0.0 }
 0x1d3   :  { %1153 = vadd.xlane.f32.xlu0 %v1152_v53  ;;  %868 = vadd.xlane.f32.xlu1 %v867_v19  ;;  %v1042_v19 = vmul.f32 %v5427_v6, %v5427_v6 }
 0x1d4   :  { %v758_v27 = vpop.xlane.xlu1 %757  ;;  %v5436_v2 = vpop.xlane.xlu0 %1108 }
 0x1d5   :  { %v1194_v39 = vsel %vm731_vm2, %v1042_v19, 0.0 }
 0x1d7   :  { %829 = vadd.xlane.f32.xlu0 %v828_v37  ;;  %865 = vadd.xlane.f32.xlu1 %v864_v8  ;;  %v834_v8 = vsel %vm731_vm2, %v5196_v40, 0.0 }
 0x1d8   :  { %v5446_v47 = vpop.xlane.xlu1 %895  ;;  %v5448_v53 = vpop.xlane.xlu0 %1246 }
 0x1d9   :  { %7530 = vst [vmem:[#allocation88_spill] sm:$0xff] %v5446_v47  ;;  %7531 = vst [vmem:[#allocation89_spill] sm:$0xff] %v5448_v53 }
 0x1db   :  { %1159 = vadd.xlane.f32.xlu0 %v1158_v55  ;;  %1198 = vadd.xlane.f32.xlu1 %v1197_v1 }
 0x1dc   :  { %v1091_v36 = vpop.xlane.xlu1 %1090  ;;  %v1106_v41 = vpop.xlane.xlu0 %1105 }
 0x1dd   :  { %v1262_v37 = vadd.f32 %v5252_v12, %v1091_v36 }
 0x1df   :  { %v1263_v48 = vadd.f32 %v1262_v37, %v5310_v31  ;;  %835 = vadd.xlane.f32.xlu0 %v834_v8  ;;  %1195 = vadd.xlane.f32.xlu1 %v1194_v39 }
 0x1e0   :  { %v5459_v15 = vpop.xlane.xlu1 %1225  ;;  %v5461_v6 = vpop.xlane.xlu0 %1243 }
 0x1e1   :  { %7532 = vst [vmem:[#allocation90_spill] sm:$0xff] %v5459_v15  ;;  %7533 = vst [vmem:[#allocation91_spill] sm:$0xff] %v5461_v6  ;;  %v1264_v55 = vadd.f32 %v1263_v48, %v5286_v24 }
 0x1e4   :  { %v5464_v23 = vpop.xlane.xlu1 %904  ;;  %v785_v1 = vpop.xlane.xlu0 %784 }
 0x1e5   :  { %7534 = vst [vmem:[#allocation92_spill] sm:$0xff] %v5464_v23 }
 0x1e8   :  { %v764_v53 = vpop.xlane.xlu1 %763  ;;  %v782_v19 = vpop.xlane.xlu0 %781 }
 0x1ec   :  { %v5466_v47 = vpop.xlane.xlu1 %910  ;;  %v1115_v12 = vpop.xlane.xlu0 %1114 }
 0x1ed   :  { %7535 = vst [vmem:[#allocation93_spill] sm:$0xff] %v5466_v47 }
 0x1f0   :  { %v5468_v36 = vpop.xlane.xlu1 %907  ;;  %v1112_v40 = vpop.xlane.xlu0 %1111 }
 0x1f1   :  { %7536 = vst [vmem:[#allocation94_spill] sm:$0xff] %v5468_v36 }
 0x1f4   :  { %v5470_v31 = vpop.xlane.xlu1 %916  ;;  %v5472_v39 = vpop.xlane.xlu0 %1249 }
 0x1f5   :  { %7537 = vst [vmem:[#allocation95_spill] sm:$0xff] %v5470_v31  ;;  %7538 = vst [vmem:[#allocation96_spill] sm:$0xff] %v5472_v39  ;;  %v929_v39 = vadd.f32 %v5293_v60, %v5360_v54 }
 0x1f8   :  { %v5474_v37 = vpop.xlane.xlu1 %913  ;;  %v791_v8 = vpop.xlane.xlu0 %790 }
 0x1f9   :  { %7539 = vst [vmem:[#allocation97_spill] sm:$0xff] %v5474_v37 }
 0x1fc   :  { %v5476_v6 = vpop.xlane.xlu1 %922  ;;  %v788_v24 = vpop.xlane.xlu0 %787 }
 0x1fd   :  { %7540 = vst [vmem:[#allocation98_spill] sm:$0xff] %v5476_v6  ;;  %v930_v6 = vadd.f32 %v929_v39, %v5334_v3 }
 0x1ff   :  { %v931_v30 = vadd.f32 %v930_v6, %v758_v27 }
 0x200   :  { %v5478_v48 = vpop.xlane.xlu1 %919  ;;  %v1121_v23 = vpop.xlane.xlu0 %1120 }
 0x201   :  { %7541 = vst [vmem:[#allocation99_spill] sm:$0xff] %v5478_v48  ;;  %v932_v14 = vadd.f32 %v931_v30, %v5408_v51 }
 0x203   :  { %v933_v29 = vadd.f32 %v932_v14, %v764_v53  ;;  %v1265_v14 = vadd.f32 %v1264_v55, %v5388_v43 }
 0x204   :  { %v5480_v15 = vpop.xlane.xlu1 %1252  ;;  %v1118_v47 = vpop.xlane.xlu0 %1117 }
 0x205   :  { %7542 = vst [vmem:[#allocation100_spill] sm:$0xff] %v5480_v15  ;;  %v934_v60 = vadd.f32 %v933_v29, %v5258_v35  ;;  %v1266_v53 = vadd.f32 %v1265_v14, %v5362_v58 }
 0x207   :  { %v935_v3 = vadd.f32 %v934_v60, %v5349_v57 }
 0x208   :  { %v797_v0 = vpop.xlane.xlu0 %796  ;;  %v5482_v59 = vpop.xlane.xlu1 %1156 }
 0x209   :  { %v936_v6 = vadd.f32 %v935_v3, %v5336_v11  ;;  %v1267_v11 = vadd.f32 %v1266_v53, %v1106_v41 }
 0x20b   :  { %v937_v51 = vadd.f32 %v936_v6, %v5423_v13  ;;  %v1268_v43 = vadd.f32 %v1267_v11, %v5436_v2 }
 0x20c   :  { %v794_v36 = vpop.xlane.xlu0 %793  ;;  %v5484_v22 = vpop.xlane.xlu1 %832 }
 0x20d   :  { %v938_v57 = vadd.f32 %v937_v51, %v5410_v52  ;;  %v1269_v13 = vadd.f32 %v1268_v43, %v1112_v40 }
 0x20f   :  { %v939_v3 = vadd.f32 %v938_v57, %v782_v19  ;;  %v1270_v52 = vadd.f32 %v1269_v13, %v1115_v12 }
 0x210   :  { %v1127_v31 = vpop.xlane.xlu0 %1126  ;;  %v5488_v37 = vpop.xlane.xlu1 %1162 }
 0x211   :  { %v940_v55 = vadd.f32 %v939_v3, %v785_v1  ;;  %v1271_v33 = vadd.f32 %v1270_v52, %v1118_v47  ;;  %v7543_v47 = vmov 0.0  }
 0x212   :  { %1912 = vst.msk [vmem:[#allocation3 + $0x10] sm:$0x1] %vm1911_vm8, %v7543_v47  ;;  %1913 = vst.msk [vmem:[#allocation3 + $0x20] sm:$0x1] %vm1911_vm8, %v7543_v47 }
 0x213   :  { %v941_v58 = vadd.f32 %v940_v55, %v788_v24  ;;  %v1272_v57 = vadd.f32 %v1271_v33, %v1121_v23  ;;  %1914 = vst.msk [vmem:[#allocation3 + $0x30] sm:$0x1] %vm1911_vm8, %v7543_v47  ;;  %1915 = vst.msk [vmem:[#allocation3 + $0x40] sm:$0x1] %vm1911_vm8, %v7543_v47 }
 0x214   :  { %v1124_v18 = vpop.xlane.xlu0 %1123  ;;  %v5491_v48 = vpop.xlane.xlu1 %838  ;;  %1916 = vst.msk [vmem:[#allocation3 + $0x50] sm:$0x1] %vm1911_vm8, %v7543_v47  ;;  %1917 = vst.msk [vmem:[#allocation3 + $0x60] sm:$0x1] %vm1911_vm8, %v7543_v47 }
 0x215   :  { %v942_v41 = vadd.f32 %v941_v58, %v791_v8  ;;  %v1273_v49 = vadd.f32 %v1272_v57, %v1124_v18  ;;  %1918 = vst.msk [vmem:[#allocation3 + $0x70] sm:$0x1] %vm1911_vm8, %v7543_v47  ;;  %1919 = vst.msk [vmem:[#allocation3 + $0x80] sm:$0x1] %vm1911_vm8, %v7543_v47 }
 0x216   :  { %1920 = vst.msk [vmem:[#allocation3 + $0xb0] sm:$0x1] %vm1911_vm8, %v7543_v47  ;;  %1921 = vst.msk [vmem:[#allocation3 + $0xc0] sm:$0x1] %vm1911_vm8, %v7543_v47 }
 0x217   :  { %v943_v19 = vadd.f32 %v942_v41, %v794_v36  ;;  %v1274_v11 = vadd.f32 %v1273_v49, %v1127_v31  ;;  %1922 = vst.msk [vmem:[#allocation3 + $0xd0] sm:$0x1] %vm1911_vm8, %v7543_v47  ;;  %1923 = vst.msk [vmem:[#allocation3 + $0xe0] sm:$0x1] %vm1911_vm8, %v7543_v47 }
 0x218   :  { %v803_v15 = vpop.xlane.xlu0 %802  ;;  %v5493_v63 = vpop.xlane.xlu1 %1168  ;;  %1924 = vst.msk [vmem:[#allocation3 + $0xf0] sm:$0x1] %vm1911_vm8, %v7543_v47  ;;  %1925 = vst.msk [vmem:[#allocation3 + $0x100] sm:$0x1] %vm1911_vm8, %v7543_v47 }
 0x219   :  { %v944_v2 = vadd.f32 %v943_v19, %v797_v0  ;;  %1926 = vst.msk [vmem:[#allocation3 + $0x110] sm:$0x1] %vm1911_vm8, %v7543_v47  ;;  %1927 = vst.msk [vmem:[#allocation3 + $0x120] sm:$0x1] %vm1911_vm8, %v7543_v47 }
 0x21a   :  { %1928 = vst.msk [vmem:[#allocation3 + $0x19] sm:$0x1] %vm1911_vm8, %v7543_v47  ;;  %1929 = vst.msk [vmem:[#allocation3 + $0x29] sm:$0x1] %vm1911_vm8, %v7543_v47 }
 0x21b   :  { %1930 = vst.msk [vmem:[#allocation3 + $0x39] sm:$0x1] %vm1911_vm8, %v7543_v47  ;;  %1931 = vst.msk [vmem:[#allocation3 + $0x49] sm:$0x1] %vm1911_vm8, %v7543_v47 }
 0x21c   :  { %v800_v20 = vpop.xlane.xlu0 %799  ;;  %v5496_v28 = vpop.xlane.xlu1 %1165  ;;  %1932 = vst.msk [vmem:[#allocation3 + $0x59] sm:$0x1] %vm1911_vm8, %v7543_v47  ;;  %1933 = vst.msk [vmem:[#allocation3 + $0x69] sm:$0x1] %vm1911_vm8, %v7543_v47 }
 0x21d   :  { %v945_v1 = vadd.f32 %v944_v2, %v800_v20  ;;  %1934 = vst.msk [vmem:[#allocation3 + $0x79] sm:$0x1] %vm1911_vm8, %v7543_v47  ;;  %1935 = vst.msk [vmem:[#allocation3 + $0x89] sm:$0x1] %vm1911_vm8, %v7543_v47 }
 0x21e   :  { %1936 = vst.msk [vmem:[#allocation3 + $0xb9] sm:$0x1] %vm1911_vm8, %v7543_v47  ;;  %1937 = vst.msk [vmem:[#allocation3 + $0xc9] sm:$0x1] %vm1911_vm8, %v7543_v47 }
 0x21f   :  { %v946_v12 = vadd.f32 %v945_v1, %v803_v15  ;;  %1938 = vst.msk [vmem:[#allocation3 + $0xd9] sm:$0x1] %vm1911_vm8, %v7543_v47  ;;  %1939 = vst.msk [vmem:[#allocation3 + $0xe9] sm:$0x1] %vm1911_vm8, %v7543_v47 }
 0x220   :  { %v5499_v54 = vpop.xlane.xlu0 %1132  ;;  %v5501_v44 = vpop.xlane.xlu1 %844  ;;  %1940 = vst.msk [vmem:[#allocation3 + $0xf9] sm:$0x1] %vm1911_vm8, %v7543_v47  ;;  %1941 = vst.msk [vmem:[#allocation3 + $0x109] sm:$0x1] %vm1911_vm8, %v7543_v47 }
 0x221   :  { %1942 = vst.msk [vmem:[#allocation3 + $0x119] sm:$0x1] %vm1911_vm8, %v7543_v47  ;;  %1943 = vst.msk [vmem:[#allocation3 + $0x129] sm:$0x1] %vm1911_vm8, %v7543_v47  ;;  %v5891_v47 = vld [vmem:[%s7338_s1 + $0xe4] sm:$0xff]  ;;  %vm3548_vm8 = vcmask 523264  }
 0x222   :  { %7584 = vst [vmem:[#allocation105_spill] sm:$0xff] %v5891_v47 }
 0x224   :  { %v1130_v39 = vpop.xlane.xlu0 %1129  ;;  %v5504_v62 = vpop.xlane.xlu1 %841 }
 0x225   :  { %v1275_v24 = vadd.f32 %v1274_v11, %v1130_v39 }
 0x227   :  { %v1276_v49 = vadd.f32 %v1275_v24, %v5499_v54 }
 0x228   :  { %v5507_v27 = vpop.xlane.xlu0 %808  ;;  %v5509_v30 = vpop.xlane.xlu1 %1174 }
 0x22c   :  { %v806_v29 = vpop.xlane.xlu0 %805  ;;  %v5513_v35 = vpop.xlane.xlu1 %1171 }
 0x22d   :  { %v947_v13 = vadd.f32 %v946_v12, %v806_v29 }
 0x22f   :  { %v948_v20 = vadd.f32 %v947_v13, %v5507_v27 }
 0x230   :  { %v5517_v60 = vpop.xlane.xlu0 %1138  ;;  %v5519_v45 = vpop.xlane.xlu1 %850 }
 0x234   :  { %v5521_v34 = vpop.xlane.xlu0 %1135  ;;  %v5523_v17 = vpop.xlane.xlu1 %847 }
 0x235   :  { %v1277_v0 = vadd.f32 %v1276_v49, %v5521_v34 }
 0x237   :  { %v1278_v23 = vadd.f32 %v1277_v0, %v5517_v60 }
 0x238   :  { %v5526_v6 = vpop.xlane.xlu0 %814  ;;  %v5528_v25 = vpop.xlane.xlu1 %1180 }
 0x23c   :  { %v812_v14 = vpop.xlane.xlu0 %811  ;;  %v5530_v51 = vpop.xlane.xlu1 %1177 }
 0x23d   :  { %v949_v15 = vadd.f32 %v948_v20, %v812_v14 }
 0x23f   :  { %v950_v39 = vadd.f32 %v949_v15, %v5526_v6 }
 0x240   :  { %v1145_v53 = vpop.xlane.xlu0 %1144  ;;  %v5532_v9 = vpop.xlane.xlu1 %856 }
 0x244   :  { %v1142_v40 = vpop.xlane.xlu0 %1141  ;;  %v5534_v43 = vpop.xlane.xlu1 %853 }
 0x245   :  { %v1279_v8 = vadd.f32 %v1278_v23, %v1142_v40 }
 0x247   :  { %v1280_v52 = vadd.f32 %v1279_v8, %v1145_v53 }
 0x248   :  { %v821_v3 = vpop.xlane.xlu0 %820  ;;  %v5601_v33 = vpop.xlane.xlu1 %1186 }
 0x24c   :  { %v818_v55 = vpop.xlane.xlu0 %817  ;;  %v1184_v31 = vpop.xlane.xlu1 %1183 }
 0x24d   :  { %v951_v29 = vadd.f32 %v950_v39, %v818_v55 }
 0x24f   :  { %v952_v19 = vadd.f32 %v951_v29, %v821_v3 }
 0x250   :  { %v1151_v18 = vpop.xlane.xlu0 %1150  ;;  %v5607_v41 = vpop.xlane.xlu1 %862 }
 0x254   :  { %v1148_v36 = vpop.xlane.xlu0 %1147  ;;  %v5609_v14 = vpop.xlane.xlu1 %859 }
 0x255   :  { %v1281_v54 = vadd.f32 %v1280_v52, %v1148_v36 }
 0x257   :  { %v1282_v27 = vadd.f32 %v1281_v54, %v1151_v18 }
 0x258   :  { %v827_v58 = vpop.xlane.xlu0 %826  ;;  %v1193_v53 = vpop.xlane.xlu1 %1192 }
 0x25c   :  { %v824_v57 = vpop.xlane.xlu0 %823  ;;  %v1190_v15 = vpop.xlane.xlu1 %1189 }
 0x25d   :  { %v953_v34 = vadd.f32 %v952_v19, %v824_v57 }
 0x25f   :  { %v954_v2 = vadd.f32 %v953_v34, %v827_v58 }
 0x260   :  { %v1154_v1 = vpop.xlane.xlu0 %1153 }
 0x261   :  { %v955_v60 = vrot.slane %v954_v2, 4  ;;  %v1283_v11 = vadd.f32 %v1282_v27, %v1154_v1 }
 0x263   :  { %v956_v24 = vadd.f32 %v955_v60, %v954_v2  ;;  %v1284_v40 = vadd.f32 %v1283_v11, %v5482_v59  ;;  %v5615_v59 = vpop.xlane.xlu1 %868 }
 0x264   :  { %v830_v6 = vpop.xlane.xlu0 %829 }
 0x265   :  { %v957_v12 = vrot.slane %v956_v24, 2  ;;  %v1285_v13 = vrot.slane %v1284_v40, 4  ;;  %v961_v29 = vadd.f32 %v5484_v22, %v830_v6 }
 0x267   :  { %v1286_v55 = vadd.f32 %v1285_v13, %v1284_v40  ;;  %v958_v0 = vadd.f32 %v957_v12, %v956_v24  ;;  %v866_v2 = vpop.xlane.xlu1 %865 }
 0x268   :  { %v1160_v49 = vpop.xlane.xlu0 %1159 }
 0x269   :  { %v1287_v3 = vrot.slane %v1286_v55, 2  ;;  %v1291_v20 = vadd.f32 %v5488_v37, %v1160_v49  ;;  %v959_v18 = vrot.slane %v958_v0, 1 }
 0x26b   :  { %v1288_v23 = vadd.f32 %v1287_v3, %v1286_v55  ;;  %v1292_v36 = vadd.f32 %v1291_v20, %v5496_v28  ;;  %v960_v39 = vadd.f32 %v959_v18, %v958_v0  ;;  %v1199_v6 = vpop.xlane.xlu1 %1198 }
 0x26c   :  { %v836_v8 = vpop.xlane.xlu0 %835 }
 0x26d   :  { %v1289_v58 = vrot.slane %v1288_v23, 1  ;;  %v1293_v52 = vadd.f32 %v1292_v36, %v5493_v63  ;;  %v962_v54 = vadd.f32 %v961_v29, %v836_v8  ;;  %v5618_v19 = vmul.f32 0.00048828125, %v960_v39  ;;  %v7551_v8 = vld [vmem:[#allocation42_spill] sm:$0xff]  ;;  %v7552_v29 = vld [vmem:[#allocation51_spill] sm:$0xff] }
 0x26f   :  { %v1290_v57 = vadd.f32 %v1289_v58, %v1288_v23  ;;  %v1294_v37 = vadd.f32 %v1293_v52, %v5513_v35  ;;  %v963_v34 = vadd.f32 %v962_v54, %v5491_v48  ;;  %v1333_v28 = vmul.f32 %v5618_v19, %v5618_v19  ;;  %v1196_v3 = vpop.xlane.xlu1 %1195  ;;  %v7550_v23 = vld [vmem:[#allocation45_spill] sm:$0xff]  ;;  %v7553_v52 = vld [vmem:[#allocation48_spill] sm:$0xff] }
 0x270   :  { %v1337_v48 = vsub.f32 %v4717_v32, %v5618_v19  ;;  %v1338_v12 = vsub.f32 %v4708_v26, %v5618_v19  ;;  %v1342_v32 = vsub.f32 %v4754_v56, %v5618_v19  ;;  %v1344_v26 = vsub.f32 %v4778_v10, %v5618_v19 }
 0x271   :  { %v1331_v27 = vmul.f32 0.00048828125, %v1290_v57  ;;  %v1295_v22 = vadd.f32 %v1294_v37, %v5509_v30  ;;  %v964_v1 = vadd.f32 %v963_v34, %v5504_v62  ;;  %v1348_v56 = vsub.f32 %v4856_v61, %v5618_v19  ;;  %v7547_v61 = vld [vmem:[#allocation28_spill] sm:$0xff]  ;;  %v7554_v57 = vld [vmem:[#allocation59_spill] sm:$0xff] }
 0x272   :  { %v1350_v10 = vsub.f32 %v4933_v46, %v5618_v19  ;;  %v1354_v0 = vsub.f32 %v7547_v61, %v5618_v19  ;;  %v7549_v46 = vld [vmem:[#allocation32_spill] sm:$0xff]  ;;  %v1357_v36 = vsub.f32 %v7550_v23, %v5618_v19  ;;  %v1358_v39 = vsub.f32 %v7551_v8, %v5618_v19  ;;  %v7555_v34 = vld [vmem:[#allocation55_spill] sm:$0xff] }
 0x273   :  { %v1335_v60 = vsub.f32 %v1331_v27, %v1333_v28  ;;  %v965_v63 = vadd.f32 %v964_v1, %v5501_v44  ;;  %v1296_v11 = vadd.f32 %v1295_v22, %v5530_v51  ;;  %v1339_v44 = vsub.f32 %v4745_v50, %v5618_v19  ;;  %v7556_v27 = vld [vmem:[#allocation67_spill] sm:$0xff]  ;;  %v7557_v1 = vld [vmem:[#allocation64_spill] sm:$0xff] }
 0x274   :  { %v1340_v51 = vsub.f32 %v4727_v38, %v5618_v19  ;;  %v1345_v50 = vsub.f32 %v4830_v42, %v5618_v19  ;;  %v1346_v38 = vsub.f32 %v5005_v5, %v5618_v19  ;;  %v7544_v42 = vld [vmem:[#allocation24_spill] sm:$0xff]  ;;  %v7545_v5 = vld [vmem:[#allocation23_spill] sm:$0xff]  ;;  %v1359_v58 = vsub.f32 %v7552_v29, %v5618_v19 }
 0x275   :  { %v1401_v24 = vadd.f32 1e-05, %v1335_v60  ;;  %v966_v40 = vadd.f32 %v965_v63, %v5523_v17  ;;  %v1297_v35 = vadd.f32 %v1296_v11, %v5528_v25  ;;  %v1341_v25 = vsub.f32 %v4771_v4, %v5618_v19  ;;  %v7558_v63 = vld [vmem:[#allocation75_spill] sm:$0xff] }
 0x276   :  { %v1343_v17 = vsub.f32 %v4800_v21, %v5618_v19  ;;  %v1347_v4 = vsub.f32 %v4901_v7, %v5618_v19  ;;  %v1349_v21 = vsub.f32 %v4951_v16, %v5618_v19  ;;  %v1351_v13 = vsub.f32 %v7544_v42, %v5618_v19  ;;  %v7546_v7 = vld [vmem:[#allocation29_spill] sm:$0xff]  ;;  %v7548_v16 = vld [vmem:[#allocation36_spill] sm:$0xff] }
 0x277   :  { %4336 = vrsqrt.f32 %v1401_v24  ;;  %v1298_v30 = vadd.f32 %v1297_v35, %v1184_v31  ;;  %v967_v62 = vadd.f32 %v966_v40, %v5519_v45  ;;  %v1352_v55 = vsub.f32 %v7545_v5, %v5618_v19  ;;  %v7559_v24 = vld [vmem:[#allocation73_spill] sm:$0xff] }
 0x278   :  { %v1353_v49 = vsub.f32 %v7546_v7, %v5618_v19  ;;  %v1355_v20 = vsub.f32 %v7548_v16, %v5618_v19  ;;  %v1360_v54 = vsub.f32 %v7553_v52, %v5618_v19  ;;  %v1361_v37 = vsub.f32 %v7554_v57, %v5618_v19  ;;  %v5804_v57 = vld [vmem:[%s7338_s1 + $0xb4] sm:$0xff] }
 0x279   :  { %v1299_v45 = vadd.f32 %v1298_v30, %v5601_v33  ;;  %v968_v31 = vadd.f32 %v967_v62, %v5534_v43  ;;  %v1362_v28 = vsub.f32 %v7555_v34, %v5618_v19  ;;  %v1363_v22 = vsub.f32 %v7556_v27, %v5618_v19  ;;  %v7560_v30 = vld [vmem:[#allocation83_spill] sm:$0xff]  ;;  %7573 = vst [vmem:[#allocation55_spill] sm:$0xff] %v5804_v57  ;;  %v5814_v34 = vld [vmem:[%s7338_s1 + $0x74] sm:$0xff] }
 0x27a   :  { %v1364_v60 = vsub.f32 %v7557_v1, %v5618_v19  ;;  %v1365_v11 = vsub.f32 %v7558_v63, %v5618_v19  ;;  %v1366_v40 = vsub.f32 %v7559_v24, %v5618_v19  ;;  %v1367_v62 = vsub.f32 %v7560_v30, %v5618_v19  ;;  %7575 = vst [vmem:[#allocation64_spill] sm:$0xff] %v5814_v34  ;;  %v5832_v1 = vld [vmem:[%s7338_s1 + $0xac] sm:$0xff]  ;;  %v5842_v63 = vld [vmem:[%s7338_s1 + $0x7c] sm:$0xff]  ;;  %v5859_v30 = vld [vmem:[%s7338_s1 + $0xc4] sm:$0xff] }
 0x27b   :  { %v1300_v33 = vadd.f32 %v1299_v45, %v1190_v15  ;;  %v969_v43 = vadd.f32 %v968_v31, %v5532_v9  ;;  %v1356_v15 = vsub.f32 %v7549_v46, %v5618_v19  ;;  %v7561_v45 = vld [vmem:[#allocation40_spill] sm:$0xff]  ;;  %7577 = vst [vmem:[#allocation73_spill] sm:$0xff] %v5832_v1  ;;  %7580 = vst [vmem:[#allocation101_spill] sm:$0xff] %v5859_v30 }
 0x27c   :  { %7579 = vst [vmem:[#allocation40_spill] sm:$0xff] %v5842_v63 }
 0x27d   :  { %v970_v9 = vadd.f32 %v969_v43, %v5609_v14  ;;  %v1301_v18 = vadd.f32 %v1300_v33, %v1193_v53 }
 0x27f   :  { %v971_v14 = vadd.f32 %v970_v9, %v5607_v41  ;;  %v1302_v53 = vadd.f32 %v1301_v18, %v1196_v3  ;;  %v1368_v41 = vsub.f32 %v7561_v45, %v5618_v19  ;;  %v5869_v45 = vld [vmem:[%s7338_s1 + $0xd4] sm:$0xff] }
 0x280   :  { %7582 = vst [vmem:[#allocation103_spill] sm:$0xff] %v5869_v45 }
 0x281   :  { %v4337_v35 = vpop.eup %4336  ;;  %v5700_v31 = vadd.f32 %v971_v14, %v866_v2  ;;  %v5702_v33 = vadd.f32 %v1302_v53, %v1199_v6  ;;  %v5720_v6 = vld [vmem:[%s7338_s1 + $0x1c] sm:$0xff] }
 0x282   :  { %v1405_v43 = vmul.f32 %v4337_v35, %v1337_v48  ;;  %v1406_v42 = vmul.f32 %v4337_v35, %v1338_v12  ;;  %v1407_v5 = vmul.f32 %v4337_v35, %v1339_v44  ;;  %v1408_v7 = vmul.f32 %v4337_v35, %v1340_v51  ;;  %v5715_v48 = vld [vmem:[%s7338_s1 + $0x24] sm:$0xff]  ;;  %v5725_v12 = vld [vmem:[%s7338_s1 + $0x34] sm:$0xff] }
 0x283   :  { %v1409_v61 = vmul.f32 %v4337_v35, %v1341_v25  ;;  %v1410_v3 = vmul.f32 %v4337_v35, %v1342_v32  ;;  %v1411_v16 = vmul.f32 %v4337_v35, %v1343_v17  ;;  %v1412_v46 = vmul.f32 %v4337_v35, %v1344_v26  ;;  %7562 = vst [vmem:[#allocation24_spill] sm:$0xff] %v5725_v12  ;;  %v5738_v17 = vld [vmem:[%s7338_s1 + $0x2c] sm:$0xff]  ;;  %v5743_v26 = vld [vmem:[%s7338_s1 + $0x44] sm:$0xff] }
 0x284   :  { %v1413_v9 = vmul.f32 %v4337_v35, %v1345_v50  ;;  %v1414_v18 = vmul.f32 %v4337_v35, %v1346_v38  ;;  %v1415_v23 = vmul.f32 %v4337_v35, %v1347_v4  ;;  %v1416_v8 = vmul.f32 %v4337_v35, %v1348_v56  ;;  %7563 = vst [vmem:[#allocation23_spill] sm:$0xff] %v5738_v17  ;;  %v5748_v50 = vld [vmem:[%s7338_s1 + $0x3c] sm:$0xff] }
 0x285   :  { %v5704_v29 = vmul.f32 %v4337_v35, %v1349_v21  ;;  %v5706_v52 = vmul.f32 %v4337_v35, %v1350_v10  ;;  %v5708_v19 = vmul.f32 %v4337_v35, %v1351_v13  ;;  %v5710_v2 = vmul.f32 %v4337_v35, %v1352_v55  ;;  %7564 = vst [vmem:[#allocation29_spill] sm:$0xff] %v5743_v26  ;;  %v5761_v10 = vld [vmem:[%s7338_s1 + $0x94] sm:$0xff]  ;;  %v5766_v13 = vld [vmem:[%s7338_s1 + $0x8c] sm:$0xff] }
 0x286   :  { %v5727_v44 = vmul.f32 %v4337_v35, %v1353_v49  ;;  %v5729_v51 = vmul.f32 %v4337_v35, %v1354_v0  ;;  %v5731_v25 = vmul.f32 %v4337_v35, %v1355_v20  ;;  %v5733_v32 = vmul.f32 %v4337_v35, %v1356_v15  ;;  %7565 = vst [vmem:[#allocation28_spill] sm:$0xff] %v5748_v50  ;;  %v5771_v55 = vld [vmem:[%s7338_s1 + $0x54] sm:$0xff]  ;;  %v5776_v49 = vld [vmem:[%s7338_s1 + $0x4c] sm:$0xff]  ;;  %v5781_v0 = vld [vmem:[%s7338_s1 + $0x64] sm:$0xff] }
 0x287   :  { %v5750_v38 = vmul.f32 %v4337_v35, %v1357_v36  ;;  %v5752_v4 = vmul.f32 %v4337_v35, %v1358_v39  ;;  %v5754_v56 = vmul.f32 %v4337_v35, %v1359_v58  ;;  %v5756_v21 = vmul.f32 %v4337_v35, %v1360_v54  ;;  %7566 = vst [vmem:[#allocation36_spill] sm:$0xff] %v5761_v10  ;;  %v5794_v58 = vld [vmem:[%s7338_s1 + $0xa4] sm:$0xff]  ;;  %v5799_v54 = vld [vmem:[%s7338_s1 + $0x9c] sm:$0xff] }
 0x288   :  { %7567 = vst [vmem:[#allocation32_spill] sm:$0xff] %v5766_v13  ;;  %7568 = vst [vmem:[#allocation45_spill] sm:$0xff] %v5771_v55  ;;  %v5783_v20 = vmul.f32 %v4337_v35, %v1361_v37  ;;  %v5785_v15 = vmul.f32 %v4337_v35, %v1362_v28  ;;  %v5787_v36 = vmul.f32 %v4337_v35, %v1363_v22  ;;  %v5809_v37 = vld [vmem:[%s7338_s1 + $0x5c] sm:$0xff]  ;;  %v5819_v28 = vld [vmem:[%s7338_s1 + $0x6c] sm:$0xff] }
 0x289   :  { %7569 = vst [vmem:[#allocation42_spill] sm:$0xff] %v5776_v49  ;;  %7570 = vst [vmem:[#allocation51_spill] sm:$0xff] %v5781_v0  ;;  %v5789_v39 = vmul.f32 %v4337_v35, %v1364_v60  ;;  %v5821_v14 = vmul.f32 %v4337_v35, %v1365_v11  ;;  %v5823_v53 = vmul.f32 %v4337_v35, %v1366_v40  ;;  %v5837_v60 = vld [vmem:[%s7338_s1 + $0x84] sm:$0xff] }
 0x28a   :  { %7571 = vst [vmem:[#allocation48_spill] sm:$0xff] %v5794_v58  ;;  %7572 = vst [vmem:[#allocation59_spill] sm:$0xff] %v5799_v54  ;;  %v5825_v27 = vmul.f32 %v4337_v35, %v1367_v62  ;;  %v5827_v22 = vmul.f32 %v4337_v35, %v1368_v41  ;;  %v5845_v11 = vmul.f32 %v1405_v43, %v5720_v6  ;;  %v5864_v62 = vld [vmem:[%s7338_s1 + $0xbc] sm:$0xff] }
 0x28b   :  { %7574 = vst [vmem:[#allocation67_spill] sm:$0xff] %v5809_v37  ;;  %7576 = vst [vmem:[#allocation75_spill] sm:$0xff] %v5819_v28  ;;  %v5848_v24 = vmul.f32 %v1406_v42, %v5715_v48  ;;  %v5851_v40 = vmul.f32 %v1407_v5, %v5738_v17  ;;  %v5854_v35 = vmul.f32 %v1408_v7, %v5725_v12  ;;  %v5886_v7 = vld [vmem:[%s7338_s1 + $0xcc] sm:$0xff]  ;;  %v5956_v12 = vld [vmem:[%s7338_s1 + $0x114] sm:$0xff] }
 0x28c   :  { %7578 = vst [vmem:[#allocation83_spill] sm:$0xff] %v5837_v60  ;;  %7581 = vst [vmem:[#allocation102_spill] sm:$0xff] %v5864_v62  ;;  %v5872_v41 = vmul.f32 %v1409_v61, %v5748_v50  ;;  %v5875_v43 = vmul.f32 %v1410_v3, %v5743_v26  ;;  %v5878_v42 = vmul.f32 %v1411_v16, %v5776_v49  ;;  %v5896_v61 = vld [vmem:[%s7338_s1 + $0xdc] sm:$0xff]  ;;  %v5913_v49 = vld [vmem:[%s7338_s1 + $0x124] sm:$0xff] }
 0x28d   :  { %v5881_v5 = vmul.f32 %v1412_v46, %v5771_v55  ;;  %7583 = vst [vmem:[#allocation104_spill] sm:$0xff] %v5886_v7  ;;  %7585 = vst [vmem:[#allocation106_spill] sm:$0xff] %v5896_v61  ;;  %v5899_v3 = vmul.f32 %v1413_v9, %v5809_v37  ;;  %v5902_v16 = vmul.f32 %v1414_v18, %v5781_v0  ;;  %v5918_v26 = vld [vmem:[%s7338_s1 + $0x11c] sm:$0xff]  ;;  %v5923_v9 = vld [vmem:[%s7338_s1 + $0x134] sm:$0xff] }
 0x28e   :  { %v5905_v46 = vmul.f32 %v1415_v23, %v5819_v28  ;;  %v5908_v55 = vmul.f32 %v1416_v8, %v5814_v34  ;;  %7586 = vst [vmem:[#allocation107_spill] sm:$0xff] %v5913_v49  ;;  %7587 = vst [vmem:[#allocation108_spill] sm:$0xff] %v5923_v9  ;;  %v5928_v18 = vld [vmem:[%s7338_s1 + $0xf4] sm:$0xff]  ;;  %v5933_v23 = vld [vmem:[%s7338_s1 + $0xec] sm:$0xff]  ;;  %v1481_v34 = vmul.f32 %v5704_v29, %v5842_v63 }
 0x28f   :  { %7588 = vst [vmem:[#allocation109_spill] sm:$0xff] %v5928_v18  ;;  %7589 = vst [vmem:[#allocation110_spill] sm:$0xff] %v5933_v23  ;;  %v5938_v8 = vld [vmem:[%s7338_s1 + $0x104] sm:$0xff]  ;;  %v1482_v28 = vmul.f32 %v5706_v52, %v5837_v60  ;;  %v1483_v0 = vmul.f32 %v5708_v19, %v5766_v13  ;;  %v1484_v37 = vmul.f32 %v5710_v2, %v5761_v10  ;;  %v5951_v50 = vld [vmem:[%s7338_s1 + $0xfc] sm:$0xff] }
 0x290   :  { %7590 = vst [vmem:[#allocation111_spill] sm:$0xff] %v5938_v8  ;;  %7591 = vst [vmem:[#allocation112_spill] sm:$0xff] %v5956_v12  ;;  %v5961_v29 = vld [vmem:[%s7338_s1 + $0x10c] sm:$0xff]  ;;  %v1485_v52 = vmul.f32 %v5727_v44, %v5799_v54  ;;  %v1486_v19 = vmul.f32 %v5729_v51, %v5794_v58  ;;  %v1487_v2 = vmul.f32 %v5731_v25, %v5832_v1  ;;  %v5979_v60 = vld [vmem:[%s7338_s1 + $0x144] sm:$0xff] }
 0x291   :  { %7592 = vst [vmem:[#allocation113_spill] sm:$0xff] %v5961_v29  ;;  %v1488_v10 = vmul.f32 %v5733_v32, %v5804_v57  ;;  %v5974_v13 = vld [vmem:[%s7338_s1 + $0x12c] sm:$0xff]  ;;  %7594 = vst [vmem:[#allocation115_spill] sm:$0xff] %v5979_v60  ;;  %v5984_v44 = vld [vmem:[%s7338_s1 + $0x13c] sm:$0xff]  ;;  %v1489_v51 = vmul.f32 %v5750_v38, %v5864_v62  ;;  %v1490_v25 = vmul.f32 %v5752_v4, %v5859_v30 }
 0x292   :  { %7593 = vst [vmem:[#allocation114_spill] sm:$0xff] %v5974_v13  ;;  %v1491_v32 = vmul.f32 %v5754_v56, %v5886_v7  ;;  %v1492_v57 = vmul.f32 %v5756_v21, %v5869_v45  ;;  %v5997_v1 = vld [vmem:[%s7338_s1 + $0x194] sm:$0xff]  ;;  %v6002_v58 = vld [vmem:[%s7338_s1 + $0x18c] sm:$0xff]  ;;  %v6017_v56 = vld [vmem:[%s7338_s1 + $0x164] sm:$0xff]  ;;  %v1493_v21 = vmul.f32 %v5783_v20, %v5896_v61  ;;  %v1494_v45 = vmul.f32 %v5785_v15, %v5891_v47 }
 0x293   :  { %7595 = vst [vmem:[#allocation116_spill] sm:$0xff] %v5997_v1  ;;  %7596 = vst [vmem:[#allocation117_spill] sm:$0xff] %v6002_v58  ;;  %v6007_v38 = vld [vmem:[%s7338_s1 + $0x154] sm:$0xff]  ;;  %v6012_v4 = vld [vmem:[%s7338_s1 + $0x14c] sm:$0xff]  ;;  %v1495_v7 = vmul.f32 %v5787_v36, %v5933_v23  ;;  %v1496_v30 = vmul.f32 %v5789_v39, %v5928_v18  ;;  %v1497_v18 = vmul.f32 %v5821_v14, %v5951_v50 }
 0x294   :  { %7597 = vst [vmem:[#allocation118_spill] sm:$0xff] %v6007_v38  ;;  %7598 = vst [vmem:[#allocation119_spill] sm:$0xff] %v6012_v4  ;;  %v6030_v62 = vld [vmem:[%s7338_s1 + $0x1a4] sm:$0xff]  ;;  %v6035_v54 = vld [vmem:[%s7338_s1 + $0x19c] sm:$0xff]  ;;  %v1498_v23 = vmul.f32 %v5823_v53, %v5938_v8  ;;  %v1499_v47 = vmul.f32 %v5825_v27, %v5961_v29  ;;  %v1500_v61 = vmul.f32 %v5827_v22, %v5956_v12 }
 0x295   :  { %7599 = vst [vmem:[#allocation120_spill] sm:$0xff] %v6017_v56  ;;  %v6040_v20 = vld [vmem:[%s7338_s1 + $0x1b4] sm:$0xff]  ;;  %v6045_v15 = vld [vmem:[%s7338_s1 + $0x15c] sm:$0xff]  ;;  %v6055_v39 = vld [vmem:[%s7338_s1 + $0x16c] sm:$0xff]  ;;  %v1533_v53 = vadd.f32 %v5845_v11, %v5918_v26  ;;  %v1534_v27 = vadd.f32 %v5848_v24, %v5913_v49  ;;  %v1535_v22 = vadd.f32 %v5851_v40, %v5974_v13  ;;  %v1536_v12 = vadd.f32 %v5854_v35, %v5923_v9 }
 0x296   :  { %7600 = vst [vmem:[#allocation121_spill] sm:$0xff] %v6045_v15  ;;  %v6050_v36 = vld [vmem:[%s7338_s1 + $0x174] sm:$0xff]  ;;  %7602 = vst [vmem:[#allocation123_spill] sm:$0xff] %v6055_v39  ;;  %v6068_v63 = vld [vmem:[%s7338_s1 + $0x1ac] sm:$0xff]  ;;  %v1537_v24 = vadd.f32 %v5872_v41, %v5984_v44  ;;  %v1538_v40 = vadd.f32 %v5875_v43, %v5979_v60  ;;  %v1539_v35 = vadd.f32 %v5878_v42, %v6012_v4 }
 0x297   :  { %7601 = vst [vmem:[#allocation122_spill] sm:$0xff] %v6050_v36  ;;  %v6073_v17 = vld [vmem:[%s7338_s1 + $0x184] sm:$0xff]  ;;  %v6078_v14 = vld [vmem:[%s7338_s1 + $0x17c] sm:$0xff]  ;;  %v6101_v11 = vld [vmem:[%s7338_s1 + $0x1d4] sm:$0xff]  ;;  %v1540_v9 = vadd.f32 %v5881_v5, %v6007_v38  ;;  %v1541_v43 = vadd.f32 %v5899_v3, %v6045_v15  ;;  %v1542_v42 = vadd.f32 %v5902_v16, %v6017_v56  ;;  %v1543_v5 = vadd.f32 %v5905_v46, %v6055_v39 }
 0x298   :  { %7603 = vst [vmem:[#allocation124_spill] sm:$0xff] %v6073_v17  ;;  %7604 = vst [vmem:[#allocation125_spill] sm:$0xff] %v6078_v14  ;;  %v6091_v29 = vld [vmem:[%s7338_s1 + $0x1c4] sm:$0xff]  ;;  %v6096_v8 = vld [vmem:[%s7338_s1 + $0x1bc] sm:$0xff]  ;;  %v1544_v38 = vadd.f32 %v5908_v55, %v6050_v36  ;;  %v1545_v16 = vadd.f32 %v1481_v34, %v6078_v14  ;;  %v1546_v46 = vadd.f32 %v1482_v28, %v6073_v17 }
 0x299   :  { %7605 = vst [vmem:[#allocation126_spill] sm:$0xff] %v6091_v29  ;;  %7606 = vst [vmem:[#allocation127_spill] sm:$0xff] %v6101_v11  ;;  %v6114_v13 = vld [vmem:[%s7338_s1 + $0x1cc] sm:$0xff]  ;;  %v6119_v49 = vld [vmem:[%s7338_s1 + $0x1e4] sm:$0xff]  ;;  %v1547_v55 = vadd.f32 %v1483_v0, %v6002_v58  ;;  %v1548_v36 = vadd.f32 %v1484_v37, %v5997_v1  ;;  %v1549_v28 = vadd.f32 %v1485_v52, %v6035_v54 }
 0x29a   :  { %7607 = vst [vmem:[#allocation128_spill] sm:$0xff] %v6114_v13  ;;  %7608 = vst [vmem:[#allocation129_spill] sm:$0xff] %v6119_v49  ;;  %v6124_v41 = vld [vmem:[%s7338_s1 + $0x1dc] sm:$0xff]  ;;  %v6137_v4 = vld [vmem:[%s7338_s1 + $0x1f4] sm:$0xff]  ;;  %v1550_v0 = vadd.f32 %v1486_v19, %v6030_v62  ;;  %v1551_v37 = vadd.f32 %v1487_v2, %v6068_v63  ;;  %v1552_v1 = vadd.f32 %v1488_v10, %v6040_v20 }
 0x29b   :  { %7609 = vst [vmem:[#allocation130_spill] sm:$0xff] %v6124_v41  ;;  %7610 = vst [vmem:[#allocation131_spill] sm:$0xff] %v6137_v4  ;;  %v6142_v60 = vld [vmem:[%s7338_s1 + $0x1ec] sm:$0xff]  ;;  %v6147_v3 = vld [vmem:[%s7338_s1 + $0x204] sm:$0xff]  ;;  %v6173_v58 = vadd.f32 %v1489_v51, %v6096_v8  ;;  %v6176_v17 = vadd.f32 %v1490_v25, %v6091_v29  ;;  %v6179_v14 = vadd.f32 %v1491_v32, %v6114_v13  ;;  %v1608_v13 = vmax.f32 %v1544_v38, 0.0 }
 0x29c   :  { %7611 = vst [vmem:[#allocation132_spill] sm:$0xff] %v6142_v60  ;;  %7612 = vst [vmem:[#allocation133_spill] sm:$0xff] %v6147_v3  ;;  %v6156_v39 = vld [vmem:[%s7338_s1 + $0x1fc] sm:$0xff]  ;;  %v6161_v56 = vld [vmem:[%s7338_s1 + $0x214] sm:$0xff]  ;;  %v6182_v15 = vadd.f32 %v1492_v57, %v6101_v11  ;;  %v6185_v52 = vadd.f32 %v1493_v21, %v6124_v41  ;;  %v6188_v19 = vadd.f32 %v1494_v45, %v6119_v49  ;;  %v1597_v45 = vmax.f32 %v1533_v53, 0.0 }
 0x29d   :  { %7613 = vst [vmem:[#allocation134_spill] sm:$0xff] %v6156_v39  ;;  %7614 = vst [vmem:[#allocation135_spill] sm:$0xff] %v6161_v56  ;;  %v6166_v34 = vld [vmem:[%s7338_s1 + $0x20c] sm:$0xff]  ;;  %v6191_v10 = vadd.f32 %v1495_v7, %v6142_v60  ;;  %v6194_v2 = vadd.f32 %v1496_v30, %v6137_v4  ;;  %v6197_v51 = vadd.f32 %v1497_v18, %v6156_v39  ;;  %v1598_v21 = vmax.f32 %v1534_v27, 0.0 }
 0x29e   :  { %7615 = vst [vmem:[#allocation136_spill] sm:$0xff] %v6166_v34  ;;  %v6200_v25 = vadd.f32 %v1498_v23, %v6147_v3  ;;  %v6203_v57 = vadd.f32 %v1499_v47, %v6166_v34  ;;  %v6206_v32 = vadd.f32 %v1500_v61, %v6161_v56  ;;  %v1599_v49 = vmax.f32 %v1535_v22, 0.0  ;;  %1661 = vst.msk [vmem:[#allocation2] sm:$0xff] %vm731_vm2, %v1597_v45 }
 0x29f   :  { %v1600_v7 = vmax.f32 %v1536_v12, 0.0  ;;  %v1601_v60 = vmax.f32 %v1537_v24, 0.0  ;;  %v1602_v41 = vmax.f32 %v1538_v40, 0.0  ;;  %v1603_v30 = vmax.f32 %v1539_v35, 0.0  ;;  %1662 = vst.msk [vmem:[#allocation2 + $0x8] sm:$0xff] %vm731_vm2, %v1598_v21  ;;  %1672 = vst.msk [vmem:[#allocation2 + $0x58] sm:$0xff] %vm731_vm2, %v1608_v13 }
 0x2a0   :  { %v1604_v4 = vmax.f32 %v1540_v9, 0.0  ;;  %v1605_v11 = vmax.f32 %v1541_v43, 0.0  ;;  %v1606_v18 = vmax.f32 %v1542_v42, 0.0  ;;  %v1607_v39 = vmax.f32 %v1543_v5, 0.0  ;;  %1663 = vst.msk [vmem:[#allocation2 + $0x10] sm:$0xff] %vm731_vm2, %v1599_v49  ;;  %v7616_v24 = vld [vmem:[#allocation46_spill] sm:$0xff] }
 0x2a1   :  { %1664 = vst.msk [vmem:[#allocation2 + $0x18] sm:$0xff] %vm731_vm2, %v1600_v7  ;;  %v1609_v47 = vmax.f32 %v1545_v16, 0.0  ;;  %v1610_v61 = vmax.f32 %v1546_v46, 0.0  ;;  %v1611_v23 = vmax.f32 %v1547_v55, 0.0  ;;  %v1612_v12 = vmax.f32 %v1548_v36, 0.0  ;;  %1665 = vst.msk [vmem:[#allocation2 + $0x20] sm:$0xff] %vm731_vm2, %v1601_v60 }
 0x2a2   :  { %1666 = vst.msk [vmem:[#allocation2 + $0x28] sm:$0xff] %vm731_vm2, %v1602_v41  ;;  %1667 = vst.msk [vmem:[#allocation2 + $0x30] sm:$0xff] %vm731_vm2, %v1603_v30  ;;  %v1613_v9 = vmax.f32 %v1549_v28, 0.0  ;;  %v1614_v38 = vmax.f32 %v1550_v0, 0.0  ;;  %v1615_v53 = vmax.f32 %v1551_v37, 0.0  ;;  %v1616_v27 = vmax.f32 %v1552_v1, 0.0 }
 0x2a3   :  { %1668 = vst.msk [vmem:[#allocation2 + $0x38] sm:$0xff] %vm731_vm2, %v1604_v4  ;;  %1669 = vst.msk [vmem:[#allocation2 + $0x40] sm:$0xff] %vm731_vm2, %v1605_v11  ;;  %v1617_v49 = vmax.f32 %v6173_v58, 0.0  ;;  %v1618_v60 = vmax.f32 %v6176_v17, 0.0  ;;  %v1619_v36 = vmax.f32 %v6179_v14, 0.0  ;;  %v1620_v4 = vmax.f32 %v6182_v15, 0.0 }
 0x2a4   :  { %1670 = vst.msk [vmem:[#allocation2 + $0x48] sm:$0xff] %vm731_vm2, %v1606_v18  ;;  %1671 = vst.msk [vmem:[#allocation2 + $0x50] sm:$0xff] %vm731_vm2, %v1607_v39  ;;  %v1621_v1 = vmax.f32 %v6185_v52, 0.0  ;;  %v1622_v13 = vmax.f32 %v6188_v19, 0.0  ;;  %v1623_v58 = vmax.f32 %v6191_v10, 0.0  ;;  %v1624_v17 = vmax.f32 %v6194_v2, 0.0 }
 0x2a5   :  { %1673 = vst.msk [vmem:[#allocation2 + $0x60] sm:$0xff] %vm731_vm2, %v1609_v47  ;;  %1674 = vst.msk [vmem:[#allocation2 + $0x68] sm:$0xff] %vm731_vm2, %v1610_v61  ;;  %v1625_v15 = vmax.f32 %v6197_v51, 0.0  ;;  %v1626_v39 = vmax.f32 %v6200_v25, 0.0  ;;  %v1627_v14 = vmax.f32 %v6203_v57, 0.0  ;;  %v1628_v22 = vmax.f32 %v6206_v32, 0.0 }
 0x2a6   :  { %1675 = vst.msk [vmem:[#allocation2 + $0x70] sm:$0xff] %vm731_vm2, %v1611_v23  ;;  %1676 = vst.msk [vmem:[#allocation2 + $0x78] sm:$0xff] %vm731_vm2, %v1612_v12  ;;  %v973_v11 = vadd.f32 %v5700_v31, %v5615_v59  ;;  %v1304_v40 = vadd.f32 %v5702_v33, %v7616_v24  ;;  %v1725_v35 = vld [vmem:[#allocation2] ss:$2 sm:$0xff]  ;;  %v1757_v41 = vld [vmem:[#allocation2 + $0x1] ss:$2 sm:$0xff] }
 0x2a7   :  { %1677 = vst.msk [vmem:[#allocation2 + $0x80] sm:$0xff] %vm731_vm2, %v1613_v9  ;;  %1678 = vst.msk [vmem:[#allocation2 + $0x88] sm:$0xff] %vm731_vm2, %v1614_v38  ;;  %v7617_v42 = vld [vmem:[#allocation41_spill] sm:$0xff]  ;;  %v7618_v16 = vld [vmem:[#allocation43_spill] sm:$0xff]  ;;  %v1852_v59 = vmax.f32 %v1725_v35, %v1757_v41 }
 0x2a8   :  { %1679 = vst.msk [vmem:[#allocation2 + $0x90] sm:$0xff] %vm731_vm2, %v1615_v53  ;;  %1680 = vst.msk [vmem:[#allocation2 + $0x98] sm:$0xff] %vm731_vm2, %v1616_v27  ;;  %v1789_v43 = vld [vmem:[#allocation2 + $0x10] ss:$2 sm:$0xff]  ;;  %v974_v5 = vadd.f32 %v973_v11, %v7617_v42  ;;  %v1305_v46 = vadd.f32 %v1304_v40, %v7618_v16  ;;  %v1821_v55 = vld [vmem:[#allocation2 + $0x11] ss:$2 sm:$0xff] }
 0x2a9   :  { %1681 = vst.msk [vmem:[#allocation2 + $0xa0] sm:$0xff] %vm731_vm2, %v1617_v49  ;;  %1682 = vst.msk [vmem:[#allocation2 + $0xa8] sm:$0xff] %vm731_vm2, %v1618_v60  ;;  %v1727_v31 = vld [vmem:[#allocation2 + $0x20] ss:$2 sm:$0xff]  ;;  %v1759_v28 = vld [vmem:[#allocation2 + $0x21] ss:$2 sm:$0xff]  ;;  %v1868_v33 = vmax.f32 %v1789_v43, %v1821_v55 }
 0x2aa   :  { %1683 = vst.msk [vmem:[#allocation2 + $0xb0] sm:$0xff] %vm731_vm2, %v1619_v36  ;;  %1684 = vst.msk [vmem:[#allocation2 + $0xb8] sm:$0xff] %vm731_vm2, %v1620_v4  ;;  %v1791_v0 = vld [vmem:[#allocation2 + $0x30] ss:$2 sm:$0xff]  ;;  %v1823_v37 = vld [vmem:[#allocation2 + $0x31] ss:$2 sm:$0xff]  ;;  %v1853_v52 = vmax.f32 %v1727_v31, %v1759_v28 }
 0x2ab   :  { %1685 = vst.msk [vmem:[#allocation2 + $0xc0] sm:$0xff] %vm731_vm2, %v1621_v1  ;;  %1686 = vst.msk [vmem:[#allocation2 + $0xc8] sm:$0xff] %vm731_vm2, %v1622_v13  ;;  %v1729_v19 = vld [vmem:[#allocation2 + $0x40] ss:$2 sm:$0xff]  ;;  %v1869_v57 = vmax.f32 %v1791_v0, %v1823_v37  ;;  %v1761_v32 = vld [vmem:[#allocation2 + $0x41] ss:$2 sm:$0xff]  ;;  %v1884_v7 = vmax.f32 %v1852_v59, %v1868_v33 }
 0x2ac   :  { %1687 = vst.msk [vmem:[#allocation2 + $0xd0] sm:$0xff] %vm731_vm2, %v1623_v58  ;;  %1688 = vst.msk [vmem:[#allocation2 + $0xd8] sm:$0xff] %vm731_vm2, %v1624_v17  ;;  %v7619_v10 = vld [vmem:[#allocation39_spill] sm:$0xff]  ;;  %v7620_v51 = vld [vmem:[#allocation58_spill] sm:$0xff]  ;;  %v1854_v30 = vmax.f32 %v1729_v19, %v1761_v32 }
 0x2ad   :  { %1689 = vst.msk [vmem:[#allocation2 + $0xe0] sm:$0xff] %vm731_vm2, %v1625_v15  ;;  %1690 = vst.msk [vmem:[#allocation2 + $0xe8] sm:$0xff] %vm731_vm2, %v1626_v39  ;;  %v975_v2 = vadd.f32 %v974_v5, %v7619_v10  ;;  %v1306_v25 = vadd.f32 %v1305_v46, %v7620_v51  ;;  %v1793_v45 = vld [vmem:[#allocation2 + $0x50] ss:$2 sm:$0xff]  ;;  %v1825_v21 = vld [vmem:[#allocation2 + $0x51] ss:$2 sm:$0xff]  ;;  %v1885_v27 = vmax.f32 %v1853_v52, %v1869_v57 }
 0x2ae   :  { %1691 = vst.msk [vmem:[#allocation2 + $0xf0] sm:$0xff] %vm731_vm2, %v1627_v14  ;;  %1692 = vst.msk [vmem:[#allocation2 + $0xf8] sm:$0xff] %vm731_vm2, %v1628_v22  ;;  %v1870_v18 = vmax.f32 %v1793_v45, %v1825_v21  ;;  %v1731_v47 = vld [vmem:[#allocation2 + $0x60] ss:$2 sm:$0xff]  ;;  %v1763_v61 = vld [vmem:[#allocation2 + $0x61] ss:$2 sm:$0xff] }
 0x2af   :  { %v1795_v23 = vld [vmem:[#allocation2 + $0x70] ss:$2 sm:$0xff]  ;;  %v1827_v49 = vld [vmem:[#allocation2 + $0x71] ss:$2 sm:$0xff]  ;;  %v1855_v60 = vmax.f32 %v1731_v47, %v1763_v61  ;;  %v1733_v36 = vld [vmem:[#allocation2 + $0x80] ss:$2 sm:$0xff] }
 0x2b0   :  { %v7621_v12 = vld [vmem:[#allocation53_spill] sm:$0xff]  ;;  %v7622_v38 = vld [vmem:[#allocation56_spill] sm:$0xff]  ;;  %1944 = vst.msk [vmem:[#allocation3 + $0x11] sm:$0xff] %vm731_vm2, %v1884_v7  ;;  %v1886_v1 = vmax.f32 %v1854_v30, %v1870_v18  ;;  %v1871_v13 = vmax.f32 %v1795_v23, %v1827_v49  ;;  %v7623_v14 = vld [vmem:[#allocation50_spill] sm:$0xff] }
 0x2b1   :  { %v976_v9 = vadd.f32 %v975_v2, %v7621_v12  ;;  %v1307_v53 = vadd.f32 %v1306_v25, %v7622_v38  ;;  %v1765_v4 = vld [vmem:[#allocation2 + $0x81] ss:$2 sm:$0xff]  ;;  %v1797_v58 = vld [vmem:[#allocation2 + $0x90] ss:$2 sm:$0xff]  ;;  %v1829_v17 = vld [vmem:[#allocation2 + $0x91] ss:$2 sm:$0xff] }
 0x2b2   :  { %v1856_v15 = vmax.f32 %v1733_v36, %v1765_v4  ;;  %v1735_v39 = vld [vmem:[#allocation2 + $0xa0] ss:$2 sm:$0xff]  ;;  %1945 = vst.msk [vmem:[#allocation3 + $0x21] sm:$0xff] %vm731_vm2, %v1885_v27  ;;  %v1872_v40 = vmax.f32 %v1797_v58, %v1829_v17  ;;  %v1767_v35 = vld [vmem:[#allocation2 + $0xa1] ss:$2 sm:$0xff]  ;;  %1946 = vst.msk [vmem:[#allocation3 + $0x31] sm:$0xff] %vm731_vm2, %v1886_v1  ;;  %v1887_v42 = vmax.f32 %v1855_v60, %v1871_v13 }
 0x2b3   :  { %v977_v22 = vadd.f32 %v976_v9, %v7623_v14  ;;  %v7624_v11 = vld [vmem:[#allocation70_spill] sm:$0xff]  ;;  %v1799_v41 = vld [vmem:[#allocation2 + $0xb0] ss:$2 sm:$0xff]  ;;  %v1831_v43 = vld [vmem:[#allocation2 + $0xb1] ss:$2 sm:$0xff]  ;;  %v1857_v5 = vmax.f32 %v1735_v39, %v1767_v35 }
 0x2b4   :  { %v1308_v24 = vadd.f32 %v1307_v53, %v7624_v11  ;;  %v1873_v16 = vmax.f32 %v1799_v41, %v1831_v43  ;;  %v1737_v46 = vld [vmem:[#allocation2 + $0xc0] ss:$2 sm:$0xff]  ;;  %v1769_v55 = vld [vmem:[#allocation2 + $0xc1] ss:$2 sm:$0xff]  ;;  %v1801_v59 = vld [vmem:[#allocation2 + $0xd0] ss:$2 sm:$0xff]  ;;  %v1888_v37 = vmax.f32 %v1856_v15, %v1872_v40 }
 0x2b5   :  { %v7625_v31 = vld [vmem:[#allocation65_spill] sm:$0xff]  ;;  %v7626_v33 = vld [vmem:[#allocation68_spill] sm:$0xff]  ;;  %v1858_v19 = vmax.f32 %v1737_v46, %v1769_v55  ;;  %1947 = vst.msk [vmem:[#allocation3 + $0x41] sm:$0xff] %vm731_vm2, %v1887_v42  ;;  %v7631_v36 = vld [vmem:[#allocation74_spill] sm:$0xff] }
 0x2b6   :  { %v978_v28 = vadd.f32 %v977_v22, %v7625_v31  ;;  %v1309_v0 = vadd.f32 %v1308_v24, %v7626_v33  ;;  %v1833_v52 = vld [vmem:[#allocation2 + $0xd1] ss:$2 sm:$0xff]  ;;  %v1739_v10 = vld [vmem:[#allocation2 + $0xe0] ss:$2 sm:$0xff]  ;;  %v1771_v2 = vld [vmem:[#allocation2 + $0xe1] ss:$2 sm:$0xff]  ;;  %v1889_v51 = vmax.f32 %v1857_v5, %v1873_v16 }
 0x2b7   :  { %v1874_v25 = vmax.f32 %v1801_v59, %v1833_v52  ;;  %v1803_v57 = vld [vmem:[#allocation2 + $0xf0] ss:$2 sm:$0xff]  ;;  %v1835_v32 = vld [vmem:[#allocation2 + $0xf1] ss:$2 sm:$0xff]  ;;  %v1859_v45 = vmax.f32 %v1739_v10, %v1771_v2  ;;  %1948 = vst.msk [vmem:[#allocation3 + $0x51] sm:$0xff] %vm731_vm2, %v1888_v37  ;;  %v7632_v1 = vld [vmem:[#allocation90_spill] sm:$0xff] }
 0x2b8   :  { %v7627_v21 = vld [vmem:[#allocation61_spill] sm:$0xff]  ;;  %v1875_v47 = vmax.f32 %v1803_v57, %v1835_v32  ;;  %1949 = vst.msk [vmem:[#allocation3 + $0x61] sm:$0xff] %vm731_vm2, %v1889_v51  ;;  %v7630_v9 = vld [vmem:[#allocation80_spill] sm:$0xff]  ;;  %v7636_v41 = vld [vmem:[#allocation71_spill] sm:$0xff] }
 0x2b9   :  { %v979_v7 = vadd.f32 %v978_v28, %v7627_v21  ;;  %v7628_v30 = vld [vmem:[#allocation81_spill] sm:$0xff]  ;;  %v1890_v61 = vmax.f32 %v1858_v19, %v1874_v25  ;;  %v2186_v53 = vld [vmem:[#allocation3 + $0x10] sm:$0xff]  ;;  %v7638_v5 = vld [vmem:[#allocation62_spill] sm:$0xff] }
 0x2ba   :  { %v1310_v18 = vadd.f32 %v1309_v0, %v7628_v30  ;;  %v7629_v23 = vld [vmem:[#allocation77_spill] sm:$0xff]  ;;  %v1993_v27 = vld [vmem:[#allocation3 + $0x11] sm:$0xff]  ;;  %v1891_v49 = vmax.f32 %v1859_v45, %v1875_v47  ;;  %2218 = vrot.lane.b32.xlu0 %v2186_v53, %s4375_s9  ;;  %1977 = vst.msk [vmem:[#allocation4 + $0x8] sm:$0xff] %vm731_vm2, %v2186_v53  ;;  %v7639_v46 = vld [vmem:[#allocation66_spill] sm:$0xff] }
 0x2bb   :  { %v980_v12 = vadd.f32 %v979_v7, %v7629_v23  ;;  %2026 = vrot.lane.b32.xlu1 %v1993_v27, %s4371_s26  ;;  %v2187_v60 = vld [vmem:[#allocation3 + $0x20] sm:$0xff]  ;;  %1950 = vst.msk [vmem:[#allocation3 + $0x71] sm:$0xff] %vm731_vm2, %v1890_v61  ;;  %v2479_v58 = vld [vmem:[#allocation3 + $0x30] sm:$0xff] }
 0x2bc   :  { %v1311_v38 = vadd.f32 %v1310_v18, %v7630_v9  ;;  %1951 = vst.msk [vmem:[#allocation3 + $0x81] sm:$0xff] %vm731_vm2, %v1891_v49  ;;  %1978 = vst.msk [vmem:[#allocation4 + $0x10] sm:$0xff] %vm731_vm2, %v2187_v60  ;;  %v7633_v17 = vld [vmem:[#allocation88_spill] sm:$0xff]  ;;  %v7634_v39 = vld [vmem:[#allocation57_spill] sm:$0xff] }
 0x2bd   :  { %v981_v4 = vadd.f32 %v980_v12, %v7631_v36  ;;  %1979 = vst.msk [vmem:[#allocation4 + $0x18] sm:$0xff] %vm731_vm2, %v2479_v58  ;;  %v2090_v22 = vld [vmem:[#allocation3 + $0x12] sm:$0xff]  ;;  %v6287_v11 = vld [vmem:[#allocation3 + $0x40] sm:$0xff] }
 0x2be   :  { %v1312_v13 = vadd.f32 %v1311_v38, %v7632_v1  ;;  %2315 = vrot.lane.b32.xlu0 %v1993_v27, %s4376_s10  ;;  %v6291_v24 = vld [vmem:[#allocation3 + $0x50] sm:$0xff]  ;;  %1980 = vst.msk [vmem:[#allocation4 + $0x20] sm:$0xff] %vm731_vm2, %v6287_v11  ;;  %v7635_v40 = vld [vmem:[#allocation85_spill] sm:$0xff]  ;;  %v7642_v0 = vld [vmem:[#allocation82_spill] sm:$0xff] }
 0x2bf   :  { %v982_v15 = vadd.f32 %v981_v4, %v7633_v17  ;;  %2123 = vrot.lane.b32.xlu1 %v2090_v22, %s4370_s17  ;;  %v6297_v42 = vld [vmem:[#allocation3 + $0x60] sm:$0xff]  ;;  %1981 = vst.msk [vmem:[#allocation4 + $0x28] sm:$0xff] %vm731_vm2, %v6291_v24  ;;  %v7641_v28 = vld [vmem:[#allocation92_spill] sm:$0xff]  ;;  %v7646_v32 = vld [vmem:[#allocation91_spill] sm:$0xff] }
 0x2c0   :  { %v1313_v14 = vadd.f32 %v1312_v13, %v7634_v39  ;;  %7637 = vst [vmem:[#allocation46_spill] sm:$0xff] %v6297_v42  ;;  %1982 = vst.msk [vmem:[#allocation4 + $0x30] sm:$0xff] %vm731_vm2, %v6297_v42  ;;  %v2284_v59 = vld [vmem:[#allocation3 + $0x21] sm:$0xff]  ;;  %v1995_v51 = vld [vmem:[#allocation3 + $0x31] sm:$0xff] }
 0x2c1   :  { %v983_v35 = vadd.f32 %v982_v15, %v7635_v40  ;;  %v7643_v52 = vld [vmem:[#allocation94_spill] sm:$0xff]  ;;  %v7645_v25 = vld [vmem:[#allocation93_spill] sm:$0xff]  ;;  %v7649_v61 = vld [vmem:[#allocation95_spill] sm:$0xff] }
 0x2c2   :  { %v1314_v43 = vadd.f32 %v1313_v14, %v7636_v41  ;;  %v6305_v31 = vld [vmem:[#allocation3 + $0x70] sm:$0xff]  ;;  %2317 = vrot.lane.b32.xlu0 %v2284_v59, %s4376_s10  ;;  %v7644_v10 = vld [vmem:[#allocation78_spill] sm:$0xff]  ;;  %v7647_v21 = vld [vmem:[#allocation97_spill] sm:$0xff] }
 0x2c3   :  { %v984_v16 = vadd.f32 %v983_v35, %v7638_v5  ;;  %7640 = vst [vmem:[#allocation41_spill] sm:$0xff] %v6305_v31  ;;  %2220 = vrot.lane.b32.xlu1 %v2187_v60, %s4375_s9  ;;  %1983 = vst.msk [vmem:[#allocation4 + $0x38] sm:$0xff] %vm731_vm2, %v6305_v31  ;;  %v7648_v30 = vld [vmem:[#allocation89_spill] sm:$0xff]  ;;  %v7650_v12 = vld [vmem:[#allocation96_spill] sm:$0xff] }
 0x2c4   :  { %v1315_v55 = vadd.f32 %v1314_v43, %v7639_v46  ;;  %v2381_v47 = vld [vmem:[#allocation3 + $0x22] sm:$0xff]  ;;  %v7651_v38 = vld [vmem:[#allocation99_spill] sm:$0xff]  ;;  %v7652_v27 = vld [vmem:[#allocation100_spill] sm:$0xff] }
 0x2c5   :  { %v985_v33 = vadd.f32 %v984_v16, %v7641_v28  ;;  %v2092_v36 = vld [vmem:[#allocation3 + $0x32] sm:$0xff]  ;;  %v7653_v4 = vld [vmem:[#allocation98_spill] sm:$0xff]  ;;  %v2785_v14 = vld [vmem:[%s7338_s1 + $0x21c] sm:$0xff] }
 0x2c6   :  { %v1316_v37 = vadd.f32 %v1315_v55, %v7642_v0  ;;  %2030 = vrot.lane.b32.xlu0 %v1995_v51, %s4371_s26  ;;  %v2788_v5 = vld [vmem:[%s7338_s1 + $0x234] sm:$0xff]  ;;  %v2790_v28 = vld [vmem:[%s7338_s1 + $0x244] sm:$0xff] }
 0x2c7   :  { %v986_v19 = vadd.f32 %v985_v33, %v7643_v52  ;;  %2028 = vrot.lane.b32.xlu1 %v2284_v59, %s4371_s26  ;;  %v6355_v0 = vld [vmem:[#allocation3 + $0x41] sm:$0xff] }
 0x2c8   :  { %v1317_v2 = vadd.f32 %v1316_v37, %v7644_v10  ;;  %v2791_v10 = vld [vmem:[%s7338_s1 + $0x24c] sm:$0xff] }
 0x2c9   :  { %v987_v57 = vadd.f32 %v986_v19, %v7645_v25 }
 0x2ca   :  { %v1318_v45 = vadd.f32 %v1317_v2, %v7646_v32  ;;  %2414 = vrot.lane.b32.xlu0 %v2381_v47, %s4377_s11  ;;  %v2792_v2 = vld [vmem:[%s7338_s1 + $0x254] sm:$0xff] }
 0x2cb   :  { %v988_v7 = vadd.f32 %v987_v57, %v7647_v21  ;;  %2412 = vrot.lane.b32.xlu1 %v2090_v22, %s4377_s11  ;;  %v2786_v22 = vld [vmem:[%s7338_s1 + $0x224] sm:$0xff]  ;;  %v4291_v32 = vpack.c.bf16 %v2792_v2, %v2791_v10  ;;  %v7671_v2 = vld [vmem:[#allocation12_spill] sm:$0xff] }
 0x2cc   :  { %v1319_v18 = vadd.f32 %v1318_v45, %v7648_v30  ;;  %v4279_v40 = vpack.c.bf16 %v2786_v22, %v2785_v14  ;;  %v2793_v45 = vld [vmem:[%s7338_s1 + $0x25c] sm:$0xff]  ;;  %v7662_v14 = vld [vmem:[#allocation72_spill] sm:$0xff] }
 0x2cd   :  { %v989_v23 = vadd.f32 %v988_v7, %v7649_v61  ;;  %v6381_v7 = vld [vmem:[#allocation3 + $0x42] sm:$0xff] }
 0x2ce   :  { %v1320_v9 = vadd.f32 %v1319_v18, %v7650_v12  ;;  %2127 = vrot.lane.b32.xlu0 %v2092_v36, %s4370_s17  ;;  %4280 = vmatprep.subr.bf16.mxu1 %v4279_v40  ;;  %v6386_v18 = vld [vmem:[#allocation3 + $0x52] sm:$0xff] }
 0x2cf   :  { %v990_v53 = vadd.f32 %v989_v23, %v7651_v38  ;;  %2125 = vrot.lane.b32.xlu1 %v2381_v47, %s4370_s17  ;;  %4282 = vmatpush3.bf16.msra.mxu1 %v4279_v40  ;;  %v7655_v23 = vld [vmem:[#allocation44_spill] sm:$0xff]  ;;  %v7663_v40 = vld [vmem:[#allocation69_spill] sm:$0xff] }
 0x2d0   :  { %v1321_v49 = vadd.f32 %v1320_v9, %v7652_v27  ;;  %v7656_v9 = vld [vmem:[#allocation49_spill] sm:$0xff] }
 0x2d1   :  { %v991_v1 = vadd.f32 %v990_v53, %v7653_v4  ;;  %v7657_v53 = vld [vmem:[#allocation47_spill] sm:$0xff]  ;;  %v7659_v4 = vld [vmem:[#allocation52_spill] sm:$0xff] }
 0x2d2   :  { %v1322_v13 = vrot.slane %v1321_v49, 4  ;;  %2512 = vrot.lane.b32.xlu0 %v2479_v58, %s4373_s16 }
 0x2d3   :  { %v992_v17 = vrot.slane %v991_v1, 4  ;;  %2510 = vrot.lane.b32.xlu1 %v2187_v60, %s4373_s16  ;;  %v2787_v60 = vld [vmem:[%s7338_s1 + $0x22c] sm:$0xff] }
 0x2d4   :  { %v1323_v39 = vadd.f32 %v1322_v13, %v1321_v49  ;;  %v4283_v16 = vpack.c.bf16 %v2788_v5, %v2787_v60  ;;  %v7658_v49 = vld [vmem:[#allocation54_spill] sm:$0xff]  ;;  %v7660_v13 = vld [vmem:[#allocation63_spill] sm:$0xff]  ;;  %v7665_v60 = vld [vmem:[#allocation76_spill] sm:$0xff] }
 0x2d5   :  { %v993_v15 = vadd.f32 %v992_v17, %v991_v1 }
 0x2d6   :  { %2224 = vrot.lane.b32.xlu0 %v6287_v11, %s4375_s9  ;;  %v1324_v43 = vrot.slane %v1323_v39, 2  ;;  %4284 = vmatprep.subr.bf16.mxu1 %v4283_v16 }
 0x2d7   :  { %v994_v35 = vrot.slane %v993_v15, 2  ;;  %2222 = vrot.lane.b32.xlu1 %v2479_v58, %s4375_s9  ;;  %v2789_v58 = vld [vmem:[%s7338_s1 + $0x23c] sm:$0xff]  ;;  %4286 = vmatpush3.bf16.msra.mxu1 %v4283_v16  ;;  %v7666_v16 = vld [vmem:[#allocation86_spill] sm:$0xff] }
 0x2d8   :  { %v1325_v55 = vadd.f32 %v1324_v43, %v1323_v39  ;;  %v4287_v33 = vpack.c.bf16 %v2790_v28, %v2789_v58  ;;  %v7668_v28 = vld [vmem:[#allocation11_spill] sm:$0xff] }
 0x2d9   :  { %v995_v41 = vadd.f32 %v994_v35, %v993_v15  ;;  %v7661_v15 = vld [vmem:[#allocation60_spill] sm:$0xff] }
 0x2da   :  { %2609 = vrot.lane.b32.xlu0 %v1995_v51, %s4374_s27  ;;  %v1326_v37 = vrot.slane %v1325_v55, 1  ;;  %4288 = vmatprep.subr.bf16.mxu1 %v4287_v33 }
 0x2db   :  { %2607 = vrot.lane.b32.xlu1 %v2284_v59, %s4374_s27  ;;  %v996_v46 = vrot.slane %v995_v41, 1  ;;  %4290 = vmatpush3.bf16.msra.mxu1 %v4287_v33 }
 0x2dc   :  { %v1327_v19 = vadd.f32 %v1326_v37, %v1325_v55  ;;  %4292 = vmatprep.subr.bf16.mxu1 %v4291_v32  ;;  %v7667_v55 = vld [vmem:[#allocation84_spill] sm:$0xff] }
 0x2dd   :  { %v997_v59 = vadd.f32 %v996_v46, %v995_v41  ;;  %v7664_v41 = vld [vmem:[#allocation79_spill] sm:$0xff] }
 0x2de   :  { %2032 = vrot.lane.b32.xlu0 %v6355_v0, %s4371_s26  ;;  %v1332_v25 = vmul.f32 0.00048828125, %v1327_v19  ;;  %v7670_v19 = vld [vmem:[#allocation14_spill] sm:$0xff] }
 0x2df   :  { %2319 = vrot.lane.b32.xlu1 %v1995_v51, %s4376_s10  ;;  %v6361_v52 = vmul.f32 0.00048828125, %v997_v59  ;;  %v6370_v51 = vld [vmem:[#allocation3 + $0x51] sm:$0xff]  ;;  %4294 = vmatpush3.bf16.msra.mxu1 %v4291_v32  ;;  %v7669_v59 = vld [vmem:[#allocation10_spill] sm:$0xff] }
 0x2e0   :  { %4202 = vmatprep.subr.mxu1 %v2793_v45 }
 0x2e1   :  { %v1334_v57 = vmul.f32 %v6361_v52, %v6361_v52  ;;  %v1370_v12 = vsub.f32 %v7655_v23, %v6361_v52  ;;  %v1371_v38 = vsub.f32 %v7656_v9, %v6361_v52  ;;  %v1372_v27 = vsub.f32 %v7657_v53, %v6361_v52  ;;  %v7675_v23 = vld [vmem:[#allocation19_spill] sm:$0xff] }
 0x2e2   :  { %2416 = vrot.lane.b32.xlu0 %v2092_v36, %s4377_s11  ;;  %v1374_v1 = vsub.f32 %v7659_v4, %v6361_v52  ;;  %v1375_v17 = vsub.f32 %v7660_v13, %v6361_v52  ;;  %v1376_v39 = vsub.f32 %v7661_v15, %v6361_v52  ;;  %v1377_v22 = vsub.f32 %v7662_v14, %v6361_v52  ;;  %v7678_v13 = vld [vmem:[#allocation15_spill] sm:$0xff]  ;;  %v7679_v14 = vld [vmem:[#allocation17_spill] sm:$0xff] }
 0x2e3   :  { %2704 = vrot.lane.b32.xlu1 %v2381_v47, %s4372_s7  ;;  %v1336_v21 = vsub.f32 %v1332_v25, %v1334_v57  ;;  %4203 = vmatpush3.msra.mxu1 %v2793_v45  ;;  %v7654_v47 = vld [vmem:[#allocation87_spill] sm:$0xff]  ;;  %v1378_v35 = vsub.f32 %v7663_v40, %v6361_v52  ;;  %v1379_v43 = vsub.f32 %v7664_v41, %v6361_v52  ;;  %v7672_v57 = vld [vmem:[#allocation18_spill] sm:$0xff]  ;;  %v7673_v45 = vld [vmem:[#allocation16_spill] sm:$0xff] }
 0x2e4   :  { %v1369_v61 = vsub.f32 %v7654_v47, %v6361_v52  ;;  %v1380_v5 = vsub.f32 %v7665_v60, %v6361_v52  ;;  %v1381_v46 = vsub.f32 %v7666_v16, %v6361_v52  ;;  %v1382_v58 = vsub.f32 %v7667_v55, %v6361_v52  ;;  %v7680_v41 = vld [vmem:[#allocation22_spill] sm:$0xff]  ;;  %v7681_v16 = vld [vmem:[#allocation20_spill] sm:$0xff] }
 0x2e5   :  { %v1402_v30 = vadd.f32 1e-05, %v1336_v21  ;;  %v1383_v33 = vsub.f32 %v7668_v28, %v6361_v52  ;;  %v1384_v37 = vsub.f32 %v7669_v59, %v6361_v52  ;;  %v1385_v10 = vsub.f32 %v7670_v19, %v6361_v52  ;;  %v7682_v59 = vld [vmem:[#allocation27_spill] sm:$0xff] }
 0x2e6   :  { %2034 = vrot.lane.b32.xlu0 %v6370_v51, %s4371_s26  ;;  %v1386_v25 = vsub.f32 %v7671_v2, %v6361_v52  ;;  %v1387_v32 = vsub.f32 %v7672_v57, %v6361_v52  ;;  %v1388_v21 = vsub.f32 %v7673_v45, %v6361_v52  ;;  %v1390_v9 = vsub.f32 %v7675_v23, %v6361_v52  ;;  %v7683_v2 = vld [vmem:[#allocation25_spill] sm:$0xff]  ;;  %v7684_v45 = vld [vmem:[#allocation30_spill] sm:$0xff]  ;;  %v7685_v23 = vld [vmem:[#allocation35_spill] sm:$0xff] }
 0x2e7   :  { %2321 = vrot.lane.b32.xlu1 %v6355_v0, %s4376_s10  ;;  %4338 = vrsqrt.f32 %v1402_v30  ;;  %v7674_v30 = vld [vmem:[#allocation21_spill] sm:$0xff]  ;;  %v1393_v15 = vsub.f32 %v7678_v13, %v6361_v52  ;;  %v1394_v40 = vsub.f32 %v7679_v14, %v6361_v52  ;;  %v1395_v60 = vsub.f32 %v7680_v41, %v6361_v52 }
 0x2e8   :  { %v1389_v47 = vsub.f32 %v7674_v30, %v6361_v52  ;;  %v1396_v55 = vsub.f32 %v7681_v16, %v6361_v52  ;;  %v1397_v19 = vsub.f32 %v7682_v59, %v6361_v52  ;;  %v1398_v57 = vsub.f32 %v7683_v2, %v6361_v52 }
 0x2e9   :  { %v1399_v30 = vsub.f32 %v7684_v45, %v6361_v52 }
 0x2ea   :  { %2418 = vrot.lane.b32.xlu0 %v6381_v7, %s4377_s11 }
 0x2eb   :  { %2706 = vrot.lane.b32.xlu1 %v2092_v36, %s4372_s7  ;;  %v1373_v36 = vsub.f32 %v7658_v49, %v6361_v52  ;;  %v7677_v49 = vld [vmem:[#allocation13_spill] sm:$0xff] }
 0x2ec   :  { %v1392_v4 = vsub.f32 %v7677_v49, %v6361_v52 }
 0x2ee   :  { %2131 = vrot.lane.b32.xlu0 %v6386_v18, %s4370_s17 }
 0x2ef   :  { %2129 = vrot.lane.b32.xlu1 %v6381_v7, %s4370_s17 }
 0x2f1   :  { %v4339_v28 = vpop.eup %4338 }
 0x2f2   :  { %2516 = vrot.lane.b32.xlu0 %v6291_v24, %s4373_s16  ;;  %v1437_v49 = vmul.f32 %v4339_v28, %v1369_v61  ;;  %v1438_v13 = vmul.f32 %v4339_v28, %v1370_v12  ;;  %v1439_v14 = vmul.f32 %v4339_v28, %v1371_v38  ;;  %v1440_v41 = vmul.f32 %v4339_v28, %v1372_v27 }
 0x2f3   :  { %2514 = vrot.lane.b32.xlu1 %v6287_v11, %s4373_s16  ;;  %v7676_v11 = vld [vmem:[#allocation26_spill] sm:$0xff]  ;;  %v1441_v16 = vmul.f32 %v4339_v28, %v1373_v36  ;;  %v1443_v31 = vmul.f32 %v4339_v28, %v1375_v17  ;;  %v1444_v59 = vmul.f32 %v4339_v28, %v1376_v39  ;;  %v1445_v56 = vmul.f32 %v4339_v28, %v1377_v22 }
 0x2f4   :  { %v1391_v53 = vsub.f32 %v7676_v11, %v6361_v52  ;;  %v1400_v11 = vsub.f32 %v7685_v23, %v6361_v52  ;;  %v1446_v34 = vmul.f32 %v4339_v28, %v1378_v35  ;;  %v1447_v2 = vmul.f32 %v4339_v28, %v1379_v43  ;;  %v6468_v39 = vld [vmem:[#allocation3 + $0x61] sm:$0xff] }
 0x2f5   :  { %v1448_v3 = vmul.f32 %v4339_v28, %v1380_v5  ;;  %v1449_v45 = vmul.f32 %v4339_v28, %v1381_v46  ;;  %v1450_v52 = vmul.f32 %v4339_v28, %v1382_v58  ;;  %v1451_v23 = vmul.f32 %v4339_v28, %v1383_v33 }
 0x2f6   :  { %2228 = vrot.lane.b32.xlu0 %v6297_v42, %s4375_s9  ;;  %v1442_v42 = vmul.f32 %v4339_v28, %v1374_v1  ;;  %v1452_v29 = vmul.f32 %v4339_v28, %v1384_v37  ;;  %v1454_v61 = vmul.f32 %v4339_v28, %v1386_v25  ;;  %v1455_v12 = vmul.f32 %v4339_v28, %v1387_v32  ;;  %v7686_v25 = vld [vmem:[#allocation23_spill] sm:$0xff] }
 0x2f7   :  { %2226 = vrot.lane.b32.xlu1 %v6291_v24, %s4375_s9  ;;  %v1453_v24 = vmul.f32 %v4339_v28, %v1385_v10  ;;  %v1456_v38 = vmul.f32 %v4339_v28, %v1388_v21  ;;  %v1457_v27 = vmul.f32 %v4339_v28, %v1389_v47  ;;  %v1458_v36 = vmul.f32 %v4339_v28, %v1390_v9  ;;  %v7687_v21 = vld [vmem:[#allocation24_spill] sm:$0xff] }
 0x2f8   :  { %v1459_v1 = vmul.f32 %v4339_v28, %v1391_v53  ;;  %v1460_v17 = vmul.f32 %v4339_v28, %v1392_v4  ;;  %v1461_v22 = vmul.f32 %v4339_v28, %v1393_v15  ;;  %v1462_v35 = vmul.f32 %v4339_v28, %v1394_v40  ;;  %v7688_v9 = vld [vmem:[#allocation28_spill] sm:$0xff]  ;;  %v7689_v4 = vld [vmem:[#allocation29_spill] sm:$0xff]  ;;  %v7690_v40 = vld [vmem:[#allocation42_spill] sm:$0xff] }
 0x2f9   :  { %v1463_v43 = vmul.f32 %v4339_v28, %v1395_v60  ;;  %v1464_v5 = vmul.f32 %v4339_v28, %v1396_v55  ;;  %v1465_v46 = vmul.f32 %v4339_v28, %v1397_v19  ;;  %v1466_v58 = vmul.f32 %v4339_v28, %v1398_v57  ;;  %v7691_v55 = vld [vmem:[#allocation45_spill] sm:$0xff] }
 0x2fa   :  { %2613 = vrot.lane.b32.xlu0 %v6370_v51, %s4374_s27  ;;  %v1468_v33 = vmul.f32 %v4339_v28, %v1400_v11  ;;  %v1501_v37 = vmul.f32 %v1437_v49, %v5720_v6  ;;  %v1502_v10 = vmul.f32 %v1438_v13, %v5715_v48  ;;  %v1503_v32 = vmul.f32 %v1439_v14, %v7686_v25  ;;  %v7694_v11 = vld [vmem:[#allocation75_spill] sm:$0xff]  ;;  %v7695_v49 = vld [vmem:[#allocation64_spill] sm:$0xff] }
 0x2fb   :  { %2611 = vrot.lane.b32.xlu1 %v6355_v0, %s4374_s27  ;;  %v1467_v0 = vmul.f32 %v4339_v28, %v1399_v30  ;;  %v1504_v47 = vmul.f32 %v1440_v41, %v7687_v21  ;;  %v1505_v53 = vmul.f32 %v1441_v16, %v7688_v9  ;;  %v1506_v15 = vmul.f32 %v1442_v42, %v7689_v4  ;;  %v7692_v28 = vld [vmem:[#allocation67_spill] sm:$0xff]  ;;  %v7696_v13 = vld [vmem:[#allocation40_spill] sm:$0xff]  ;;  %v7702_v9 = vld [vmem:[#allocation73_spill] sm:$0xff] }
 0x2fc   :  { %v1507_v60 = vmul.f32 %v1443_v31, %v7690_v40  ;;  %v1508_v19 = vmul.f32 %v1444_v59, %v7691_v55  ;;  %v1509_v57 = vmul.f32 %v1445_v56, %v7692_v28  ;;  %v7693_v30 = vld [vmem:[#allocation51_spill] sm:$0xff]  ;;  %v1511_v6 = vmul.f32 %v1447_v2, %v7694_v11  ;;  %v7698_v42 = vld [vmem:[#allocation32_spill] sm:$0xff]  ;;  %v7704_v55 = vld [vmem:[#allocation102_spill] sm:$0xff] }
 0x2fd   :  { %v1512_v48 = vmul.f32 %v1448_v3, %v7695_v49  ;;  %v1513_v14 = vmul.f32 %v1449_v45, %v7696_v13  ;;  %v7697_v41 = vld [vmem:[#allocation83_spill] sm:$0xff]  ;;  %v1515_v25 = vmul.f32 %v1451_v23, %v7698_v42  ;;  %v7699_v31 = vld [vmem:[#allocation36_spill] sm:$0xff]  ;;  %v1519_v3 = vmul.f32 %v1455_v12, %v7702_v9  ;;  %v7705_v45 = vld [vmem:[#allocation101_spill] sm:$0xff] }
 0x2fe   :  { %2036 = vrot.lane.b32.xlu0 %v6468_v39, %s4371_s26  ;;  %v1514_v16 = vmul.f32 %v1450_v52, %v7697_v41  ;;  %v1516_v21 = vmul.f32 %v1452_v29, %v7699_v31  ;;  %v7700_v56 = vld [vmem:[#allocation59_spill] sm:$0xff]  ;;  %v7701_v59 = vld [vmem:[#allocation48_spill] sm:$0xff]  ;;  %v1521_v28 = vmul.f32 %v1457_v27, %v7704_v55  ;;  %v7708_v13 = vld [vmem:[#allocation106_spill] sm:$0xff] }
 0x2ff   :  { %2323 = vrot.lane.b32.xlu1 %v6370_v51, %s4376_s10  ;;  %v1510_v51 = vmul.f32 %v1446_v34, %v7693_v30  ;;  %v1517_v34 = vmul.f32 %v1453_v24, %v7700_v56  ;;  %v1518_v2 = vmul.f32 %v1454_v61, %v7701_v59  ;;  %v7703_v4 = vld [vmem:[#allocation55_spill] sm:$0xff]  ;;  %v1522_v30 = vmul.f32 %v1458_v36, %v7705_v45  ;;  %v7706_v52 = vld [vmem:[#allocation104_spill] sm:$0xff]  ;;  %v7709_v41 = vld [vmem:[#allocation105_spill] sm:$0xff] }
 0x300   :  { %v1520_v40 = vmul.f32 %v1456_v38, %v7703_v4  ;;  %v1523_v11 = vmul.f32 %v1459_v1, %v7706_v52  ;;  %v7707_v23 = vld [vmem:[#allocation103_spill] sm:$0xff]  ;;  %v1526_v24 = vmul.f32 %v1462_v35, %v7709_v41  ;;  %v7710_v42 = vld [vmem:[#allocation110_spill] sm:$0xff]  ;;  %v7711_v31 = vld [vmem:[#allocation109_spill] sm:$0xff]  ;;  %v1529_v38 = vmul.f32 %v1465_v46, %v5951_v50 }
 0x301   :  { %v1524_v49 = vmul.f32 %v1460_v17, %v7707_v23  ;;  %v6502_v29 = vld [vmem:[#allocation3 + $0x71] sm:$0xff]  ;;  %v1527_v61 = vmul.f32 %v1463_v43, %v7710_v42  ;;  %v1528_v12 = vmul.f32 %v1464_v5, %v7711_v31  ;;  %v7713_v1 = vld [vmem:[#allocation113_spill] sm:$0xff]  ;;  %v7716_v9 = vld [vmem:[#allocation114_spill] sm:$0xff]  ;;  %v1569_v45 = vadd.f32 %v1505_v53, %v5984_v44 }
 0x302   :  { %2420 = vrot.lane.b32.xlu0 %v6386_v18, %s4377_s11  ;;  %v7712_v27 = vld [vmem:[#allocation111_spill] sm:$0xff]  ;;  %v1531_v56 = vmul.f32 %v1467_v0, %v7713_v1  ;;  %v7714_v17 = vld [vmem:[#allocation112_spill] sm:$0xff]  ;;  %v1567_v5 = vadd.f32 %v1503_v32, %v7716_v9  ;;  %v7720_v0 = vld [vmem:[#allocation118_spill] sm:$0xff] }
 0x303   :  { %2708 = vrot.lane.b32.xlu1 %v6381_v7, %s4372_s7  ;;  %v1525_v7 = vmul.f32 %v1461_v22, %v7708_v13  ;;  %v1530_v36 = vmul.f32 %v1466_v58, %v7712_v27  ;;  %v1532_v59 = vmul.f32 %v1468_v33, %v7714_v17  ;;  %v1565_v22 = vadd.f32 %v1501_v37, %v5918_v26  ;;  %v7715_v35 = vld [vmem:[#allocation107_spill] sm:$0xff]  ;;  %v7717_v4 = vld [vmem:[#allocation108_spill] sm:$0xff]  ;;  %v6524_v33 = vld [vmem:[#allocation3 + $0x62] sm:$0xff] }
 0x304   :  { %v1566_v43 = vadd.f32 %v1502_v10, %v7715_v35  ;;  %v1568_v55 = vadd.f32 %v1504_v47, %v7717_v4  ;;  %v7718_v50 = vld [vmem:[#allocation115_spill] sm:$0xff]  ;;  %v1572_v23 = vadd.f32 %v1508_v19, %v7720_v0  ;;  %v7721_v13 = vld [vmem:[#allocation121_spill] sm:$0xff]  ;;  %v7722_v42 = vld [vmem:[#allocation120_spill] sm:$0xff]  ;;  %v1633_v0 = vmax.f32 %v1569_v45, 0.0 }
 0x305   :  { %v1570_v46 = vadd.f32 %v1506_v15, %v7718_v50  ;;  %v7719_v58 = vld [vmem:[#allocation119_spill] sm:$0xff]  ;;  %v1573_v41 = vadd.f32 %v1509_v57, %v7721_v13  ;;  %v1574_v26 = vadd.f32 %v1510_v51, %v7722_v42  ;;  %v7724_v31 = vld [vmem:[#allocation122_spill] sm:$0xff]  ;;  %v7725_v44 = vld [vmem:[#allocation125_spill] sm:$0xff]  ;;  %v6547_v51 = vadd.f32 %v1517_v34, %v6035_v54 }
 0x306   :  { %2038 = vrot.lane.b32.xlu0 %v6502_v29, %s4371_s26  ;;  %v1571_v52 = vadd.f32 %v1507_v60, %v7719_v58  ;;  %v7723_v37 = vld [vmem:[#allocation123_spill] sm:$0xff]  ;;  %v1576_v32 = vadd.f32 %v1512_v48, %v7724_v31  ;;  %v6533_v47 = vadd.f32 %v1513_v14, %v7725_v44  ;;  %v7726_v53 = vld [vmem:[#allocation124_spill] sm:$0xff]  ;;  %v7727_v60 = vld [vmem:[#allocation117_spill] sm:$0xff]  ;;  %v6553_v48 = vadd.f32 %v1519_v3, %v6068_v63 }
 0x307   :  { %2325 = vrot.lane.b32.xlu1 %v6468_v39, %s4376_s10  ;;  %v1575_v10 = vadd.f32 %v1511_v6, %v7723_v37  ;;  %v6536_v15 = vadd.f32 %v1514_v16, %v7726_v53  ;;  %v6539_v19 = vadd.f32 %v1515_v25, %v7727_v60  ;;  %v7728_v27 = vld [vmem:[#allocation116_spill] sm:$0xff]  ;;  %v6550_v6 = vadd.f32 %v1518_v2, %v6030_v62  ;;  %v7729_v25 = vld [vmem:[#allocation126_spill] sm:$0xff]  ;;  %v7731_v54 = vld [vmem:[#allocation127_spill] sm:$0xff] }
 0x308   :  { %v6542_v57 = vadd.f32 %v1516_v21, %v7728_v27  ;;  %v6556_v14 = vadd.f32 %v1520_v40, %v6040_v20  ;;  %v6559_v16 = vadd.f32 %v1521_v28, %v6096_v8  ;;  %v6562_v21 = vadd.f32 %v1522_v30, %v7729_v25  ;;  %v7730_v1 = vld [vmem:[#allocation128_spill] sm:$0xff]  ;;  %v7732_v2 = vld [vmem:[#allocation130_spill] sm:$0xff]  ;;  %v7733_v3 = vld [vmem:[#allocation129_spill] sm:$0xff]  ;;  %1697 = vst.msk [vmem:[#allocation2 + $0x120] sm:$0xff] %vm731_vm2, %v1633_v0 }
 0x309   :  { %v6568_v34 = vadd.f32 %v1524_v49, %v7731_v54  ;;  %v6570_v62 = vld [vmem:[#allocation3 + $0x72] sm:$0xff]  ;;  %v6573_v63 = vadd.f32 %v1525_v7, %v7732_v2  ;;  %v6576_v20 = vadd.f32 %v1526_v24, %v7733_v3  ;;  %v7737_v17 = vld [vmem:[#allocation133_spill] sm:$0xff]  ;;  %v1631_v50 = vmax.f32 %v1567_v5, 0.0 }
 0x30a   :  { %2422 = vrot.lane.b32.xlu0 %v6524_v33, %s4377_s11  ;;  %v7734_v40 = vld [vmem:[#allocation132_spill] sm:$0xff]  ;;  %v7735_v28 = vld [vmem:[#allocation131_spill] sm:$0xff]  ;;  %v6590_v35 = vadd.f32 %v1530_v36, %v7737_v17  ;;  %v1632_v58 = vmax.f32 %v1568_v55, 0.0  ;;  %v1634_v13 = vmax.f32 %v1570_v46, 0.0  ;;  %v1636_v42 = vmax.f32 %v1572_v23, 0.0  ;;  %v7741_v55 = vld [vmem:[#allocation46_spill] sm:$0xff] }
 0x30b   :  { %2710 = vrot.lane.b32.xlu1 %v6386_v18, %s4372_s7  ;;  %v6565_v18 = vadd.f32 %v1523_v11, %v7730_v1  ;;  %v6579_v8 = vadd.f32 %v1527_v61, %v7734_v40  ;;  %v6582_v30 = vadd.f32 %v1528_v12, %v7735_v28  ;;  %v7736_v11 = vld [vmem:[#allocation134_spill] sm:$0xff]  ;;  %v7738_v7 = vld [vmem:[#allocation136_spill] sm:$0xff]  ;;  %v7739_v24 = vld [vmem:[#allocation135_spill] sm:$0xff]  ;;  %v1629_v61 = vmax.f32 %v1565_v22, 0.0  ;;  %1695 = vst.msk [vmem:[#allocation2 + $0x110] sm:$0xff] %vm731_vm2, %v1631_v50 }
 0x30c   :  { %v6587_v49 = vadd.f32 %v1529_v38, %v7736_v11  ;;  %v6593_v9 = vadd.f32 %v1531_v56, %v7738_v7  ;;  %v6596_v4 = vadd.f32 %v1532_v59, %v7739_v24  ;;  %v1630_v12 = vmax.f32 %v1566_v43, 0.0  ;;  %1696 = vst.msk [vmem:[#allocation2 + $0x118] sm:$0xff] %vm731_vm2, %v1632_v58  ;;  %v7740_v56 = vld [vmem:[#allocation41_spill] sm:$0xff]  ;;  %1698 = vst.msk [vmem:[#allocation2 + $0x128] sm:$0xff] %vm731_vm2, %v1634_v13 }
 0x30d   :  { %v1635_v38 = vmax.f32 %v1571_v52, 0.0  ;;  %v1637_v37 = vmax.f32 %v1573_v41, 0.0  ;;  %v1638_v36 = vmax.f32 %v1574_v26, 0.0  ;;  %v1639_v31 = vmax.f32 %v1575_v10, 0.0  ;;  %1693 = vst.msk [vmem:[#allocation2 + $0x100] sm:$0xff] %vm731_vm2, %v1629_v61  ;;  %1700 = vst.msk [vmem:[#allocation2 + $0x138] sm:$0xff] %vm731_vm2, %v1636_v42 }
 0x30e   :  { %2135 = vrot.lane.b32.xlu0 %v6570_v62, %s4370_s17  ;;  %v1640_v44 = vmax.f32 %v1576_v32, 0.0  ;;  %1694 = vst.msk [vmem:[#allocation2 + $0x108] sm:$0xff] %vm731_vm2, %v1630_v12  ;;  %v1641_v59 = vmax.f32 %v6533_v47, 0.0  ;;  %v1642_v22 = vmax.f32 %v6536_v15, 0.0  ;;  %v1643_v43 = vmax.f32 %v6539_v19, 0.0  ;;  %v6632_v47 = vld [vmem:[#allocation3 + $0x80] sm:$0xff] }
 0x30f   :  { %2133 = vrot.lane.b32.xlu1 %v6524_v33, %s4370_s17  ;;  %v1644_v5 = vmax.f32 %v6542_v57, 0.0  ;;  %1699 = vst.msk [vmem:[#allocation2 + $0x130] sm:$0xff] %vm731_vm2, %v1635_v38  ;;  %v1645_v45 = vmax.f32 %v6547_v51, 0.0  ;;  %v1646_v46 = vmax.f32 %v6550_v6, 0.0  ;;  %v1647_v52 = vmax.f32 %v6553_v48, 0.0  ;;  %1701 = vst.msk [vmem:[#allocation2 + $0x140] sm:$0xff] %vm731_vm2, %v1637_v37 }
 0x310   :  { %v1648_v23 = vmax.f32 %v6556_v14, 0.0  ;;  %1702 = vst.msk [vmem:[#allocation2 + $0x148] sm:$0xff] %vm731_vm2, %v1638_v36  ;;  %1703 = vst.msk [vmem:[#allocation2 + $0x150] sm:$0xff] %vm731_vm2, %v1639_v31  ;;  %v1649_v41 = vmax.f32 %v6559_v16, 0.0  ;;  %v1650_v26 = vmax.f32 %v6562_v21, 0.0  ;;  %v1651_v10 = vmax.f32 %v6565_v18, 0.0 }
 0x311   :  { %1704 = vst.msk [vmem:[#allocation2 + $0x158] sm:$0xff] %vm731_vm2, %v1640_v44  ;;  %v1652_v32 = vmax.f32 %v6568_v34, 0.0  ;;  %1705 = vst.msk [vmem:[#allocation2 + $0x160] sm:$0xff] %vm731_vm2, %v1641_v59  ;;  %v1653_v53 = vmax.f32 %v6573_v63, 0.0  ;;  %v1654_v15 = vmax.f32 %v6576_v20, 0.0  ;;  %v1655_v60 = vmax.f32 %v6579_v8, 0.0 }
 0x312   :  { %2520 = vrot.lane.b32.xlu0 %v7740_v56, %s4373_s16  ;;  %1706 = vst.msk [vmem:[#allocation2 + $0x168] sm:$0xff] %vm731_vm2, %v1642_v22  ;;  %1707 = vst.msk [vmem:[#allocation2 + $0x170] sm:$0xff] %vm731_vm2, %v1643_v43  ;;  %v1656_v19 = vmax.f32 %v6582_v30, 0.0  ;;  %v1657_v27 = vmax.f32 %v6587_v49, 0.0  ;;  %v1658_v57 = vmax.f32 %v6590_v35, 0.0  ;;  %v1659_v51 = vmax.f32 %v6593_v9, 0.0 }
 0x313   :  { %2518 = vrot.lane.b32.xlu1 %v7741_v55, %s4373_s16  ;;  %1708 = vst.msk [vmem:[#allocation2 + $0x178] sm:$0xff] %vm731_vm2, %v1644_v5  ;;  %1709 = vst.msk [vmem:[#allocation2 + $0x180] sm:$0xff] %vm731_vm2, %v1645_v45  ;;  %v1660_v6 = vmax.f32 %v6596_v4, 0.0  ;;  %v1805_v16 = vld [vmem:[#allocation2 + $0x110] ss:$2 sm:$0xff]  ;;  %v6670_v12 = vld [vmem:[#allocation3 + $0x82] sm:$0xff] }
 0x314   :  { %1710 = vst.msk [vmem:[#allocation2 + $0x188] sm:$0xff] %vm731_vm2, %v1646_v46  ;;  %1711 = vst.msk [vmem:[#allocation2 + $0x190] sm:$0xff] %vm731_vm2, %v1647_v52  ;;  %v1837_v25 = vld [vmem:[#allocation2 + $0x111] ss:$2 sm:$0xff]  ;;  %v1743_v1 = vld [vmem:[#allocation2 + $0x120] ss:$2 sm:$0xff] }
 0x315   :  { %1712 = vst.msk [vmem:[#allocation2 + $0x198] sm:$0xff] %vm731_vm2, %v1648_v23  ;;  %1713 = vst.msk [vmem:[#allocation2 + $0x1a0] sm:$0xff] %vm731_vm2, %v1649_v41  ;;  %v1741_v48 = vld [vmem:[#allocation2 + $0x100] ss:$2 sm:$0xff]  ;;  %v1773_v14 = vld [vmem:[#allocation2 + $0x101] ss:$2 sm:$0xff]  ;;  %v1876_v54 = vmax.f32 %v1805_v16, %v1837_v25 }
 0x316   :  { %2232 = vrot.lane.b32.xlu0 %v6632_v47, %s4375_s9  ;;  %1714 = vst.msk [vmem:[#allocation2 + $0x1a8] sm:$0xff] %vm731_vm2, %v1650_v26  ;;  %1715 = vst.msk [vmem:[#allocation2 + $0x1b0] sm:$0xff] %vm731_vm2, %v1651_v10  ;;  %v1860_v21 = vmax.f32 %v1741_v48, %v1773_v14  ;;  %v1775_v18 = vld [vmem:[#allocation2 + $0x121] ss:$2 sm:$0xff]  ;;  %v1807_v34 = vld [vmem:[#allocation2 + $0x130] ss:$2 sm:$0xff] }
 0x317   :  { %1716 = vst.msk [vmem:[#allocation2 + $0x1b8] sm:$0xff] %vm731_vm2, %v1652_v32  ;;  %2230 = vrot.lane.b32.xlu1 %v7740_v56, %s4375_s9  ;;  %1717 = vst.msk [vmem:[#allocation2 + $0x1c0] sm:$0xff] %vm731_vm2, %v1653_v53  ;;  %v1839_v2 = vld [vmem:[#allocation2 + $0x131] ss:$2 sm:$0xff]  ;;  %v1861_v63 = vmax.f32 %v1743_v1, %v1775_v18  ;;  %v1745_v3 = vld [vmem:[#allocation2 + $0x140] ss:$2 sm:$0xff] }
 0x318   :  { %1718 = vst.msk [vmem:[#allocation2 + $0x1c8] sm:$0xff] %vm731_vm2, %v1654_v15  ;;  %1719 = vst.msk [vmem:[#allocation2 + $0x1d0] sm:$0xff] %vm731_vm2, %v1655_v60  ;;  %v1877_v20 = vmax.f32 %v1807_v34, %v1839_v2  ;;  %v1777_v40 = vld [vmem:[#allocation2 + $0x141] ss:$2 sm:$0xff]  ;;  %v1809_v8 = vld [vmem:[#allocation2 + $0x150] ss:$2 sm:$0xff]  ;;  %v1892_v30 = vmax.f32 %v1860_v21, %v1876_v54 }
 0x319   :  { %1720 = vst.msk [vmem:[#allocation2 + $0x1d8] sm:$0xff] %vm731_vm2, %v1656_v19  ;;  %1721 = vst.msk [vmem:[#allocation2 + $0x1e0] sm:$0xff] %vm731_vm2, %v1657_v27  ;;  %v1841_v28 = vld [vmem:[#allocation2 + $0x151] ss:$2 sm:$0xff]  ;;  %v1862_v11 = vmax.f32 %v1745_v3, %v1777_v40  ;;  %v1747_v17 = vld [vmem:[#allocation2 + $0x160] ss:$2 sm:$0xff] }
 0x31a   :  { %1722 = vst.msk [vmem:[#allocation2 + $0x1e8] sm:$0xff] %vm731_vm2, %v1658_v57  ;;  %1723 = vst.msk [vmem:[#allocation2 + $0x1f0] sm:$0xff] %vm731_vm2, %v1659_v51  ;;  %2617 = vrot.lane.b32.xlu0 %v6502_v29, %s4374_s27  ;;  %v1878_v49 = vmax.f32 %v1809_v8, %v1841_v28  ;;  %v1779_v35 = vld [vmem:[#allocation2 + $0x161] ss:$2 sm:$0xff]  ;;  %v1811_v7 = vld [vmem:[#allocation2 + $0x170] ss:$2 sm:$0xff]  ;;  %v1893_v9 = vmax.f32 %v1861_v63, %v1877_v20 }
 0x31b   :  { %1724 = vst.msk [vmem:[#allocation2 + $0x1f8] sm:$0xff] %vm731_vm2, %v1660_v6  ;;  %2615 = vrot.lane.b32.xlu1 %v6468_v39, %s4374_s27  ;;  %v1843_v39 = vld [vmem:[#allocation2 + $0x171] ss:$2 sm:$0xff]  ;;  %v1863_v24 = vmax.f32 %v1747_v17, %v1779_v35  ;;  %v1749_v4 = vld [vmem:[#allocation2 + $0x180] ss:$2 sm:$0xff]  ;;  %1952 = vst.msk [vmem:[#allocation3 + $0xb1] sm:$0xff] %vm731_vm2, %v1892_v30 }
 0x31c   :  { %v1781_v61 = vld [vmem:[#allocation2 + $0x181] ss:$2 sm:$0xff]  ;;  %v1894_v50 = vmax.f32 %v1862_v11, %v1878_v49  ;;  %v1879_v58 = vmax.f32 %v1811_v7, %v1843_v39  ;;  %v1813_v0 = vld [vmem:[#allocation2 + $0x190] ss:$2 sm:$0xff]  ;;  %v1845_v13 = vld [vmem:[#allocation2 + $0x191] ss:$2 sm:$0xff] }
 0x31d   :  { %v1864_v38 = vmax.f32 %v1749_v4, %v1781_v61  ;;  %v1751_v42 = vld [vmem:[#allocation2 + $0x1a0] ss:$2 sm:$0xff]  ;;  %1953 = vst.msk [vmem:[#allocation3 + $0xc1] sm:$0xff] %vm731_vm2, %v1893_v9  ;;  %v1880_v37 = vmax.f32 %v1813_v0, %v1845_v13  ;;  %v1783_v36 = vld [vmem:[#allocation2 + $0x1a1] ss:$2 sm:$0xff] }
 0x31e   :  { %2424 = vrot.lane.b32.xlu0 %v6570_v62, %s4377_s11  ;;  %v1815_v31 = vld [vmem:[#allocation2 + $0x1b0] ss:$2 sm:$0xff]  ;;  %v1847_v44 = vld [vmem:[#allocation2 + $0x1b1] ss:$2 sm:$0xff]  ;;  %1954 = vst.msk [vmem:[#allocation3 + $0xd1] sm:$0xff] %vm731_vm2, %v1894_v50  ;;  %v1895_v56 = vmax.f32 %v1863_v24, %v1879_v58  ;;  %v2290_v19 = vld [vmem:[#allocation3 + $0x81] sm:$0xff] }
 0x31f   :  { %2327 = vrot.lane.b32.xlu1 %v6502_v29, %s4376_s10  ;;  %v1865_v29 = vmax.f32 %v1751_v42, %v1783_v36  ;;  %v1881_v59 = vmax.f32 %v1815_v31, %v1847_v44  ;;  %v1753_v22 = vld [vmem:[#allocation2 + $0x1c0] ss:$2 sm:$0xff]  ;;  %v1785_v43 = vld [vmem:[#allocation2 + $0x1c1] ss:$2 sm:$0xff]  ;;  %v1896_v55 = vmax.f32 %v1864_v38, %v1880_v37 }
 0x320   :  { %v1817_v5 = vld [vmem:[#allocation2 + $0x1d0] ss:$2 sm:$0xff]  ;;  %v1849_v45 = vld [vmem:[#allocation2 + $0x1d1] ss:$2 sm:$0xff]  ;;  %v1866_v46 = vmax.f32 %v1753_v22, %v1785_v43  ;;  %1955 = vst.msk [vmem:[#allocation3 + $0xe1] sm:$0xff] %vm731_vm2, %v1895_v56 }
 0x321   :  { %v1755_v52 = vld [vmem:[#allocation2 + $0x1e0] ss:$2 sm:$0xff]  ;;  %v1787_v23 = vld [vmem:[#allocation2 + $0x1e1] ss:$2 sm:$0xff]  ;;  %v1897_v41 = vmax.f32 %v1865_v29, %v1881_v59  ;;  %v1882_v26 = vmax.f32 %v1817_v5, %v1849_v45  ;;  %1956 = vst.msk [vmem:[#allocation3 + $0xf1] sm:$0xff] %vm731_vm2, %v1896_v55 }
 0x322   :  { %2426 = vrot.lane.b32.xlu0 %v6670_v12, %s4377_s11  ;;  %v1819_v10 = vld [vmem:[#allocation2 + $0x1f0] ss:$2 sm:$0xff]  ;;  %v1851_v32 = vld [vmem:[#allocation2 + $0x1f1] ss:$2 sm:$0xff]  ;;  %v1867_v53 = vmax.f32 %v1755_v52, %v1787_v23 }
 0x323   :  { %2712 = vrot.lane.b32.xlu1 %v6524_v33, %s4372_s7  ;;  %v1883_v15 = vmax.f32 %v1819_v10, %v1851_v32  ;;  %1957 = vst.msk [vmem:[#allocation3 + $0x101] sm:$0xff] %vm731_vm2, %v1897_v41  ;;  %v1898_v60 = vmax.f32 %v1866_v46, %v1882_v26  ;;  %v2001_v27 = vld [vmem:[#allocation3 + $0xb1] sm:$0xff] }
 0x324   :  { %v2194_v57 = vld [vmem:[#allocation3 + $0xb0] sm:$0xff]  ;;  %v6684_v33 = vld [vmem:[#allocation3 + $0xc0] sm:$0xff] }
 0x325   :  { %v1899_v51 = vmax.f32 %v1867_v53, %v1883_v15  ;;  %1958 = vst.msk [vmem:[#allocation3 + $0x111] sm:$0xff] %vm731_vm2, %v1898_v60  ;;  %1985 = vst.msk [vmem:[#allocation4 + $0x48] sm:$0xff] %vm731_vm2, %v2194_v57  ;;  %v6688_v6 = vld [vmem:[#allocation3 + $0xd0] sm:$0xff]  ;;  %v2002_v34 = vld [vmem:[#allocation3 + $0xc1] sm:$0xff] }
 0x326   :  { %2042 = vrot.lane.b32.xlu0 %v2001_v27, %s4371_s26  ;;  %1986 = vst.msk [vmem:[#allocation4 + $0x50] sm:$0xff] %vm731_vm2, %v6684_v33  ;;  %1987 = vst.msk [vmem:[#allocation4 + $0x58] sm:$0xff] %vm731_vm2, %v6688_v6  ;;  %v2098_v48 = vld [vmem:[#allocation3 + $0xb2] sm:$0xff]  ;;  %v2389_v28 = vld [vmem:[#allocation3 + $0xc2] sm:$0xff] }
 0x327   :  { %2329 = vrot.lane.b32.xlu1 %v2290_v19, %s4376_s10  ;;  %1959 = vst.msk [vmem:[#allocation3 + $0x121] sm:$0xff] %vm731_vm2, %v1899_v51  ;;  %v6695_v14 = vld [vmem:[#allocation3 + $0xe0] sm:$0xff]  ;;  %v2003_v20 = vld [vmem:[#allocation3 + $0xd1] sm:$0xff] }
 0x328   :  { %v6700_v16 = vld [vmem:[#allocation3 + $0xf0] sm:$0xff]  ;;  %1988 = vst.msk [vmem:[#allocation4 + $0x60] sm:$0xff] %vm731_vm2, %v6695_v14  ;;  %v2391_v31 = vld [vmem:[#allocation3 + $0xe2] sm:$0xff] }
 0x329   :  { %1989 = vst.msk [vmem:[#allocation4 + $0x68] sm:$0xff] %vm731_vm2, %v6700_v16  ;;  %v2100_v49 = vld [vmem:[#allocation3 + $0xd2] sm:$0xff] }
 0x32a   :  { %2139 = vrot.lane.b32.xlu0 %v2098_v48, %s4370_s17  ;;  %v6704_v1 = vld [vmem:[#allocation3 + $0x100] sm:$0xff]  ;;  %v2005_v38 = vld [vmem:[#allocation3 + $0xf1] sm:$0xff] }
 0x32b   :  { %2714 = vrot.lane.b32.xlu1 %v6570_v62, %s4372_s7  ;;  %1990 = vst.msk [vmem:[#allocation4 + $0x70] sm:$0xff] %vm731_vm2, %v6704_v1  ;;  %v2102_v29 = vld [vmem:[#allocation3 + $0xf2] sm:$0xff]  ;;  %v2006_v41 = vld [vmem:[#allocation3 + $0x101] sm:$0xff] }
 0x32c   :  { %v2219_v21 = vpop.permute.xlu0 %2218  ;;  %v6712_v62 = vld [vmem:[#allocation3 + $0x110] sm:$0xff] }
 0x32d   :  { %v2027_v25 = vpop.permute.xlu1 %2026  ;;  %2267 = vst.msk [vmem:[#allocation4] sm:$0xff] %vm2266_vm9, %v2219_v21  ;;  %v2007_v15 = vld [vmem:[#allocation3 + $0x111] sm:$0xff] }
 0x32e   :  { %2074 = vst.msk [vmem:[#allocation4 + $0x8] sm:$0xff] %vm2072_vm6, %v2027_v25  ;;  %2236 = vrot.lane.b32.xlu0 %v6684_v33, %s4375_s9 }
 0x32f   :  { %2522 = vrot.lane.b32.xlu1 %v6632_v47, %s4373_s16  ;;  %1991 = vst.msk [vmem:[#allocation4 + $0x78] sm:$0xff] %vm731_vm2, %v6712_v62  ;;  %vm3497_vm2 = vcmask 1042434  }
 0x330   :  { %v2316_v54 = vpop.permute.xlu0 %2315 }
 0x331   :  { %v2124_v18 = vpop.permute.xlu1 %2123  ;;  %2364 = vst.msk [vmem:[#allocation4] sm:$0xff] %vm2363_vm10, %v2316_v54 }
 0x332   :  { %2171 = vst.msk [vmem:[#allocation4 + $0x8] sm:$0xff] %vm2169_vm7, %v2124_v18  ;;  %2044 = vrot.lane.b32.xlu0 %v2002_v34, %s4371_s26  ;;  %v2201_v18 = vld [vmem:[#allocation3 + $0x120] sm:$0xff] }
 0x333   :  { %2619 = vrot.lane.b32.xlu1 %v2290_v19, %s4374_s27 }
 0x334   :  { %v2318_v63 = vpop.permute.xlu0 %2317 }
 0x335   :  { %v2221_v2 = vpop.permute.xlu1 %2220 }
 0x336   :  { %2268 = vst.msk [vmem:[#allocation4 + $0x8] sm:$0xff] %vm2266_vm9, %v2221_v2  ;;  %2428 = vrot.lane.b32.xlu0 %v2098_v48, %s4377_s11 }
 0x337   :  { %2365 = vst.msk [vmem:[#allocation4 + $0x8] sm:$0xff] %vm2363_vm10, %v2318_v63  ;;  %2716 = vrot.lane.b32.xlu1 %v6670_v12, %s4372_s7  ;;  %v2004_v12 = vld [vmem:[#allocation3 + $0xe1] sm:$0xff] }
 0x338   :  { %v2031_v3 = vpop.permute.xlu0 %2030 }
 0x339   :  { %v2029_v47 = vpop.permute.xlu1 %2028  ;;  %2076 = vst.msk [vmem:[#allocation4 + $0x18] sm:$0xff] %vm2072_vm6, %v2031_v3 }
 0x33a   :  { %2075 = vst.msk [vmem:[#allocation4 + $0x10] sm:$0xff] %vm2072_vm6, %v2029_v47  ;;  %2046 = vrot.lane.b32.xlu0 %v2003_v20, %s4371_s26  ;;  %v2298_v47 = vld [vmem:[#allocation3 + $0x121] sm:$0xff] }
 0x33b   :  { %2234 = vrot.lane.b32.xlu1 %v2194_v57, %s4375_s9  ;;  %v2393_v57 = vld [vmem:[#allocation3 + $0x102] sm:$0xff] }
 0x33c   :  { %v2415_v8 = vpop.permute.xlu0 %2414 }
 0x33d   :  { %v2413_v40 = vpop.permute.xlu1 %2412  ;;  %2462 = vst.msk [vmem:[#allocation4 + $0x8] sm:$0xff] %vm2460_vm11, %v2415_v8  ;;  %v7743_v8 = vld [vmem:[#allocation38_spill] sm:$0xff] }
 0x33e   :  { %2461 = vst.msk [vmem:[#allocation4] sm:$0xff] %vm2460_vm11, %v2413_v40  ;;  %2430 = vrot.lane.b32.xlu0 %v2389_v28, %s4377_s11  ;;  %v7742_v40 = vld [vmem:[#allocation34_spill] sm:$0xff] }
 0x33f   :  { %2331 = vrot.lane.b32.xlu1 %v2001_v27, %s4376_s10 }
 0x340   :  { %v2128_v11 = vpop.permute.xlu0 %2127 }
 0x341   :  { %v2126_v30 = vpop.permute.xlu1 %2125  ;;  %2173 = vst.msk [vmem:[#allocation4 + $0x18] sm:$0xff] %vm2169_vm7, %v2128_v11 }
 0x342   :  { %2172 = vst.msk [vmem:[#allocation4 + $0x10] sm:$0xff] %vm2169_vm7, %v2126_v30  ;;  %2143 = vrot.lane.b32.xlu0 %v2100_v49, %s4370_s17 }
 0x343   :  { %2333 = vrot.lane.b32.xlu1 %v2002_v34, %s4376_s10 }
 0x344   :  { %v2513_v35 = vpop.permute.xlu0 %2512 }
 0x345   :  { %v2511_v17 = vpop.permute.xlu1 %2510  ;;  %2560 = vst.msk [vmem:[#allocation4 + $0x8] sm:$0xff] %vm2558_vm12, %v2513_v35 }
 0x346   :  { %2559 = vst.msk [vmem:[#allocation4] sm:$0xff] %vm2558_vm12, %v2511_v17  ;;  %2528 = vrot.lane.b32.xlu0 %v6688_v6, %s4373_s16 }
 0x347   :  { %2141 = vrot.lane.b32.xlu1 %v2389_v28, %s4370_s17 }
 0x348   :  { %v2225_v9 = vpop.permute.xlu0 %2224 }
 0x349   :  { %v2223_v7 = vpop.permute.xlu1 %2222  ;;  %2270 = vst.msk [vmem:[#allocation4 + $0x18] sm:$0xff] %vm2266_vm9, %v2225_v9  ;;  %v2687_v9 = vld [vmem:[#allocation3 + $0x132] sm:$0xff] }
 0x34a   :  { %2269 = vst.msk [vmem:[#allocation4 + $0x10] sm:$0xff] %vm2266_vm9, %v2223_v7  ;;  %2240 = vrot.lane.b32.xlu0 %v6695_v14, %s4375_s9  ;;  %v2395_v7 = vld [vmem:[#allocation3 + $0x122] sm:$0xff] }
 0x34b   :  { %2526 = vrot.lane.b32.xlu1 %v6684_v33, %s4373_s16 }
 0x34c   :  { %v2610_v24 = vpop.permute.xlu0 %2609 }
 0x34d   :  { %v2608_v39 = vpop.permute.xlu1 %2607  ;;  %2657 = vst.msk [vmem:[#allocation4 + $0x8] sm:$0xff] %vm2655_vm13, %v2610_v24 }
 0x34e   :  { %2656 = vst.msk [vmem:[#allocation4] sm:$0xff] %vm2655_vm13, %v2608_v39  ;;  %2625 = vrot.lane.b32.xlu0 %v2003_v20, %s4374_s27 }
 0x34f   :  { %2238 = vrot.lane.b32.xlu1 %v6688_v6, %s4375_s9  ;;  %v2104_v6 = vld [vmem:[#allocation3 + $0x112] sm:$0xff] }
 0x350   :  { %v2033_v61 = vpop.permute.xlu0 %2032 }
 0x351   :  { %v2320_v4 = vpop.permute.xlu1 %2319  ;;  %2077 = vst.msk [vmem:[#allocation4 + $0x20] sm:$0xff] %vm2072_vm6, %v2033_v61 }
 0x352   :  { %2366 = vst.msk [vmem:[#allocation4 + $0x10] sm:$0xff] %vm2363_vm10, %v2320_v4  ;;  %2048 = vrot.lane.b32.xlu0 %v2004_v12, %s4371_s26 }
 0x353   :  { %2623 = vrot.lane.b32.xlu1 %v2002_v34, %s4374_s27 }
 0x354   :  { %v2417_v50 = vpop.permute.xlu0 %2416 }
 0x355   :  { %v2705_v58 = vpop.permute.xlu1 %2704  ;;  %2463 = vst.msk [vmem:[#allocation4 + $0x10] sm:$0xff] %vm2460_vm11, %v2417_v50 }
 0x356   :  { %2753 = vst.msk [vmem:[#allocation4] sm:$0xff] %vm2752_vm14, %v2705_v58  ;;  %2432 = vrot.lane.b32.xlu0 %v2100_v49, %s4377_s11 }
 0x357   :  { %2335 = vrot.lane.b32.xlu1 %v2003_v20, %s4376_s10 }
 0x358   :  { %v2035_v0 = vpop.permute.xlu0 %2034 }
 0x359   :  { %v2322_v13 = vpop.permute.xlu1 %2321  ;;  %2078 = vst.msk [vmem:[#allocation4 + $0x28] sm:$0xff] %vm2072_vm6, %v2035_v0 }
 0x35a   :  { %2367 = vst.msk [vmem:[#allocation4 + $0x18] sm:$0xff] %vm2363_vm10, %v2322_v13  ;;  %2050 = vrot.lane.b32.xlu0 %v2005_v38, %s4371_s26 }
 0x35b   :  { %2720 = vrot.lane.b32.xlu1 %v2389_v28, %s4372_s7 }
 0x35c   :  { %v2419_v42 = vpop.permute.xlu0 %2418 }
 0x35d   :  { %v2707_v37 = vpop.permute.xlu1 %2706  ;;  %2464 = vst.msk [vmem:[#allocation4 + $0x18] sm:$0xff] %vm2460_vm11, %v2419_v42  ;;  %v2769_v36 = vld [vmem:[#allocation4] sm:$0xff] }
 0x35e   :  { %2754 = vst.msk [vmem:[#allocation4 + $0x8] sm:$0xff] %vm2752_vm14, %v2707_v37  ;;  %4204 = vmatprep.mubr.msk.f32.mxu1 %vm2799_vm15, %v2769_v36  ;;  %2434 = vrot.lane.b32.xlu0 %v2391_v31, %s4377_s11 }
 0x35f   :  { %2337 = vrot.lane.b32.xlu1 %v2004_v12, %s4376_s10 }
 0x360   :  { %v2132_v44 = vpop.permute.xlu0 %2131 }
 0x361   :  { %v2130_v56 = vpop.permute.xlu1 %2129  ;;  %2175 = vst.msk [vmem:[#allocation4 + $0x28] sm:$0xff] %vm2169_vm7, %v2132_v44 }
 0x362   :  { %2174 = vst.msk [vmem:[#allocation4 + $0x20] sm:$0xff] %vm2169_vm7, %v2130_v56  ;;  %2147 = vrot.lane.b32.xlu0 %v2102_v29, %s4370_s17 }
 0x363   :  { %2722 = vrot.lane.b32.xlu1 %v2100_v49, %s4372_s7  ;;  %v7744_v49 = vld [vmem:[#allocation31_spill] sm:$0xff] }
 0x364   :  { %v2517_v59 = vpop.permute.xlu0 %2516 }
 0x365   :  { %v2515_v22 = vpop.permute.xlu1 %2514  ;;  %2562 = vst.msk [vmem:[#allocation4 + $0x18] sm:$0xff] %vm2558_vm12, %v2517_v59  ;;  %v2770_v43 = vld [vmem:[#allocation4 + $0x8] sm:$0xff] }
 0x366   :  { %2561 = vst.msk [vmem:[#allocation4 + $0x10] sm:$0xff] %vm2558_vm12, %v2515_v22  ;;  %4205 = vmatmul.mubr.msk.f32.vlgmr.msra.gmra.mrb[18].mxu1 %vm2799_vm15, %v2770_v43  ;;  %2532 = vrot.lane.b32.xlu0 %v6700_v16, %s4373_s16 }
 0x367   :  { %2145 = vrot.lane.b32.xlu1 %v2391_v31, %s4370_s17 }
 0x368   :  { %v2229_v5 = vpop.permute.xlu0 %2228 }
 0x369   :  { %v2227_v55 = vpop.permute.xlu1 %2226  ;;  %2272 = vst.msk [vmem:[#allocation4 + $0x28] sm:$0xff] %vm2266_vm9, %v2229_v5 }
 0x36a   :  { %2271 = vst.msk [vmem:[#allocation4 + $0x20] sm:$0xff] %vm2266_vm9, %v2227_v55  ;;  %2244 = vrot.lane.b32.xlu0 %v6704_v1, %s4375_s9 }
 0x36b   :  { %2530 = vrot.lane.b32.xlu1 %v6695_v14, %s4373_s16 }
 0x36c   :  { %v2614_v45 = vpop.permute.xlu0 %2613 }
 0x36d   :  { %v2612_v46 = vpop.permute.xlu1 %2611  ;;  %2659 = vst.msk [vmem:[#allocation4 + $0x18] sm:$0xff] %vm2655_vm13, %v2614_v45 }
 0x36e   :  { %2658 = vst.msk [vmem:[#allocation4 + $0x10] sm:$0xff] %vm2655_vm13, %v2612_v46  ;;  %2629 = vrot.lane.b32.xlu0 %v2005_v38, %s4374_s27 }
 0x36f   :  { %2242 = vrot.lane.b32.xlu1 %v6700_v16, %s4375_s9 }
 0x370   :  { %v2037_v52 = vpop.permute.xlu0 %2036 }
 0x371   :  { %v2324_v23 = vpop.permute.xlu1 %2323  ;;  %2079 = vst.msk [vmem:[#allocation4 + $0x30] sm:$0xff] %vm2072_vm6, %v2037_v52 }
 0x372   :  { %2368 = vst.msk [vmem:[#allocation4 + $0x20] sm:$0xff] %vm2363_vm10, %v2324_v23  ;;  %2052 = vrot.lane.b32.xlu0 %v2006_v41, %s4371_s26 }
 0x373   :  { %2627 = vrot.lane.b32.xlu1 %v2004_v12, %s4374_s27 }
 0x374   :  { %v2421_v26 = vpop.permute.xlu0 %2420 }
 0x375   :  { %v2709_v10 = vpop.permute.xlu1 %2708  ;;  %2465 = vst.msk [vmem:[#allocation4 + $0x20] sm:$0xff] %vm2460_vm11, %v2421_v26 }
 0x376   :  { %2755 = vst.msk [vmem:[#allocation4 + $0x10] sm:$0xff] %vm2752_vm14, %v2709_v10  ;;  %2436 = vrot.lane.b32.xlu0 %v2102_v29, %s4377_s11 }
 0x377   :  { %2339 = vrot.lane.b32.xlu1 %v2005_v38, %s4376_s10 }
 0x378   :  { %v2039_v32 = vpop.permute.xlu0 %2038 }
 0x379   :  { %v2326_v53 = vpop.permute.xlu1 %2325  ;;  %2080 = vst.msk [vmem:[#allocation4 + $0x38] sm:$0xff] %vm2072_vm6, %v2039_v32 }
 0x37a   :  { %2369 = vst.msk [vmem:[#allocation4 + $0x28] sm:$0xff] %vm2363_vm10, %v2326_v53  ;;  %2054 = vrot.lane.b32.xlu0 %v2007_v15, %s4371_s26 }
 0x37b   :  { %2724 = vrot.lane.b32.xlu1 %v2391_v31, %s4372_s7 }
 0x37c   :  { %v2423_v60 = vpop.permute.xlu0 %2422 }
 0x37d   :  { %v2711_v19 = vpop.permute.xlu1 %2710  ;;  %2466 = vst.msk [vmem:[#allocation4 + $0x28] sm:$0xff] %vm2460_vm11, %v2423_v60  ;;  %v2771_v27 = vld [vmem:[#allocation4 + $0x10] sm:$0xff] }
 0x37e   :  { %2756 = vst.msk [vmem:[#allocation4 + $0x18] sm:$0xff] %vm2752_vm14, %v2711_v19  ;;  %4207 = vmatprep.mubr.msk.f32.mxu1 %vm2799_vm15, %v2771_v27  ;;  %2438 = vrot.lane.b32.xlu0 %v2393_v57, %s4377_s11 }
 0x37f   :  { %2341 = vrot.lane.b32.xlu1 %v2006_v41, %s4376_s10 }
 0x380   :  { %v2136_v51 = vpop.permute.xlu0 %2135 }
 0x381   :  { %v2134_v33 = vpop.permute.xlu1 %2133  ;;  %2177 = vst.msk [vmem:[#allocation4 + $0x38] sm:$0xff] %vm2169_vm7, %v2136_v51 }
 0x382   :  { %2176 = vst.msk [vmem:[#allocation4 + $0x30] sm:$0xff] %vm2169_vm7, %v2134_v33  ;;  %2151 = vrot.lane.b32.xlu0 %v2104_v6, %s4370_s17 }
 0x383   :  { %2726 = vrot.lane.b32.xlu1 %v2102_v29, %s4372_s7 }
 0x384   :  { %v2521_v48 = vpop.permute.xlu0 %2520 }
 0x385   :  { %v2519_v14 = vpop.permute.xlu1 %2518  ;;  %2564 = vst.msk [vmem:[#allocation4 + $0x28] sm:$0xff] %vm2558_vm12, %v2521_v48  ;;  %v2772_v16 = vld [vmem:[#allocation4 + $0x18] sm:$0xff] }
 0x386   :  { %2563 = vst.msk [vmem:[#allocation4 + $0x20] sm:$0xff] %vm2558_vm12, %v2519_v14  ;;  %4208 = vmatmul.mubr.msk.f32.gmra.mrb[20].mxu1 %vm2799_vm15, %v2772_v16  ;;  %2536 = vrot.lane.b32.xlu0 %v6712_v62, %s4373_s16 }
 0x387   :  { %2149 = vrot.lane.b32.xlu1 %v2393_v57, %s4370_s17 }
 0x388   :  { %v2233_v25 = vpop.permute.xlu0 %2232 }
 0x389   :  { %v2231_v21 = vpop.permute.xlu1 %2230  ;;  %2274 = vst.msk [vmem:[#allocation4 + $0x38] sm:$0xff] %vm2266_vm9, %v2233_v25 }
 0x38a   :  { %2273 = vst.msk [vmem:[#allocation4 + $0x30] sm:$0xff] %vm2266_vm9, %v2231_v21  ;;  %2248 = vrot.lane.b32.xlu0 %v2201_v18, %s4375_s9 }
 0x38b   :  { %2534 = vrot.lane.b32.xlu1 %v6704_v1, %s4373_s16 }
 0x38c   :  { %v2618_v54 = vpop.permute.xlu0 %2617 }
 0x38d   :  { %v2616_v34 = vpop.permute.xlu1 %2615  ;;  %2661 = vst.msk [vmem:[#allocation4 + $0x28] sm:$0xff] %vm2655_vm13, %v2618_v54 }
 0x38e   :  { %2660 = vst.msk [vmem:[#allocation4 + $0x20] sm:$0xff] %vm2655_vm13, %v2616_v34  ;;  %2633 = vrot.lane.b32.xlu0 %v2007_v15, %s4374_s27 }
 0x38f   :  { %2246 = vrot.lane.b32.xlu1 %v6712_v62, %s4375_s9 }
 0x390   :  { %v2425_v2 = vpop.permute.xlu0 %2424 }
 0x391   :  { %v2328_v63 = vpop.permute.xlu1 %2327 }
 0x392   :  { %2370 = vst.msk [vmem:[#allocation4 + $0x30] sm:$0xff] %vm2363_vm10, %v2328_v63  ;;  %2345 = vrot.lane.b32.xlu0 %v2298_v47, %s4376_s10 }
 0x393   :  { %2467 = vst.msk [vmem:[#allocation4 + $0x30] sm:$0xff] %vm2460_vm11, %v2425_v2  ;;  %2631 = vrot.lane.b32.xlu1 %v2006_v41, %s4374_s27 }
 0x394   :  { %v2427_v1 = vpop.permute.xlu0 %2426 }
 0x395   :  { %v2713_v3 = vpop.permute.xlu1 %2712 }
 0x396   :  { %2757 = vst.msk [vmem:[#allocation4 + $0x20] sm:$0xff] %vm2752_vm14, %v2713_v3  ;;  %2730 = vrot.lane.b32.xlu0 %v2104_v6, %s4372_s7 }
 0x397   :  { %2343 = vrot.lane.b32.xlu1 %v2007_v15, %s4376_s10 }
 0x398   :  { %v2043_v20 = vpop.permute.xlu0 %2042 }
 0x399   :  { %v2330_v62 = vpop.permute.xlu1 %2329  ;;  %2082 = vst.msk [vmem:[#allocation4 + $0x48] sm:$0xff] %vm2072_vm6, %v2043_v20 }
 0x39a   :  { %2371 = vst.msk [vmem:[#allocation4 + $0x38] sm:$0xff] %vm2363_vm10, %v2330_v62  ;;  %2538 = vrot.lane.b32.xlu0 %v2201_v18, %s4373_s16 }
 0x39b   :  { %2468 = vst.msk [vmem:[#allocation4 + $0x38] sm:$0xff] %vm2460_vm11, %v2427_v1  ;;  %2728 = vrot.lane.b32.xlu1 %v2393_v57, %s4372_s7 }
 0x39c   :  { %2566 = vst.msk [vmem:[#allocation4 + $0x38] sm:$0xff] %vm2558_vm12, %v7742_v40  ;;  %v2140_v30 = vpop.permute.xlu0 %2139 }
 0x39d   :  { %2663 = vst.msk [vmem:[#allocation4 + $0x38] sm:$0xff] %vm2655_vm13, %v7743_v8  ;;  %v2715_v28 = vpop.permute.xlu1 %2714  ;;  %v2773_v11 = vld [vmem:[#allocation4 + $0x20] sm:$0xff] }
 0x39e   :  { %2760 = vst.msk [vmem:[#allocation4 + $0x38] sm:$0xff] %vm2752_vm14, %v7744_v49  ;;  %2758 = vst.msk [vmem:[#allocation4 + $0x28] sm:$0xff] %vm2752_vm14, %v2715_v28  ;;  %4210 = vmatprep.mubr.msk.f32.mxu1 %vm2799_vm15, %v2773_v11  ;;  %2635 = vrot.lane.b32.xlu0 %v2298_v47, %s4374_s27 }
 0x39f   :  { %2179 = vst.msk [vmem:[#allocation4 + $0x48] sm:$0xff] %vm2169_vm7, %v2140_v30  ;;  %2440 = vrot.lane.b32.xlu1 %v2104_v6, %s4377_s11 }
 0x3a0   :  { %v2237_v35 = vpop.permute.xlu0 %2236 }
 0x3a1   :  { %v2523_v17 = vpop.permute.xlu1 %2522  ;;  %2276 = vst.msk [vmem:[#allocation4 + $0x48] sm:$0xff] %vm2266_vm9, %v2237_v35 }
 0x3a2   :  { %2565 = vst.msk [vmem:[#allocation4 + $0x30] sm:$0xff] %vm2558_vm12, %v2523_v17  ;;  %2732 = vrot.lane.b32.xlu0 %v2395_v7, %s4372_s7 }
 0x3a3   :  { %2442 = vrot.lane.b32.xlu1 %v2395_v7, %s4377_s11 }
 0x3a4   :  { %v2045_v24 = vpop.permute.xlu0 %2044 }
 0x3a5   :  { %v2620_v39 = vpop.permute.xlu1 %2619  ;;  %v2774_v4 = vld [vmem:[#allocation4 + $0x28] sm:$0xff]  ;;  %2083 = vst.msk [vmem:[#allocation4 + $0x50] sm:$0xff] %vm2072_vm6, %v2045_v24  ;;  %v2776_v42 = vld [vmem:[#allocation4 + $0x38] sm:$0xff] }
 0x3a6   :  { %2662 = vst.msk [vmem:[#allocation4 + $0x30] sm:$0xff] %vm2655_vm13, %v2620_v39  ;;  %4211 = vmatmul.mubr.msk.f32.gmra.mrb[22].mxu1 %vm2799_vm15, %v2774_v4 }
 0x3a7   :  { %2734 = vrot.lane.b32.xlu1 %v2687_v9, %s4372_s7 }
 0x3a8   :  { %v2429_v12 = vpop.permute.xlu0 %2428 }
 0x3a9   :  { %v2717_v61 = vpop.permute.xlu1 %2716 }
 0x3aa   :  { %2759 = vst.msk [vmem:[#allocation4 + $0x30] sm:$0xff] %vm2752_vm14, %v2717_v61  ;;  %v7745_v61 = vld [vmem:[#allocation33_spill] sm:$0xff] }
 0x3ac   :  { %v2047_v58 = vpop.permute.xlu0 %2046 }
 0x3ad   :  { %v2235_v50 = vpop.permute.xlu1 %2234  ;;  %2084 = vst.msk [vmem:[#allocation4 + $0x58] sm:$0xff] %vm2072_vm6, %v2047_v58 }
 0x3ae   :  { %2275 = vst.msk [vmem:[#allocation4 + $0x40] sm:$0xff] %vm2266_vm9, %v2235_v50 }
 0x3b0   :  { %v2431_v13 = vpop.permute.xlu0 %2430 }
 0x3b1   :  { %v2332_v0 = vpop.permute.xlu1 %2331  ;;  %v2775_v38 = vld [vmem:[#allocation4 + $0x30] sm:$0xff] }
 0x3b2   :  { %2372 = vst.msk [vmem:[#allocation4 + $0x40] sm:$0xff] %vm2363_vm10, %v2332_v0  ;;  %4213 = vmatprep.mubr.msk.f32.mxu1 %vm2799_vm15, %v2775_v38 }
 0x3b3   :  { %2469 = vst.msk [vmem:[#allocation4 + $0x40] sm:$0xff] %vm2460_vm11, %v2429_v12  ;;  %4214 = vmatmul.mubr.msk.f32.gmra.mrb[24].mxu1 %vm2799_vm15, %v2776_v42  ;;  %v7746_v12 = vld [vmem:[#allocation37_spill] sm:$0xff] }
 0x3b4   :  { %v2144_v36 = vpop.permute.xlu0 %2143 }
 0x3b5   :  { %v2334_v37 = vpop.permute.xlu1 %2333  ;;  %2181 = vst.msk [vmem:[#allocation4 + $0x58] sm:$0xff] %vm2169_vm7, %v2144_v36 }
 0x3b6   :  { %2373 = vst.msk [vmem:[#allocation4 + $0x48] sm:$0xff] %vm2363_vm10, %v2334_v37 }
 0x3b7   :  { %2470 = vst.msk [vmem:[#allocation4 + $0x48] sm:$0xff] %vm2460_vm11, %v2431_v13  ;;  %v6937_v13 = vld [vmem:[%s7338_s1 + $0x264] ss:$0 sm:$0xff] }
 0x3b8   :  { %v2529_v44 = vpop.permute.xlu0 %2528 }
 0x3b9   :  { %v2142_v31 = vpop.permute.xlu1 %2141  ;;  %2568 = vst.msk [vmem:[#allocation4 + $0x48] sm:$0xff] %vm2558_vm12, %v2529_v44 }
 0x3ba   :  { %2180 = vst.msk [vmem:[#allocation4 + $0x50] sm:$0xff] %vm2169_vm7, %v2142_v31 }
 0x3bc   :  { %v2241_v29 = vpop.permute.xlu0 %2240 }
 0x3bd   :  { %v2527_v56 = vpop.permute.xlu1 %2526  ;;  %2278 = vst.msk [vmem:[#allocation4 + $0x58] sm:$0xff] %vm2266_vm9, %v2241_v29 }
 0x3be   :  { %2567 = vst.msk [vmem:[#allocation4 + $0x40] sm:$0xff] %vm2558_vm12, %v2527_v56 }
 0x3c0   :  { %v2626_v22 = vpop.permute.xlu0 %2625 }
 0x3c1   :  { %v2239_v59 = vpop.permute.xlu1 %2238  ;;  %2665 = vst.msk [vmem:[#allocation4 + $0x48] sm:$0xff] %vm2655_vm13, %v2626_v22 }
 0x3c2   :  { %2277 = vst.msk [vmem:[#allocation4 + $0x50] sm:$0xff] %vm2266_vm9, %v2239_v59 }
 0x3c4   :  { %v2049_v5 = vpop.permute.xlu0 %2048 }
 0x3c5   :  { %v2624_v43 = vpop.permute.xlu1 %2623  ;;  %2085 = vst.msk [vmem:[#allocation4 + $0x60] sm:$0xff] %vm2072_vm6, %v2049_v5 }
 0x3c6   :  { %2664 = vst.msk [vmem:[#allocation4 + $0x40] sm:$0xff] %vm2655_vm13, %v2624_v43 }
 0x3c8   :  { %v2433_v45 = vpop.permute.xlu0 %2432 }
 0x3c9   :  { %v2336_v55 = vpop.permute.xlu1 %2335 }
 0x3ca   :  { %2374 = vst.msk [vmem:[#allocation4 + $0x50] sm:$0xff] %vm2363_vm10, %v2336_v55 }
 0x3cb   :  { %2471 = vst.msk [vmem:[#allocation4 + $0x50] sm:$0xff] %vm2460_vm11, %v2433_v45 }
 0x3cc   :  { %v2051_v52 = vpop.permute.xlu0 %2050 }
 0x3cd   :  { %v2721_v46 = vpop.permute.xlu1 %2720  ;;  %2086 = vst.msk [vmem:[#allocation4 + $0x68] sm:$0xff] %vm2072_vm6, %v2051_v52 }
 0x3ce   :  { %2761 = vst.msk [vmem:[#allocation4 + $0x40] sm:$0xff] %vm2752_vm14, %v2721_v46 }
 0x3d0   :  { %v2435_v41 = vpop.permute.xlu0 %2434 }
 0x3d1   :  { %v2338_v23 = vpop.permute.xlu1 %2337 }
 0x3d2   :  { %2375 = vst.msk [vmem:[#allocation4 + $0x58] sm:$0xff] %vm2363_vm10, %v2338_v23 }
 0x3d3   :  { %2472 = vst.msk [vmem:[#allocation4 + $0x58] sm:$0xff] %vm2460_vm11, %v2435_v41 }
 0x3d4   :  { %v2148_v10 = vpop.permute.xlu0 %2147 }
 0x3d5   :  { %v2723_v26 = vpop.permute.xlu1 %2722  ;;  %v2777_v32 = vld [vmem:[#allocation4 + $0x40] sm:$0xff]  ;;  %2183 = vst.msk [vmem:[#allocation4 + $0x68] sm:$0xff] %vm2169_vm7, %v2148_v10 }
 0x3d6   :  { %2762 = vst.msk [vmem:[#allocation4 + $0x48] sm:$0xff] %vm2752_vm14, %v2723_v26  ;;  %4216 = vmatprep.mubr.msk.f32.mxu1 %vm2799_vm15, %v2777_v32 }
 0x3d8   :  { %v2533_v15 = vpop.permute.xlu0 %2532 }
 0x3d9   :  { %v2146_v53 = vpop.permute.xlu1 %2145  ;;  %2570 = vst.msk [vmem:[#allocation4 + $0x58] sm:$0xff] %vm2558_vm12, %v2533_v15 }
 0x3da   :  { %2182 = vst.msk [vmem:[#allocation4 + $0x60] sm:$0xff] %vm2169_vm7, %v2146_v53 }
 0x3dc   :  { %v2245_v19 = vpop.permute.xlu0 %2244 }
 0x3dd   :  { %v2531_v60 = vpop.permute.xlu1 %2530  ;;  %v2778_v27 = vld [vmem:[#allocation4 + $0x48] sm:$0xff]  ;;  %2280 = vst.msk [vmem:[#allocation4 + $0x68] sm:$0xff] %vm2266_vm9, %v2245_v19 }
 0x3de   :  { %2569 = vst.msk [vmem:[#allocation4 + $0x50] sm:$0xff] %vm2558_vm12, %v2531_v60  ;;  %4217 = vmatmul.mubr.msk.f32.gmra.mrb[26].mxu1 %vm2799_vm15, %v2778_v27 }
 0x3e0   :  { %v2630_v51 = vpop.permute.xlu0 %2629 }
 0x3e1   :  { %v2243_v57 = vpop.permute.xlu1 %2242  ;;  %2667 = vst.msk [vmem:[#allocation4 + $0x58] sm:$0xff] %vm2655_vm13, %v2630_v51 }
 0x3e2   :  { %2279 = vst.msk [vmem:[#allocation4 + $0x60] sm:$0xff] %vm2266_vm9, %v2243_v57 }
 0x3e4   :  { %v2053_v6 = vpop.permute.xlu0 %2052 }
 0x3e5   :  { %v2628_v33 = vpop.permute.xlu1 %2627  ;;  %2087 = vst.msk [vmem:[#allocation4 + $0x70] sm:$0xff] %vm2072_vm6, %v2053_v6 }
 0x3e6   :  { %2666 = vst.msk [vmem:[#allocation4 + $0x50] sm:$0xff] %vm2655_vm13, %v2628_v33 }
 0x3e8   :  { %v2437_v14 = vpop.permute.xlu0 %2436 }
 0x3e9   :  { %v2340_v48 = vpop.permute.xlu1 %2339 }
 0x3ea   :  { %2376 = vst.msk [vmem:[#allocation4 + $0x60] sm:$0xff] %vm2363_vm10, %v2340_v48 }
 0x3eb   :  { %2473 = vst.msk [vmem:[#allocation4 + $0x60] sm:$0xff] %vm2460_vm11, %v2437_v14 }
 0x3ec   :  { %v2055_v25 = vpop.permute.xlu0 %2054 }
 0x3ed   :  { %v2725_v16 = vpop.permute.xlu1 %2724  ;;  %2088 = vst.msk [vmem:[#allocation4 + $0x78] sm:$0xff] %vm2072_vm6, %v2055_v25  ;;  %vm3518_vm6 = vcmask 386304  }
 0x3ee   :  { %2763 = vst.msk [vmem:[#allocation4 + $0x50] sm:$0xff] %vm2752_vm14, %v2725_v16 }
 0x3f0   :  { %v2439_v18 = vpop.permute.xlu0 %2438 }
 0x3f1   :  { %v2342_v21 = vpop.permute.xlu1 %2341 }
 0x3f2   :  { %2377 = vst.msk [vmem:[#allocation4 + $0x68] sm:$0xff] %vm2363_vm10, %v2342_v21 }
 0x3f3   :  { %2474 = vst.msk [vmem:[#allocation4 + $0x68] sm:$0xff] %vm2460_vm11, %v2439_v18 }
 0x3f4   :  { %v2152_v34 = vpop.permute.xlu0 %2151 }
 0x3f5   :  { %v2727_v54 = vpop.permute.xlu1 %2726  ;;  %v2779_v2 = vld [vmem:[#allocation4 + $0x50] sm:$0xff]  ;;  %2185 = vst.msk [vmem:[#allocation4 + $0x78] sm:$0xff] %vm2169_vm7, %v2152_v34 }
 0x3f6   :  { %2764 = vst.msk [vmem:[#allocation4 + $0x58] sm:$0xff] %vm2752_vm14, %v2727_v54  ;;  %4219 = vmatprep.mubr.msk.f32.mxu1 %vm2799_vm15, %v2779_v2 }
 0x3f8   :  { %v2537_v47 = vpop.permute.xlu0 %2536 }
 0x3f9   :  { %v2150_v63 = vpop.permute.xlu1 %2149  ;;  %2572 = vst.msk [vmem:[#allocation4 + $0x68] sm:$0xff] %vm2558_vm12, %v2537_v47 }
 0x3fa   :  { %2184 = vst.msk [vmem:[#allocation4 + $0x70] sm:$0xff] %vm2169_vm7, %v2150_v63  ;;  %vm3532_vm7 = vcmask 518529  }
 0x3fc   :  { %v2249_v3 = vpop.permute.xlu0 %2248 }
 0x3fd   :  { %v2535_v1 = vpop.permute.xlu1 %2534  ;;  %v2780_v62 = vld [vmem:[#allocation4 + $0x58] sm:$0xff]  ;;  %2282 = vst.msk [vmem:[#allocation4 + $0x78] sm:$0xff] %vm2266_vm9, %v2249_v3 }
 0x3fe   :  { %2571 = vst.msk [vmem:[#allocation4 + $0x60] sm:$0xff] %vm2558_vm12, %v2535_v1  ;;  %4220 = vmatmul.mubr.msk.f32.gmra.mrb[28].mxu1 %vm2799_vm15, %v2780_v62 }
 0x400   :  { %v2634_v40 = vpop.permute.xlu0 %2633 }
 0x401   :  { %v2247_v20 = vpop.permute.xlu1 %2246  ;;  %2669 = vst.msk [vmem:[#allocation4 + $0x68] sm:$0xff] %vm2655_vm13, %v2634_v40 }
 0x402   :  { %2281 = vst.msk [vmem:[#allocation4 + $0x70] sm:$0xff] %vm2266_vm9, %v2247_v20  ;;  %vm3632_vm9 = vcmask 261120  }
 0x404   :  { %v2346_v28 = vpop.permute.xlu0 %2345 }
 0x405   :  { %v2632_v8 = vpop.permute.xlu1 %2631  ;;  %2379 = vst.msk [vmem:[#allocation4 + $0x78] sm:$0xff] %vm2363_vm10, %v2346_v28 }
 0x406   :  { %2668 = vst.msk [vmem:[#allocation4 + $0x60] sm:$0xff] %vm2655_vm13, %v2632_v8 }
 0x408   :  { %v2731_v11 = vpop.permute.xlu0 %2730 }
 0x409   :  { %v2344_v30 = vpop.permute.xlu1 %2343  ;;  %2766 = vst.msk [vmem:[#allocation4 + $0x68] sm:$0xff] %vm2752_vm14, %v2731_v11 }
 0x40a   :  { %2378 = vst.msk [vmem:[#allocation4 + $0x70] sm:$0xff] %vm2363_vm10, %v2344_v30  ;;  %vm3789_vm10 = vcmask 74752  }
 0x40c   :  { %v2539_v17 = vpop.permute.xlu0 %2538 }
 0x40d   :  { %v2729_v49 = vpop.permute.xlu1 %2728 }
 0x40e   :  { %2765 = vst.msk [vmem:[#allocation4 + $0x60] sm:$0xff] %vm2752_vm14, %v2729_v49 }
 0x410   :  { %v2636_v7 = vpop.permute.xlu0 %2635  ;;  %v2782_v4 = vld [vmem:[#allocation4 + $0x68] sm:$0xff] }
 0x411   :  { %v2441_v35 = vpop.permute.xlu1 %2440 }
 0x412   :  { %2475 = vst.msk [vmem:[#allocation4 + $0x70] sm:$0xff] %vm2460_vm11, %v2441_v35 }
 0x413   :  { %2573 = vst.msk [vmem:[#allocation4 + $0x70] sm:$0xff] %vm2558_vm12, %v2539_v17 }
 0x414   :  { %2670 = vst.msk [vmem:[#allocation4 + $0x70] sm:$0xff] %vm2655_vm13, %v2636_v7  ;;  %v2733_v39 = vpop.permute.xlu0 %2732 }
 0x415   :  { %v2443_v9 = vpop.permute.xlu1 %2442  ;;  %v2781_v24 = vld [vmem:[#allocation4 + $0x60] sm:$0xff]  ;;  %2767 = vst.msk [vmem:[#allocation4 + $0x70] sm:$0xff] %vm2752_vm14, %v2733_v39 }
 0x416   :  { %2476 = vst.msk [vmem:[#allocation4 + $0x78] sm:$0xff] %vm2460_vm11, %v2443_v9  ;;  %4222 = vmatprep.mubr.msk.f32.mxu1 %vm2799_vm15, %v2781_v24 }
 0x417   :  { %2574 = vst.msk [vmem:[#allocation4 + $0x78] sm:$0xff] %vm2558_vm12, %v7745_v61  ;;  %4223 = vmatmul.mubr.msk.f32.gmra.mrb[30].mxu1 %vm2799_vm15, %v2782_v4 }
 0x418   :  { %2671 = vst.msk [vmem:[#allocation4 + $0x78] sm:$0xff] %vm2655_vm13, %v7746_v12 }
 0x419   :  { %v2735_v50 = vpop.permute.xlu1 %2734 }
 0x41a   :  { %2768 = vst.msk [vmem:[#allocation4 + $0x78] sm:$0xff] %vm2752_vm14, %v2735_v50 }
 0x41c   :  { %v2783_v58 = vld [vmem:[#allocation4 + $0x70] sm:$0xff] }
 0x41d   :  { %4225 = vmatprep.mubr.msk.f32.mxu1 %vm2799_vm15, %v2783_v58 }
 0x421   :  { %v2784_v0 = vld [vmem:[#allocation4 + $0x78] sm:$0xff] }
 0x422   :  { %4226 = vmatmul.mubr.msk.f32.gmra.mrb[32].mxu1 %vm2799_vm15, %v2784_v0 }
 0x439   :  { %v4206_v38 = vpop.f32.mrb[18].mxu1 }
 0x43a   :  { %v6940_v42 = vadd.f32 %v4206_v38, %v6937_v13  ;;  %v2914_v37 = vpop.f32.mrb[19].mxu1 }
 0x43b   :  { %v6943_v36 = vadd.f32 %v6937_v13, %v2914_v37 }
 0x43c   :  { %v3013_v31 = vsel %vm3009_vm0, %v6940_v42, 0.0  ;;  %v3085_v44 = vmul.f32 %v6940_v42, %v6940_v42 }
 0x43d   :  { %3014 = vadd.xlane.f32.xlu1 %v3013_v31  ;;  %v3010_v56 = vsel %vm3009_vm0, %v6943_v36, 0.0  ;;  %v3084_v29 = vmul.f32 %v6943_v36, %v6943_v36 }
 0x43e   :  { %3011 = vadd.xlane.f32.xlu0 %v3010_v56  ;;  %v3103_v59 = vsel %vm3009_vm0, %v3085_v44, 0.0 }
 0x43f   :  { %v3100_v22 = vsel %vm3009_vm0, %v3084_v29, 0.0 }
 0x441   :  { %3104 = vadd.xlane.f32.xlu1 %v3103_v59 }
 0x442   :  { %3101 = vadd.xlane.f32.xlu0 %v3100_v22 }
 0x459   :  { %v4209_v43 = vpop.f32.mrb[20].mxu1 }
 0x45a   :  { %v6956_v5 = vadd.f32 %v4209_v43, %v6937_v13  ;;  %v2924_v55 = vpop.f32.mrb[21].mxu1 }
 0x45b   :  { %v6959_v45 = vadd.f32 %v6937_v13, %v2924_v55 }
 0x45c   :  { %v3019_v46 = vsel %vm3009_vm0, %v6956_v5, 0.0  ;;  %v3087_v23 = vmul.f32 %v6956_v5, %v6956_v5 }
 0x45d   :  { %3020 = vadd.xlane.f32.xlu0 %v3019_v46  ;;  %v3016_v52 = vsel %vm3009_vm0, %v6959_v45, 0.0  ;;  %v3086_v26 = vmul.f32 %v6959_v45, %v6959_v45 }
 0x45e   :  { %v3109_v41 = vsel %vm3009_vm0, %v3087_v23, 0.0 }
 0x45f   :  { %v3106_v10 = vsel %vm3009_vm0, %v3086_v26, 0.0 }
 0x461   :  { %3017 = vadd.xlane.f32.xlu0 %v3016_v52 }
 0x465   :  { %3110 = vadd.xlane.f32.xlu0 %v3109_v41 }
 0x469   :  { %3107 = vadd.xlane.f32.xlu0 %v3106_v10 }
 0x479   :  { %v4212_v32 = vpop.f32.mrb[22].mxu1 }
 0x47a   :  { %v6972_v53 = vadd.f32 %v4212_v32, %v6937_v13  ;;  %v2934_v15 = vpop.f32.mrb[23].mxu1 }
 0x47b   :  { %v6975_v60 = vadd.f32 %v6937_v13, %v2934_v15 }
 0x47c   :  { %v3025_v19 = vsel %vm3009_vm0, %v6972_v53, 0.0  ;;  %v3089_v57 = vmul.f32 %v6972_v53, %v6972_v53 }
 0x47d   :  { %3026 = vadd.xlane.f32.xlu0 %v3025_v19  ;;  %v3022_v27 = vsel %vm3009_vm0, %v6975_v60, 0.0  ;;  %v3088_v33 = vmul.f32 %v6975_v60, %v6975_v60 }
 0x47e   :  { %v3115_v51 = vsel %vm3009_vm0, %v3089_v57, 0.0 }
 0x47f   :  { %v3112_v16 = vsel %vm3009_vm0, %v3088_v33, 0.0 }
 0x481   :  { %3023 = vadd.xlane.f32.xlu0 %v3022_v27 }
 0x485   :  { %3116 = vadd.xlane.f32.xlu0 %v3115_v51 }
 0x486   :  { %v4215_v6 = vpop.f32.mrb[24].mxu1 }
 0x487   :  { %v2944_v48 = vpop.f32.mrb[25].mxu1  ;;  %v7008_v62 = vadd.f32 %v4215_v6, %v6937_v13 }
 0x488   :  { %v6987_v14 = vadd.f32 %v6937_v13, %v2944_v48 }
 0x489   :  { %3113 = vadd.xlane.f32.xlu0 %v3112_v16  ;;  %v3031_v40 = vsel %vm3009_vm0, %v7008_v62, 0.0  ;;  %v3091_v30 = vmul.f32 %v7008_v62, %v7008_v62 }
 0x48a   :  { %v3028_v25 = vsel %vm3009_vm0, %v6987_v14, 0.0  ;;  %v3090_v8 = vmul.f32 %v6987_v14, %v6987_v14 }
 0x48b   :  { %v3121_v11 = vsel %vm3009_vm0, %v3091_v30, 0.0 }
 0x48c   :  { %v3118_v28 = vsel %vm3009_vm0, %v3090_v8, 0.0 }
 0x48d   :  { %3029 = vadd.xlane.f32.xlu0 %v3028_v25 }
 0x4b1   :  { %v4218_v21 = vpop.f32.mrb[26].mxu1 }
 0x4b2   :  { %v6993_v18 = vadd.f32 %v4218_v21, %v6937_v13  ;;  %v2954_v54 = vpop.f32.mrb[27].mxu1 }
 0x4b3   :  { %v6996_v34 = vadd.f32 %v6937_v13, %v2954_v54 }
 0x4b4   :  { %v3037_v2 = vsel %vm3009_vm0, %v6993_v18, 0.0  ;;  %v3093_v63 = vmul.f32 %v6993_v18, %v6993_v18 }
 0x4b5   :  { %3038 = vadd.xlane.f32.xlu0 %v3037_v2  ;;  %v3034_v1 = vsel %vm3009_vm0, %v6996_v34, 0.0  ;;  %v3092_v3 = vmul.f32 %v6996_v34, %v6996_v34 }
 0x4b6   :  { %v3127_v47 = vsel %vm3009_vm0, %v3093_v63, 0.0 }
 0x4b7   :  { %3128 = vadd.xlane.f32.xlu1 %v3127_v47  ;;  %v3124_v20 = vsel %vm3009_vm0, %v3092_v3, 0.0 }
 0x4b9   :  { %3035 = vadd.xlane.f32.xlu0 %v3034_v1 }
 0x4bd   :  { %3125 = vadd.xlane.f32.xlu0 %v3124_v20 }
 0x4c1   :  { %3032 = vadd.xlane.f32.xlu0 %v3031_v40 }
 0x4c5   :  { %3119 = vadd.xlane.f32.xlu0 %v3118_v28 }
 0x4c9   :  { %3122 = vadd.xlane.f32.xlu0 %v3121_v11 }
 0x4ca   :  { %v3015_v25 = vpop.xlane.xlu1 %3014 }
 0x4cb   :  { %v3012_v32 = vpop.xlane.xlu0 %3011 }
 0x4cc   :  { %v3058_v54 = vadd.f32 %v3015_v25, %v3012_v32  ;;  %v3535_v32 = vld [vmem:[%s7338_s1 + $0x2e5] sm:$0xff] }
 0x4cd   :  { %v3539_v25 = vld [vmem:[%s7338_s1 + $0x305] sm:$0xff] }
 0x4ce   :  { %v3105_v47 = vpop.xlane.xlu1 %3104 }
 0x4d1   :  { %v4221_v49 = vpop.f32.mrb[28].mxu1 }
 0x4d2   :  { %v7020_v17 = vadd.f32 %v4221_v49, %v6937_v13  ;;  %v2964_v35 = vpop.f32.mrb[29].mxu1 }
 0x4d3   :  { %v7023_v7 = vadd.f32 %v6937_v13, %v2964_v35 }
 0x4d4   :  { %v3043_v9 = vsel %vm3009_vm0, %v7020_v17, 0.0  ;;  %v3095_v24 = vmul.f32 %v7020_v17, %v7020_v17 }
 0x4d5   :  { %3044 = vadd.xlane.f32.xlu1 %v3043_v9  ;;  %v3040_v39 = vsel %vm3009_vm0, %v7023_v7, 0.0  ;;  %v3094_v61 = vmul.f32 %v7023_v7, %v7023_v7 }
 0x4d6   :  { %v3133_v4 = vsel %vm3009_vm0, %v3095_v24, 0.0 }
 0x4d7   :  { %v3130_v12 = vsel %vm3009_vm0, %v3094_v61, 0.0 }
 0x4d9   :  { %3041 = vadd.xlane.f32.xlu1 %v3040_v39 }
 0x4dd   :  { %3134 = vadd.xlane.f32.xlu1 %v3133_v4 }
 0x4e1   :  { %3131 = vadd.xlane.f32.xlu1 %v3130_v12 }
 0x4ea   :  { %v4224_v50 = vpop.f32.mrb[30].mxu1 }
 0x4eb   :  { %v7036_v58 = vadd.f32 %v4224_v50, %v6937_v13  ;;  %v2974_v0 = vpop.f32.mrb[31].mxu1 }
 0x4ec   :  { %v7039_v38 = vadd.f32 %v6937_v13, %v2974_v0 }
 0x4ed   :  { %v3049_v37 = vsel %vm3009_vm0, %v7036_v58, 0.0  ;;  %v3097_v44 = vmul.f32 %v7036_v58, %v7036_v58 }
 0x4ee   :  { %3050 = vadd.xlane.f32.xlu1 %v3049_v37  ;;  %v3046_v31 = vsel %vm3009_vm0, %v7039_v38, 0.0  ;;  %v3096_v59 = vmul.f32 %v7039_v38, %v7039_v38 }
 0x4ef   :  { %v3139_v56 = vsel %vm3009_vm0, %v3097_v44, 0.0 }
 0x4f0   :  { %v3136_v55 = vsel %vm3009_vm0, %v3096_v59, 0.0 }
 0x4f2   :  { %3047 = vadd.xlane.f32.xlu1 %v3046_v31 }
 0x4f5   :  { %v4227_v29 = vpop.f32.mrb[32].mxu1 }
 0x4f6   :  { %3140 = vadd.xlane.f32.xlu1 %v3139_v56  ;;  %v2984_v22 = vpop.f32.mrb[33].mxu1  ;;  %v7051_v43 = vadd.f32 %v4227_v29, %v6937_v13 }
 0x4f7   :  { %v7057_v52 = vadd.f32 %v6937_v13, %v2984_v22  ;;  %v3102_v13 = vpop.xlane.xlu0 %3101 }
 0x4f8   :  { %v3055_v46 = vsel %vm3009_vm0, %v7051_v43, 0.0  ;;  %v3099_v10 = vmul.f32 %v7051_v43, %v7051_v43  ;;  %v3148_v20 = vadd.f32 %v3105_v47, %v3102_v13  ;;  %v3537_v13 = vld [vmem:[%s7338_s1 + $0x2f5] sm:$0xff] }
 0x4f9   :  { %v3052_v23 = vsel %vm3009_vm0, %v7057_v52, 0.0  ;;  %v3098_v41 = vmul.f32 %v7057_v52, %v7057_v52 }
 0x4fa   :  { %3137 = vadd.xlane.f32.xlu1 %v3136_v55  ;;  %v3145_v15 = vsel %vm3009_vm0, %v3099_v10, 0.0 }
 0x4fb   :  { %v3142_v26 = vsel %vm3009_vm0, %v3098_v41, 0.0  ;;  %v3021_v19 = vpop.xlane.xlu0 %3020 }
 0x4fe   :  { %3056 = vadd.xlane.f32.xlu1 %v3055_v46 }
 0x4ff   :  { %v3018_v27 = vpop.xlane.xlu0 %3017 }
 0x500   :  { %v3059_v2 = vadd.f32 %v3058_v54, %v3018_v27 }
 0x502   :  { %3053 = vadd.xlane.f32.xlu1 %v3052_v23  ;;  %v3060_v1 = vadd.f32 %v3059_v2, %v3021_v19 }
 0x503   :  { %v3111_v57 = vpop.xlane.xlu0 %3110 }
 0x506   :  { %3143 = vadd.xlane.f32.xlu1 %v3142_v26 }
 0x507   :  { %v3108_v51 = vpop.xlane.xlu0 %3107 }
 0x508   :  { %v3149_v28 = vadd.f32 %v3148_v20, %v3108_v51 }
 0x50a   :  { %3146 = vadd.xlane.f32.xlu1 %v3145_v15  ;;  %v3150_v49 = vadd.f32 %v3149_v28, %v3111_v57  ;;  %v3536_v15 = vld [vmem:[%s7338_s1 + $0x2ed] sm:$0xff]  ;;  %v4378_v57 = vmov 0.0|0.0  }
 0x50b   :  { %v3027_v33 = vpop.xlane.xlu0 %3026  ;;  %4295 = vmatprep.subr.bf16.mxu1 %v4378_v57  ;;  %v4296_v51 = vpack.c.bf16 %v3536_v15, %v3535_v32  ;;  %v7181_v32 = vld [vmem:[%s7338_s1 + $0x2ad] sm:$0xff]  ;;  %v7186_v15 = vld [vmem:[%s7338_s1 + $0x2b5] sm:$0xff] }
 0x50d   :  { %4297 = vmatpush3.bf16.msra.mxu1 %v4296_v51 }
 0x50e   :  { %4298 = vmatprep.subr.bf16.mxu1 %v4378_v57 }
 0x50f   :  { %v3024_v6 = vpop.xlane.xlu0 %3023 }
 0x510   :  { %v3061_v40 = vadd.f32 %v3060_v1, %v3024_v6 }
 0x512   :  { %v3062_v11 = vadd.f32 %v3061_v40, %v3027_v33  ;;  %v3538_v33 = vld [vmem:[%s7338_s1 + $0x2fd] sm:$0xff] }
 0x513   :  { %v3117_v48 = vpop.xlane.xlu0 %3116 }
 0x517   :  { %v3114_v16 = vpop.xlane.xlu0 %3113 }
 0x518   :  { %v3151_v39 = vadd.f32 %v3150_v49, %v3114_v16  ;;  %v4299_v16 = vpack.c.bf16 %v3538_v33, %v3537_v13  ;;  %v7113_v49 = vld [vmem:[%s7338_s1 + $0x28d] sm:$0xff]  ;;  %v7191_v13 = vld [vmem:[%s7338_s1 + $0x2bd] sm:$0xff] }
 0x51a   :  { %v3152_v50 = vadd.f32 %v3151_v39, %v3117_v48  ;;  %4300 = vmatpush3.bf16.msra.mxu1 %v4299_v16 }
 0x51b   :  { %v3030_v21 = vpop.xlane.xlu0 %3029  ;;  %4301 = vmatprep.subr.bf16.mxu1 %v4378_v57 }
 0x51c   :  { %v3063_v35 = vadd.f32 %v3062_v11, %v3030_v21  ;;  %v3540_v21 = vld [vmem:[%s7338_s1 + $0x30d] sm:$0xff] }
 0x51d   :  { %v4302_v47 = vpack.c.bf16 %v3540_v21, %v3539_v25 }
 0x51f   :  { %4303 = vmatpush3.bf16.msra.mxu1 %v4302_v47 }
 0x520   :  { %4304 = vmatprep.subr.bf16.mxu1 %v4378_v57 }
 0x542   :  { %v3039_v63 = vpop.xlane.xlu0 %3038 }
 0x544   :  { %v7071_v23 = vpop.xlane.xlu1 %3128 }
 0x546   :  { %v3036_v3 = vpop.xlane.xlu0 %3035 }
 0x547   :  { %v7067_v8 = vadd.f32 %v3039_v63, %v3036_v3  ;;  %v7104_v3 = vld [vmem:[%s7338_s1 + $0x285] sm:$0xff] }
 0x54a   :  { %v7069_v30 = vpop.xlane.xlu0 %3125 }
 0x54e   :  { %v3033_v9 = vpop.xlane.xlu0 %3032 }
 0x54f   :  { %v3064_v24 = vadd.f32 %v3063_v35, %v3033_v9  ;;  %v7118_v35 = vld [vmem:[%s7338_s1 + $0x295] sm:$0xff] }
 0x551   :  { %v3065_v4 = vrot.slane %v3064_v24, 4 }
 0x552   :  { %v3120_v61 = vpop.xlane.xlu0 %3119 }
 0x553   :  { %v3066_v12 = vadd.f32 %v3065_v4, %v3064_v24  ;;  %v3153_v37 = vadd.f32 %v3152_v50, %v3120_v61  ;;  %v7132_v4 = vld [vmem:[%s7338_s1 + $0x2c5] sm:$0xff] }
 0x554   :  { %v7137_v61 = vld [vmem:[%s7338_s1 + $0x265] sm:$0xff] }
 0x555   :  { %v3067_v0 = vrot.slane %v3066_v12, 2 }
 0x556   :  { %v3123_v31 = vpop.xlane.xlu0 %3122 }
 0x557   :  { %v3068_v44 = vadd.f32 %v3067_v0, %v3066_v12  ;;  %v3154_v56 = vadd.f32 %v3153_v37, %v3123_v31  ;;  %v7152_v0 = vld [vmem:[%s7338_s1 + $0x275] sm:$0xff]  ;;  %v7157_v37 = vld [vmem:[%s7338_s1 + $0x27d] sm:$0xff] }
 0x558   :  { %v7162_v31 = vld [vmem:[%s7338_s1 + $0x2d5] sm:$0xff] }
 0x559   :  { %v3155_v29 = vrot.slane %v3154_v56, 4  ;;  %v3069_v59 = vrot.slane %v3068_v44, 1 }
 0x55b   :  { %v3156_v22 = vadd.f32 %v3155_v29, %v3154_v56  ;;  %v3070_v46 = vadd.f32 %v3069_v59, %v3068_v44  ;;  %v7167_v44 = vld [vmem:[%s7338_s1 + $0x2dd] sm:$0xff]  ;;  %v7172_v56 = vld [vmem:[%s7338_s1 + $0x2a5] sm:$0xff] }
 0x55d   :  { %v3157_v55 = vrot.slane %v3156_v22, 2  ;;  %v3175_v26 = vmul.f32 0.0009765625, %v3070_v46 }
 0x55f   :  { %v3158_v41 = vadd.f32 %v3157_v55, %v3156_v22  ;;  %v3179_v6 = vmul.f32 %v3175_v26, %v3175_v26  ;;  %v3187_v20 = vsub.f32 %v6975_v60, %v3175_v26  ;;  %v3188_v40 = vsub.f32 %v6972_v53, %v3175_v26  ;;  %v7123_v60 = vld [vmem:[%s7338_s1 + $0x29d] sm:$0xff] }
 0x560   :  { %v3189_v28 = vsub.f32 %v6987_v14, %v3175_v26  ;;  %v3190_v11 = vsub.f32 %v7008_v62, %v3175_v26  ;;  %v3183_v14 = vsub.f32 %v6943_v36, %v3175_v26  ;;  %v3184_v62 = vsub.f32 %v6940_v42, %v3175_v26  ;;  %v7142_v36 = vld [vmem:[%s7338_s1 + $0x26d] sm:$0xff] }
 0x561   :  { %v3159_v10 = vrot.slane %v3158_v41, 1  ;;  %v3185_v9 = vsub.f32 %v6959_v45, %v3175_v26  ;;  %v3186_v39 = vsub.f32 %v6956_v5, %v3175_v26  ;;  %v7147_v42 = vld [vmem:[%s7338_s1 + $0x2cd] sm:$0xff] }
 0x562   :  { %v7082_v27 = vpop.xlane.xlu1 %3044 }
 0x563   :  { %v3160_v19 = vadd.f32 %v3159_v10, %v3158_v41 }
 0x565   :  { %v3177_v48 = vmul.f32 0.0009765625, %v3160_v19 }
 0x566   :  { %v7095_v63 = vpop.xlane.xlu1 %3041 }
 0x567   :  { %v3181_v54 = vsub.f32 %v3177_v48, %v3179_v6 }
 0x569   :  { %v3199_v2 = vadd.f32 1e-05, %v3181_v54 }
 0x56a   :  { %v7099_v1 = vpop.xlane.xlu1 %3134 }
 0x56b   :  { %4340 = vrsqrt.f32 %v3199_v2 }
 0x56e   :  { %v3132_v24 = vpop.xlane.xlu1 %3131 }
 0x575   :  { %v4341_v53 = vpop.eup %4340 }
 0x576   :  { %v3207_v5 = vmul.f32 %v4341_v53, %v3187_v20  ;;  %v3208_v45 = vmul.f32 %v4341_v53, %v3188_v40  ;;  %v3209_v12 = vmul.f32 %v4341_v53, %v3189_v28  ;;  %v3210_v50 = vmul.f32 %v4341_v53, %v3190_v11 }
 0x577   :  { %v3203_v29 = vmul.f32 %v4341_v53, %v3183_v14  ;;  %v3204_v59 = vmul.f32 %v4341_v53, %v3184_v62  ;;  %v3205_v22 = vmul.f32 %v4341_v53, %v3185_v9  ;;  %v3206_v55 = vmul.f32 %v4341_v53, %v3186_v39 }
 0x578   :  { %v3223_v46 = vmul.f32 %v3207_v5, %v7104_v3  ;;  %v3224_v41 = vmul.f32 %v3208_v45, %v7113_v49  ;;  %v3225_v26 = vmul.f32 %v3209_v12, %v7118_v35  ;;  %v3226_v10 = vmul.f32 %v3210_v50, %v7123_v60 }
 0x579   :  { %v3219_v51 = vmul.f32 %v3203_v29, %v7137_v61  ;;  %v3220_v33 = vmul.f32 %v3204_v59, %v7142_v36  ;;  %v3221_v6 = vmul.f32 %v3205_v22, %v7152_v0  ;;  %v3222_v48 = vmul.f32 %v3206_v55, %v7157_v37 }
 0x57a   :  { %v3239_v16 = vadd.f32 %v3223_v46, %v7132_v4  ;;  %v3240_v25 = vadd.f32 %v3224_v41, %v7147_v42  ;;  %v3241_v21 = vadd.f32 %v3225_v26, %v7162_v31  ;;  %v3242_v54 = vadd.f32 %v3226_v10, %v7167_v44 }
 0x57b   :  { %v3051_v19 = vpop.xlane.xlu1 %3050  ;;  %v3235_v2 = vadd.f32 %v3219_v51, %v7172_v56  ;;  %v3236_v47 = vadd.f32 %v3220_v33, %v7181_v32  ;;  %v3237_v20 = vadd.f32 %v3221_v6, %v7186_v15  ;;  %v3238_v40 = vadd.f32 %v3222_v48, %v7191_v13 }
 0x57c   :  { %v3255_v28 = vmax.f32 %v3239_v16, 0.0  ;;  %v3256_v11 = vmax.f32 %v3240_v25, 0.0  ;;  %v3257_v53 = vmax.f32 %v3241_v21, 0.0  ;;  %v3258_v14 = vmax.f32 %v3242_v54, 0.0 }
 0x57d   :  { %v3251_v9 = vmax.f32 %v3235_v2, 0.0  ;;  %v3252_v39 = vmax.f32 %v3236_v47, 0.0  ;;  %v3253_v5 = vmax.f32 %v3237_v20, 0.0  ;;  %v3254_v45 = vmax.f32 %v3238_v40, 0.0 }
 0x57e   :  { %3271 = vst.msk [vmem:[#allocation5 + $0x20] sm:$0xff] %vm3009_vm0, %v3255_v28  ;;  %3272 = vst.msk [vmem:[#allocation5 + $0x28] sm:$0xff] %vm3009_vm0, %v3256_v11  ;;  %v3072_v50 = vadd.f32 %v7067_v8, %v7095_v63  ;;  %v3161_v59 = vadd.f32 %v7071_v23, %v7069_v30 }
 0x57f   :  { %v3048_v62 = vpop.xlane.xlu1 %3047  ;;  %3273 = vst.msk [vmem:[#allocation5 + $0x30] sm:$0xff] %vm3009_vm0, %v3257_v53  ;;  %3274 = vst.msk [vmem:[#allocation5 + $0x38] sm:$0xff] %vm3009_vm0, %v3258_v14 }
 0x580   :  { %3267 = vst.msk [vmem:[#allocation5] sm:$0xff] %vm3009_vm0, %v3251_v9  ;;  %3268 = vst.msk [vmem:[#allocation5 + $0x8] sm:$0xff] %vm3009_vm0, %v3252_v39  ;;  %v3073_v22 = vadd.f32 %v3072_v50, %v7082_v27  ;;  %v3162_v55 = vadd.f32 %v3161_v59, %v3132_v24 }
 0x581   :  { %3269 = vst.msk [vmem:[#allocation5 + $0x10] sm:$0xff] %vm3009_vm0, %v3253_v5  ;;  %3270 = vst.msk [vmem:[#allocation5 + $0x18] sm:$0xff] %vm3009_vm0, %v3254_v45 }
 0x582   :  { %v3074_v46 = vadd.f32 %v3073_v22, %v3048_v62  ;;  %v3163_v26 = vadd.f32 %v3162_v55, %v7099_v1 }
 0x583   :  { %v3141_v12 = vpop.xlane.xlu1 %3140 }
 0x584   :  { %v3075_v10 = vadd.f32 %v3074_v46, %v3051_v19 }
 0x585   :  { %v3285_v11 = vld [vmem:[#allocation5 + $0x20] ss:$4 sm:$0x3]  ;;  %v3293_v53 = vld [vmem:[#allocation5 + $0x21] ss:$4 sm:$0x3] }
 0x586   :  { %v3305_v14 = vld [vmem:[#allocation5 + $0x28] ss:$4 sm:$0x3]  ;;  %v3313_v62 = vld [vmem:[#allocation5 + $0x29] ss:$4 sm:$0x3]  ;;  %v3299_v59 = vmax.f32 %v3285_v11, %v3293_v53 }
 0x587   :  { %v3138_v29 = vpop.xlane.xlu1 %3137  ;;  %v3329_v39 = vld [vmem:[#allocation5 + $0x22] ss:$4 sm:$0x3]  ;;  %v3337_v5 = vld [vmem:[#allocation5 + $0x23] ss:$4 sm:$0x3]  ;;  %v3319_v55 = vmax.f32 %v3305_v14, %v3313_v62 }
 0x588   :  { %v3164_v33 = vadd.f32 %v3163_v26, %v3138_v29  ;;  %v3349_v45 = vld [vmem:[#allocation5 + $0x2a] ss:$4 sm:$0x3]  ;;  %v3343_v46 = vmax.f32 %v3329_v39, %v3337_v5  ;;  %v3373_v26 = vld [vmem:[#allocation5 + $0x30] ss:$4 sm:$0x3] }
 0x58a   :  { %v3165_v21 = vadd.f32 %v3164_v33, %v3141_v12  ;;  %v3357_v12 = vld [vmem:[#allocation5 + $0x2b] ss:$4 sm:$0x3]  ;;  %v3393_v33 = vld [vmem:[#allocation5 + $0x38] ss:$4 sm:$0x3] }
 0x58b   :  { %v3057_v41 = vpop.xlane.xlu1 %3056 }
 0x58f   :  { %v3054_v51 = vpop.xlane.xlu1 %3053 }
 0x590   :  { %v3076_v6 = vadd.f32 %v3075_v10, %v3054_v51  ;;  %v3381_v51 = vld [vmem:[#allocation5 + $0x31] ss:$4 sm:$0x3] }
 0x592   :  { %v3077_v48 = vadd.f32 %v3076_v6, %v3057_v41  ;;  %v3363_v41 = vmax.f32 %v3349_v45, %v3357_v12  ;;  %v3401_v6 = vld [vmem:[#allocation5 + $0x39] ss:$4 sm:$0x3] }
 0x593   :  { %v3144_v16 = vpop.xlane.xlu1 %3143 }
 0x594   :  { %v3078_v25 = vrot.slane %v3077_v48, 4  ;;  %v3166_v63 = vadd.f32 %v3165_v21, %v3144_v16  ;;  %v3367_v16 = vmax.f32 %v3343_v46, %v3363_v41  ;;  %v3407_v21 = vmax.f32 %v3393_v33, %v3401_v6  ;;  %v3311_v33 = vld [vmem:[#allocation5 + $0x9] ss:$4 sm:$0x3] }
 0x595   :  { %v3327_v6 = vld [vmem:[#allocation5 + $0x2] ss:$4 sm:$0x3] }
 0x596   :  { %v3079_v8 = vadd.f32 %v3078_v25, %v3077_v48  ;;  %v3323_v48 = vmax.f32 %v3299_v59, %v3319_v55  ;;  %v3387_v25 = vmax.f32 %v3373_v26, %v3381_v51 }
 0x597   :  { %v3147_v54 = vpop.xlane.xlu1 %3146 }
 0x598   :  { %v3080_v2 = vrot.slane %v3079_v8, 2  ;;  %v3167_v30 = vadd.f32 %v3166_v63, %v3147_v54  ;;  %v3425_v63 = vld [vmem:[#allocation5 + $0x33] ss:$4 sm:$0x3]  ;;  %v3459_v54 = vadd.f32 %v3367_v16, %v3323_v48 }
 0x599   :  { %v3335_v48 = vld [vmem:[#allocation5 + $0x3] ss:$4 sm:$0x3]  ;;  %v3347_v16 = vld [vmem:[#allocation5 + $0xa] ss:$4 sm:$0x3] }
 0x59a   :  { %v3081_v23 = vadd.f32 %v3080_v2, %v3079_v8  ;;  %v3168_v27 = vrot.slane %v3167_v30, 4  ;;  %v3417_v8 = vld [vmem:[#allocation5 + $0x32] ss:$4 sm:$0x3] }
 0x59b   :  { %v3437_v2 = vld [vmem:[#allocation5 + $0x3a] ss:$4 sm:$0x3] }
 0x59c   :  { %v3082_v24 = vrot.slane %v3081_v23, 1  ;;  %v3169_v47 = vadd.f32 %v3168_v27, %v3167_v30  ;;  %v3445_v30 = vld [vmem:[#allocation5 + $0x3b] ss:$4 sm:$0x3]  ;;  %v3431_v27 = vmax.f32 %v3417_v8, %v3425_v63 }
 0x59e   :  { %v3170_v20 = vrot.slane %v3169_v47, 2  ;;  %v3083_v40 = vadd.f32 %v3082_v24, %v3081_v23  ;;  %v3411_v23 = vmax.f32 %v3387_v25, %v3407_v21  ;;  %v3451_v24 = vmax.f32 %v3437_v2, %v3445_v30  ;;  %v3355_v25 = vld [vmem:[#allocation5 + $0xb] ss:$4 sm:$0x3] }
 0x5a0   :  { %v3171_v1 = vadd.f32 %v3170_v20, %v3169_v47  ;;  %v3176_v19 = vmul.f32 0.0009765625, %v3083_v40  ;;  %v3463_v47 = vadd.f32 %v3459_v54, %v3411_v23  ;;  %v3476_v20 = vlaneseq }
 0x5a2   :  { %v3172_v28 = vrot.slane %v3171_v1, 1  ;;  %v3180_v29 = vmul.f32 %v3176_v19, %v3176_v19  ;;  %v3195_v40 = vsub.f32 %v7039_v38, %v3176_v19  ;;  %v3198_v11 = vsub.f32 %v7051_v43, %v3176_v19 }
 0x5a3   :  { %v3191_v14 = vsub.f32 %v6996_v34, %v3176_v19  ;;  %v3192_v62 = vsub.f32 %v6993_v18, %v3176_v19  ;;  %v3194_v39 = vsub.f32 %v7020_v17, %v3176_v19 }
 0x5a4   :  { %v3173_v9 = vadd.f32 %v3172_v28, %v3171_v1  ;;  %v3196_v1 = vsub.f32 %v7036_v58, %v3176_v19  ;;  %v3197_v28 = vsub.f32 %v7057_v52, %v3176_v19 }
 0x5a6   :  { %v3178_v50 = vmul.f32 0.0009765625, %v3173_v9  ;;  %v3193_v9 = vsub.f32 %v7023_v7, %v3176_v19 }
 0x5a8   :  { %v3182_v22 = vsub.f32 %v3178_v50, %v3180_v29 }
 0x5aa   :  { %v3200_v10 = vadd.f32 1e-05, %v3182_v22 }
 0x5ac   :  { %4342 = vrsqrt.f32 %v3200_v10 }
 0x5b6   :  { %v4343_v53 = vpop.eup %4342 }
 0x5b7   :  { %v3215_v5 = vmul.f32 %v4343_v53, %v3195_v40  ;;  %v3216_v45 = vmul.f32 %v4343_v53, %v3196_v1  ;;  %v3217_v12 = vmul.f32 %v4343_v53, %v3197_v28  ;;  %v3218_v50 = vmul.f32 %v4343_v53, %v3198_v11 }
 0x5b8   :  { %v3211_v38 = vmul.f32 %v4343_v53, %v3191_v14  ;;  %v3212_v29 = vmul.f32 %v4343_v53, %v3192_v62  ;;  %v3213_v58 = vmul.f32 %v4343_v53, %v3193_v9  ;;  %v3214_v59 = vmul.f32 %v4343_v53, %v3194_v39  ;;  %v3371_v53 = vld [vmem:[#allocation5 + $0x10] ss:$4 sm:$0x3]  ;;  %v3379_v14 = vld [vmem:[#allocation5 + $0x11] ss:$4 sm:$0x3] }
 0x5b9   :  { %v3231_v52 = vmul.f32 %v3215_v5, %v7104_v3  ;;  %v3232_v43 = vmul.f32 %v3216_v45, %v7113_v49  ;;  %v3233_v34 = vmul.f32 %v3217_v12, %v7118_v35  ;;  %v3234_v18 = vmul.f32 %v3218_v50, %v7123_v60  ;;  %v3391_v62 = vld [vmem:[#allocation5 + $0x18] ss:$4 sm:$0x3]  ;;  %v3399_v9 = vld [vmem:[#allocation5 + $0x19] ss:$4 sm:$0x3] }
 0x5ba   :  { %v3227_v7 = vmul.f32 %v3211_v38, %v7137_v61  ;;  %v3228_v17 = vmul.f32 %v3212_v29, %v7142_v36  ;;  %v3229_v19 = vmul.f32 %v3213_v58, %v7152_v0  ;;  %v3230_v22 = vmul.f32 %v3214_v59, %v7157_v37 }
 0x5bb   :  { %v3247_v55 = vadd.f32 %v3231_v52, %v7132_v4  ;;  %v3248_v46 = vadd.f32 %v3232_v43, %v7147_v42  ;;  %v3249_v3 = vadd.f32 %v3233_v34, %v7162_v31  ;;  %v3250_v49 = vadd.f32 %v3234_v18, %v7167_v44 }
 0x5bc   :  { %v3243_v35 = vadd.f32 %v3227_v7, %v7172_v56  ;;  %v3244_v60 = vadd.f32 %v3228_v17, %v7181_v32  ;;  %v3245_v61 = vadd.f32 %v3229_v19, %v7186_v15  ;;  %v3246_v36 = vadd.f32 %v3230_v22, %v7191_v13  ;;  %v3283_v32 = vld [vmem:[#allocation5] ss:$4 sm:$0x3]  ;;  %v3291_v15 = vld [vmem:[#allocation5 + $0x1] ss:$4 sm:$0x3] }
 0x5bd   :  { %v3263_v41 = vmax.f32 %v3247_v55, 0.0  ;;  %v3264_v0 = vmax.f32 %v3248_v46, 0.0  ;;  %v3265_v26 = vmax.f32 %v3249_v3, 0.0  ;;  %v3266_v37 = vmax.f32 %v3250_v49, 0.0 }
 0x5be   :  { %v3259_v10 = vmax.f32 %v3243_v35, 0.0  ;;  %v3260_v4 = vmax.f32 %v3244_v60, 0.0  ;;  %v3261_v51 = vmax.f32 %v3245_v61, 0.0  ;;  %v3262_v42 = vmax.f32 %v3246_v36, 0.0 }
 0x5bf   :  { %3279 = vst.msk [vmem:[#allocation5 + $0x60] sm:$0xff] %vm3009_vm0, %v3263_v41  ;;  %3280 = vst.msk [vmem:[#allocation5 + $0x68] sm:$0xff] %vm3009_vm0, %v3264_v0  ;;  %v3455_v31 = vmax.f32 %v3431_v27, %v3451_v24  ;;  %v3477_v44 = vshrl.u32 %v3476_v20, 7  ;;  %v3303_v13 = vld [vmem:[#allocation5 + $0x8] ss:$4 sm:$0x3]  ;;  %v3298_v30 = vmax.f32 %v3283_v32, %v3291_v15  ;;  %v3342_v20 = vmax.f32 %v3327_v6, %v3335_v48 }
 0x5c0   :  { %3281 = vst.msk [vmem:[#allocation5 + $0x70] sm:$0xff] %vm3009_vm0, %v3265_v26  ;;  %3282 = vst.msk [vmem:[#allocation5 + $0x78] sm:$0xff] %vm3009_vm0, %v3266_v37  ;;  %v3362_v40 = vmax.f32 %v3347_v16, %v3355_v25  ;;  %v3415_v22 = vld [vmem:[#allocation5 + $0x12] ss:$4 sm:$0x3]  ;;  %v3386_v61 = vmax.f32 %v3371_v53, %v3379_v14  ;;  %v3406_v36 = vmax.f32 %v3391_v62, %v3399_v9 }
 0x5c1   :  { %3275 = vst.msk [vmem:[#allocation5 + $0x40] sm:$0xff] %vm3009_vm0, %v3259_v10  ;;  %3276 = vst.msk [vmem:[#allocation5 + $0x48] sm:$0xff] %vm3009_vm0, %v3260_v4  ;;  %v3467_v56 = vadd.f32 %v3463_v47, %v3455_v31  ;;  %v7253_v8 = vsub.s32 0, %v3477_v44  ;;  %v7255_v63 = vsub.s32 1, %v3477_v44  ;;  %v3318_v47 = vmax.f32 %v3303_v13, %v3311_v33 }
 0x5c2   :  { %3277 = vst.msk [vmem:[#allocation5 + $0x50] sm:$0xff] %vm3009_vm0, %v3261_v51  ;;  %3278 = vst.msk [vmem:[#allocation5 + $0x58] sm:$0xff] %vm3009_vm0, %v3262_v42  ;;  %v3366_v34 = vmax.f32 %v3342_v20, %v3362_v40  ;;  %v3423_v55 = vld [vmem:[#allocation5 + $0x13] ss:$4 sm:$0x3]  ;;  %v3410_v16 = vmax.f32 %v3386_v61, %v3406_v36 }
 0x5c3   :  { %v7251_v21 = vmul.f32 0.25, %v3467_v56  ;;  %v3322_v43 = vmax.f32 %v3298_v30, %v3318_v47  ;;  %v3435_v46 = vld [vmem:[#allocation5 + $0x1a] ss:$4 sm:$0x3]  ;;  %v3430_v25 = vmax.f32 %v3415_v22, %v3423_v55  ;;  %v7747_v22 = vmov 0.0  }
 0x5c4   :  { %v3443_v3 = vld [vmem:[#allocation5 + $0x1b] ss:$4 sm:$0x3]  ;;  %4244 = vmatprep.mubr.msk.f32.mxu1 %vm4379_vm3, %v7747_v22 }
 0x5c5   :  { %v3458_v31 = vadd.f32 %v3366_v34, %v3322_v43  ;;  %v3509_v62 = vrot.slane %v7251_v21, %v7253_v8  ;;  %v3541_v43 = vld [vmem:[%s7338_s1 + $0x315] sm:$0xff]  ;;  %v3542_v34 = vld [vmem:[%s7338_s1 + $0x31d] sm:$0xff]  ;;  %v3523_v55 = vrot.slane %v7251_v21, %v7255_v63 }
 0x5c6   :  { %v3289_v54 = vld [vmem:[#allocation5 + $0x60] ss:$4 sm:$0x3]  ;;  %v3297_v2 = vld [vmem:[#allocation5 + $0x61] ss:$4 sm:$0x3] }
 0x5c7   :  { %v3301_v23 = vmax.f32 %v3289_v54, %v3297_v2  ;;  %v3309_v27 = vld [vmem:[#allocation5 + $0x68] ss:$4 sm:$0x3]  ;;  %v3317_v24 = vld [vmem:[#allocation5 + $0x69] ss:$4 sm:$0x3]  ;;  %v3450_v54 = vmax.f32 %v3435_v46, %v3443_v3 }
 0x5c8   :  { %v3321_v1 = vmax.f32 %v3309_v27, %v3317_v24  ;;  %v3333_v28 = vld [vmem:[#allocation5 + $0x62] ss:$4 sm:$0x3]  ;;  %v3341_v11 = vld [vmem:[#allocation5 + $0x63] ss:$4 sm:$0x3] }
 0x5c9   :  { %v3345_v39 = vmax.f32 %v3333_v28, %v3341_v11  ;;  %v3353_v5 = vld [vmem:[#allocation5 + $0x6a] ss:$4 sm:$0x3]  ;;  %v3361_v45 = vld [vmem:[#allocation5 + $0x6b] ss:$4 sm:$0x3] }
 0x5ca   :  { %v3325_v12 = vmax.f32 %v3301_v23, %v3321_v1  ;;  %v3365_v50 = vmax.f32 %v3353_v5, %v3361_v45  ;;  %v3377_v38 = vld [vmem:[#allocation5 + $0x70] ss:$4 sm:$0x3]  ;;  %v3385_v29 = vld [vmem:[#allocation5 + $0x71] ss:$4 sm:$0x3]  ;;  %v3462_v1 = vadd.f32 %v3458_v31, %v3410_v16  ;;  %v3454_v5 = vmax.f32 %v3430_v25, %v3450_v54 }
 0x5cb   :  { %v3389_v58 = vmax.f32 %v3377_v38, %v3385_v29  ;;  %v3397_v59 = vld [vmem:[#allocation5 + $0x78] ss:$4 sm:$0x3]  ;;  %v3405_v52 = vld [vmem:[#allocation5 + $0x79] ss:$4 sm:$0x3] }
 0x5cc   :  { %v3369_v18 = vmax.f32 %v3345_v39, %v3365_v50  ;;  %v3409_v7 = vmax.f32 %v3397_v59, %v3405_v52  ;;  %v3421_v17 = vld [vmem:[#allocation5 + $0x72] ss:$4 sm:$0x3]  ;;  %v3429_v19 = vld [vmem:[#allocation5 + $0x73] ss:$4 sm:$0x3]  ;;  %v3466_v59 = vadd.f32 %v3462_v1, %v3454_v5 }
 0x5cd   :  { %v3433_v49 = vmax.f32 %v3421_v17, %v3429_v19  ;;  %v3441_v35 = vld [vmem:[#allocation5 + $0x7a] ss:$4 sm:$0x3]  ;;  %v3449_v60 = vld [vmem:[#allocation5 + $0x7b] ss:$4 sm:$0x3]  ;;  %v4305_v17 = vpack.c.bf16 %v3542_v34, %v3541_v43 }
 0x5ce   :  { %v3413_v41 = vmax.f32 %v3389_v58, %v3409_v7  ;;  %v3453_v0 = vmax.f32 %v3441_v35, %v3449_v60  ;;  %v3461_v26 = vadd.f32 %v3369_v18, %v3325_v12  ;;  %v3287_v37 = vld [vmem:[#allocation5 + $0x40] ss:$4 sm:$0x3]  ;;  %v3295_v10 = vld [vmem:[#allocation5 + $0x41] ss:$4 sm:$0x3] }
 0x5cf   :  { %v3300_v4 = vmax.f32 %v3287_v37, %v3295_v10  ;;  %v3307_v51 = vld [vmem:[#allocation5 + $0x48] ss:$4 sm:$0x3]  ;;  %v3315_v42 = vld [vmem:[#allocation5 + $0x49] ss:$4 sm:$0x3]  ;;  %4306 = vmatpush3.bf16.msra.mxu1 %v4305_v17 }
 0x5d0   :  { %v3457_v44 = vmax.f32 %v3433_v49, %v3453_v0  ;;  %v3465_v56 = vadd.f32 %v3461_v26, %v3413_v41  ;;  %v3320_v32 = vmax.f32 %v3307_v51, %v3315_v42  ;;  %v3331_v15 = vld [vmem:[#allocation5 + $0x42] ss:$4 sm:$0x3]  ;;  %v3339_v13 = vld [vmem:[#allocation5 + $0x43] ss:$4 sm:$0x3]  ;;  %4307 = vmatprep.subr.bf16.mxu1 %v4378_v57 }
 0x5d1   :  { %v3344_v33 = vmax.f32 %v3331_v15, %v3339_v13  ;;  %v3351_v6 = vld [vmem:[#allocation5 + $0x4a] ss:$4 sm:$0x3]  ;;  %v3359_v48 = vld [vmem:[#allocation5 + $0x4b] ss:$4 sm:$0x3] }
 0x5d2   :  { %v3469_v2 = vadd.f32 %v3465_v56, %v3457_v44  ;;  %v3324_v30 = vmax.f32 %v3300_v4, %v3320_v32  ;;  %v3364_v23 = vmax.f32 %v3351_v6, %v3359_v48  ;;  %v3375_v27 = vld [vmem:[#allocation5 + $0x50] ss:$4 sm:$0x3]  ;;  %v3383_v24 = vld [vmem:[#allocation5 + $0x51] ss:$4 sm:$0x3] }
 0x5d3   :  { %v3388_v47 = vmax.f32 %v3375_v27, %v3383_v24  ;;  %v3395_v20 = vld [vmem:[#allocation5 + $0x58] ss:$4 sm:$0x3]  ;;  %v3403_v40 = vld [vmem:[#allocation5 + $0x59] ss:$4 sm:$0x3] }
 0x5d4   :  { %v3473_v28 = vmul.f32 0.25, %v3469_v2  ;;  %v3368_v11 = vmax.f32 %v3344_v33, %v3364_v23  ;;  %v3408_v53 = vmax.f32 %v3395_v20, %v3403_v40  ;;  %v3419_v14 = vld [vmem:[#allocation5 + $0x52] ss:$4 sm:$0x3]  ;;  %v3470_v3 = vmul.f32 0.25, %v3466_v59  ;;  %v3626_v31 = vld [vmem:[%s7338_s1 + $0x33e] sm:$0xff] }
 0x5d5   :  { %v3427_v9 = vld [vmem:[#allocation5 + $0x53] ss:$4 sm:$0x3]  ;;  %v3439_v39 = vld [vmem:[#allocation5 + $0x5a] ss:$4 sm:$0x3] }
 0x5d6   :  { %v3513_v45 = vrot.slane %v3473_v28, %v7253_v8  ;;  %v3412_v12 = vmax.f32 %v3388_v47, %v3408_v53  ;;  %v3432_v50 = vmax.f32 %v3419_v14, %v3427_v9  ;;  %v3447_v38 = vld [vmem:[#allocation5 + $0x5b] ss:$4 sm:$0x3]  ;;  %v3460_v29 = vadd.f32 %v3368_v11, %v3324_v30  ;;  %v3964_v56 = vld [vmem:[%s7338_s1 + $0x325] ss:$0 sm:$0xff]  ;;  %v3707_v32 = vld [vmem:[%s7338_s1 + $0x347] sm:$0xff] }
 0x5d7   :  { %v3452_v58 = vmax.f32 %v3439_v39, %v3447_v38  ;;  %v3527_v52 = vrot.slane %v3473_v28, %v7255_v63  ;;  %v3492_v60 = vrot.slane %v3470_v3, %v7255_v63  ;;  %v3479_v41 = vrot.slane %v3470_v3, %v7253_v8  ;;  %v3625_v42 = vld [vmem:[%s7338_s1 + $0x336] sm:$0xff]  ;;  %v3710_v54 = vld [vmem:[%s7338_s1 + $0x35f] sm:$0xff] }
 0x5d8   :  { %v3514_v18 = vsel %vm3484_vm1, %v3513_v45, %v3509_v62  ;;  %v3464_v7 = vadd.f32 %v3460_v29, %v3412_v12  ;;  %v4311_v44 = vpack.c.bf16 %v3626_v31, %v3625_v42  ;;  %v3708_v15 = vld [vmem:[%s7338_s1 + $0x34f] sm:$0xff]  ;;  %v3709_v25 = vld [vmem:[%s7338_s1 + $0x357] sm:$0xff]  ;;  %v3966_v30 = vld [vmem:[%s7338_s1 + $0x346] ss:$0 sm:$0xff] }
 0x5d9   :  { %3515 = vrot.lane.b32.xlu1 %v3514_v18, %s4376_s10  ;;  %v3456_v19 = vmax.f32 %v3432_v50, %v3452_v58  ;;  %v3528_v49 = vsel %vm3497_vm2, %v3527_v52, %v3523_v55  ;;  %v4314_v48 = vpack.c.bf16 %v3708_v15, %v3707_v32  ;;  %v4317_v2 = vpack.c.bf16 %v3710_v54, %v3709_v25 }
 0x5db   :  { %v3468_v46 = vadd.f32 %v3464_v7, %v3456_v19 }
 0x5dd   :  { %v3472_v35 = vmul.f32 0.25, %v3468_v46  ;;  %3529 = vrot.lane.b32.xlu1 %v3528_v49, %s4373_s16 }
 0x5df   :  { %v3496_v61 = vrot.slane %v3472_v35, %v7255_v63  ;;  %v3483_v36 = vrot.slane %v3472_v35, %v7253_v8  ;;  %v3623_v8 = vld [vmem:[%s7338_s1 + $0x326] sm:$0xff]  ;;  %v3624_v63 = vld [vmem:[%s7338_s1 + $0x32e] sm:$0xff] }
 0x5e0   :  { %v4308_v4 = vpack.c.bf16 %v3624_v63, %v3623_v8 }
 0x5e1   :  { %v3498_v21 = vsel %vm3497_vm2, %v3496_v61, %v3492_v60  ;;  %v3485_v0 = vsel %vm3484_vm1, %v3483_v36, %v3479_v41 }
 0x5e2   :  { %3499 = vrot.lane.b32.xlu0 %v3498_v21, %s4370_s17  ;;  %3488 = vst.msk [vmem:[#allocation6] sm:$0x3] %vm3487_vm4, %v3485_v0 }
 0x64b   :  { %v3516_v26 = vpop.permute.xlu1 %3515 }
 0x64f   :  { %v3530_v10 = vpop.permute.xlu1 %3529 }
 0x654   :  { %v3500_v37 = vpop.permute.xlu0 %3499 }
 0x655   :  { %3503 = vst.msk [vmem:[#allocation6 - $0x1] sm:$0x6] %vm3502_vm5, %v3500_v37 }
 0x656   :  { %3519 = vst.msk [vmem:[#allocation6] sm:$0x3] %vm3518_vm6, %v3516_v26 }
 0x657   :  { %3533 = vst.msk [vmem:[#allocation6 - $0x1] sm:$0x6] %vm3532_vm7, %v3530_v10 }
 0x65e   :  { %v3534_v51 = vld [vmem:[#allocation6] sm:$0x3] }
 0x65f   :  { %4245 = vmatmul.mubr.msk.f32.vlgmr.msra.gmra.mrb[34].mxu1 %vm3548_vm8, %v3534_v51 }
 0x660   :  { %4309 = vmatpush3.bf16.msra.mxu1 %v4308_v4  ;;  %4255 = vmatprep.mubr.msk.f32.mxu1 %vm4379_vm3, %v7747_v22 }
 0x661   :  { %4310 = vmatprep.subr.bf16.mxu1 %v4378_v57 }
 0x664   :  { %4312 = vmatpush3.bf16.msra.mxu1 %v4311_v44 }
 0x665   :  { %4313 = vmatprep.subr.bf16.mxu1 %v4378_v57 }
 0x732   :  { %v3618_v13 = vpop.f32.mrb[34].mxu1 }
 0x733   :  { %v3619_v33 = vadd.f32 %v3964_v56, %v3618_v13  ;;  %v4246_v6 = vpop.f32.mrb[35].mxu1 }
 0x735   :  { %v3622_v16 = vmax.f32 %v3619_v33, 0.0 }
 0x737   :  { %4256 = vmatmul.mubr.msk.f32.vlgmr.msra.gmra.mrb[36].mxu1 %vm3632_vm9, %v3622_v16 }
 0x738   :  { %4315 = vmatpush3.bf16.msra.mxu1 %v4314_v48  ;;  %4266 = vmatprep.mubr.msk.f32.mxu1 %vm4379_vm3, %v7747_v22 }
 0x739   :  { %4316 = vmatprep.subr.bf16.mxu1 %v4378_v57  ;;  %v3968_v57 = vld [vmem:[%s7338_s1 + $0x367] ss:$0 sm:$0xff] }
 0x73c   :  { %4318 = vmatpush3.bf16.msra.mxu1 %v4317_v2 }
 0x80a   :  { %v3702_v23 = vpop.f32.mrb[36].mxu1 }
 0x80b   :  { %v3703_v27 = vadd.f32 %v3966_v30, %v3702_v23  ;;  %v4257_v24 = vpop.f32.mrb[37].mxu1 }
 0x80d   :  { %v3706_v47 = vmax.f32 %v3703_v27, 0.0 }
 0x80f   :  { %4267 = vmatmul.mubr.msk.f32.vlgmr.msra.gmra.mrb[38].mxu1 %vm3632_vm9, %v3706_v47 }
 0x8e2   :  { %v3785_v20 = vpop.f32.mrb[38].mxu1 }
 0x8e3   :  { %v3786_v40 = vadd.f32 %v3968_v57, %v3785_v20  ;;  %v4268_v1 = vpop.f32.mrb[39].mxu1 }
 0x8e5   :  { %3790 = vst.msk [vmem:[#allocation7] sm:$0x3] %vm3789_vm10, %v3786_v40 }
 0x8e6   :  { %4355 = shalt.err (!%p4352_p4)
}
 0x8e7   :  { %s4356_s29 = scalar_lea.hbm %s7339_s2, 32 }
 0x8e8   :  { %p4357_p5 = scmp.ne.s32.totalorder %s7339_s2, %s4356_s29  ;;  %p4360_p6 = scmp.lt.u32.totalorder %s4356_s29, %s7339_s2 }
 0x8ea   :  { %p4362_p7 = pnand %p4360_p6, %p4357_p5 }
 0x8ec   :  { %4365 = shalt.err (!%p4362_p7)
}
 0x8ed   :  { %3800 = dma.vmem_to_hbm [thread:$0]  %s3798_s24, 32, %s7339_s2, [#allocation8]  }
 0x8ee   :  { %4366 = dma.done.wait [#allocation8], 32  }
 0x8ef   :  { %4367 = vsyncadd [#allocation8], 4294967264 }
 0x8f0   :  { %3804 = vsyncpa [#allocation8], 1 }

</bundles_post_ra>
